<compile_context>
chip_gen: v7x
topology: tpu7x:2x2x1
jax: 0.10.0
libtpu: 0.0.40
codegen_flags: <defaults>
</compile_context>

<pallas_src>
import functools

import jax
import jax.numpy as jnp
from jax import lax
from jax.experimental import pallas as pl
from jax.experimental.pallas import tpu as pltpu

KSIZE = 7
PAD = KSIZE // 2  # 3


def _round_up(v, m):
    return (v + m - 1) // m * m


def _spatial_attn_kernel(w_ref, x_ref, o_ref, pad_ref):
    """One batch-block per grid step.

    w_ref  : SMEM (2*7*7,) flattened conv weights, layout [c, ki, kj]
    x_ref  : VMEM (bb, C, H, W) input block
    o_ref  : VMEM (bb, 1, H, W) output block
    pad_ref: VMEM (2, Hp, Wp) scratch.  Rows [PAD, PAD+H) x cols [0, W) hold the
             [avg, max] maps; everything else stays zero.  Hp is a multiple of 8
             and Wp a multiple of 128 (>= W + 2*PAD), so band loads are full-lane
             and pltpu.roll lane shifts wrap only into the zero padding.
    """
    bb, C, H, W = x_ref.shape
    _, Hp, Wp = pad_ref.shape
    inv_c = jnp.float32(1.0 / C)

    # Hoist the 98 scalar weight reads out of the batch loop (SMEM scalar slot).
    wts = [w_ref[i] for i in range(2 * KSIZE * KSIZE)]

    # Zero the scratch once per grid step: the interior is fully overwritten for
    # every image below, only the halo needs to stay zero.  (Not gated on
    # program_id == 0 so it remains correct if the "parallel" grid axis is split
    # across TensorCores, each with its own scratch instance.)
    pad_ref[...] = jnp.zeros_like(pad_ref)

    for b in range(bb):
        # ---- fused single-pass channel mean + max (one read of x) ----
        x0 = x_ref[b, 0].astype(jnp.float32)
        if C <= 32:
            s, m = x0, x0
            for c in range(1, C):
                xc = x_ref[b, c].astype(jnp.float32)
                s = s + xc
                m = jnp.maximum(m, xc)
        else:
            def body(c, carry):
                cs, cm = carry
                xc = x_ref[b, c].astype(jnp.float32)
                return cs + xc, jnp.maximum(cm, xc)
            s, m = lax.fori_loop(1, C, body, (x0, x0), unroll=8)
        avg = s * inv_c

        # ---- write the two maps into the zero-padded scratch interior ----
        pad_ref[0, PAD:PAD + H, 0:W] = avg
        pad_ref[1, PAD:PAD + H, 0:W] = m

        # ---- 7x7 conv (2 -> 1, no bias): 14 full-lane band loads, lane shifts
        #      on the XLU via pltpu.roll, scalar-weighted FMAs on the VPU.
        #      Accumulate at padded lane width; cols >= W are garbage, sliced off.
        acc = jnp.zeros((H, Wp), jnp.float32)
        for ci in range(2):
            for ki in range(KSIZE):
                band = pad_ref[ci, ki:ki + H, :]            # (H, Wp) full-lane load
                for kj in range(KSIZE):
                    # tap[:, j] = band[:, j + (kj - PAD)]; wrapped columns hit the
                    # zero pad (Wp >= W + PAD), reproducing zero-padding exactly.
                    shift = (PAD - kj) % Wp
                    tap = pltpu.roll(band, shift=shift, axis=1) if shift else band
                    acc = acc + wts[ci * KSIZE * KSIZE + ki * KSIZE + kj] * tap

        o_ref[b, 0] = jax.nn.sigmoid(acc[:, 0:W]).astype(o_ref.dtype)


def _pick_batch_block(batch, per_image_bytes, target_bytes=2 * 1024 * 1024):
    """Largest divisor of `batch` whose input block stays under ~2 MiB."""
    bb = max(1, min(batch, target_bytes // max(per_image_bytes, 1)))
    while batch % bb:
        bb -= 1
    return bb


@jax.jit
def spatial_attention(x, w):
    """x: (B, C, H, W), w: (1, 2, 7, 7) -> (B, 1, H, W) (dtype of x, f32 math)."""
    B, C, H, W = x.shape
    assert w.shape == (1, 2, KSIZE, KSIZE), w.shape
    w_flat = w.reshape(-1).astype(jnp.float32)      # [c, ki, kj], channel-major

    Hp = _round_up(H + 2 * PAD, 8)                  # sublane-aligned padded height
    Wp = _round_up(W + 2 * PAD, 128)                # lane-aligned padded width
    itemsize = jnp.dtype(x.dtype).itemsize
    bb = _pick_batch_block(B, C * H * W * itemsize)

    # VMEM budget: double-buffered in/out blocks + conv scratch + slack.
    in_block = bb * C * H * W * itemsize
    out_block = bb * H * W * itemsize
    scratch_bytes = 2 * Hp * Wp * 4
    vmem_limit = int(min(max(4 * (in_block + out_block) + scratch_bytes + (1 << 20),
                             16 * 1024 * 1024),
                         64 * 1024 * 1024))

    return pl.pallas_call(
        _spatial_attn_kernel,
        out_shape=jax.ShapeDtypeStruct((B, 1, H, W), x.dtype),
        grid=(B // bb,),
        in_specs=[
            pl.BlockSpec(memory_space=pltpu.MemorySpace.SMEM),          # conv weights
            pl.BlockSpec((bb, C, H, W), lambda i: (i, 0, 0, 0)),        # input block
        ],
        out_specs=pl.BlockSpec((bb, 1, H, W), lambda i: (i, 0, 0, 0)),
        scratch_shapes=[pltpu.VMEM((2, Hp, Wp), jnp.float32)],
        compiler_params=pltpu.CompilerParams(
            dimension_semantics=("parallel",),
            vmem_limit_bytes=vmem_limit,
        ),
    )(w_flat, x)


def _reference(x, w):
    """Plain-JAX reference mirroring the PyTorch forward (for verification)."""
    avg = jnp.mean(x, axis=1, keepdims=True)
    mx = jnp.max(x, axis=1, keepdims=True)
    cat = jnp.concatenate([avg, mx], axis=1)                 # (B, 2, H, W)
    y = lax.conv_general_dilated(
        cat, w, window_strides=(1, 1), padding=((PAD, PAD), (PAD, PAD)),
        dimension_numbers=("NCHW", "OIHW", "NCHW"))
    return jax.nn.sigmoid(y)


if __name__ == "__main__":
    key = jax.random.PRNGKey(0)
    kx, kw = jax.random.split(key)

    B, C, H, W = 2, 4, 16, 16
    x = jax.random.normal(kx, (B, C, H, W), dtype=jnp.float32)
    # Deterministic conv weight, shape matches nn.Conv2d(2, 1, 7, bias=False).
    w = 0.05 * jax.random.normal(kw, (1, 2, KSIZE, KSIZE), dtype=jnp.float32)

    out = spatial_attention(x, w)
    out = jax.block_until_ready(out)

    ref = _reference(x, w)
    assert out.shape == (B, 1, H, W), out.shape
    assert jnp.allclose(out, ref, atol=1e-5, rtol=1e-5), float(jnp.max(jnp.abs(out - ref)))

    print("KERNEL_OK")
</pallas_src>

<mosaic_0001>
module attributes {stable_mosaic.version = 11 : i64} {
  func.func @_spatial_attn_kernel(%arg0: i32, %arg1: memref<98xf32, #tpu.memory_space<smem>>, %arg2: memref<2x4x16x16xf32, #tpu.memory_space<vmem>>, %arg3: memref<2x1x16x16xf32, #tpu.memory_space<vmem>>, %arg4: memref<2x24x128xf32, #tpu.memory_space<vmem>>) attributes {dimension_semantics = [#tpu.dimension_semantics<parallel>], iteration_bounds = array<i64: 1>, scalar_prefetch = 0 : i64, scratch_operands = 1 : i64, tpu.core_type = #tpu.core_type<tc>, window_params = [{transform_indices = @transform_0, window_bounds = array<i64: 98>}, {transform_indices = @transform_1, window_bounds = array<i64: 2, 4, 16, 16>}, {transform_indices = @transform_2, window_bounds = array<i64: 2, 1, 16, 16>}]} {
    %c0 = arith.constant 0 : index
    %0 = memref.load %arg1[%c0] : memref<98xf32, #tpu.memory_space<smem>>
    %c1 = arith.constant 1 : index
    %1 = memref.load %arg1[%c1] : memref<98xf32, #tpu.memory_space<smem>>
    %c2 = arith.constant 2 : index
    %2 = memref.load %arg1[%c2] : memref<98xf32, #tpu.memory_space<smem>>
    %c3 = arith.constant 3 : index
    %3 = memref.load %arg1[%c3] : memref<98xf32, #tpu.memory_space<smem>>
    %c4 = arith.constant 4 : index
    %4 = memref.load %arg1[%c4] : memref<98xf32, #tpu.memory_space<smem>>
    %c5 = arith.constant 5 : index
    %5 = memref.load %arg1[%c5] : memref<98xf32, #tpu.memory_space<smem>>
    %c6 = arith.constant 6 : index
    %6 = memref.load %arg1[%c6] : memref<98xf32, #tpu.memory_space<smem>>
    %c7 = arith.constant 7 : index
    %7 = memref.load %arg1[%c7] : memref<98xf32, #tpu.memory_space<smem>>
    %c8 = arith.constant 8 : index
    %8 = memref.load %arg1[%c8] : memref<98xf32, #tpu.memory_space<smem>>
    %c9 = arith.constant 9 : index
    %9 = memref.load %arg1[%c9] : memref<98xf32, #tpu.memory_space<smem>>
    %c10 = arith.constant 10 : index
    %10 = memref.load %arg1[%c10] : memref<98xf32, #tpu.memory_space<smem>>
    %c11 = arith.constant 11 : index
    %11 = memref.load %arg1[%c11] : memref<98xf32, #tpu.memory_space<smem>>
    %c12 = arith.constant 12 : index
    %12 = memref.load %arg1[%c12] : memref<98xf32, #tpu.memory_space<smem>>
    %c13 = arith.constant 13 : index
    %13 = memref.load %arg1[%c13] : memref<98xf32, #tpu.memory_space<smem>>
    %c14 = arith.constant 14 : index
    %14 = memref.load %arg1[%c14] : memref<98xf32, #tpu.memory_space<smem>>
    %c15 = arith.constant 15 : index
    %15 = memref.load %arg1[%c15] : memref<98xf32, #tpu.memory_space<smem>>
    %c16 = arith.constant 16 : index
    %16 = memref.load %arg1[%c16] : memref<98xf32, #tpu.memory_space<smem>>
    %c17 = arith.constant 17 : index
    %17 = memref.load %arg1[%c17] : memref<98xf32, #tpu.memory_space<smem>>
    %c18 = arith.constant 18 : index
    %18 = memref.load %arg1[%c18] : memref<98xf32, #tpu.memory_space<smem>>
    %c19 = arith.constant 19 : index
    %19 = memref.load %arg1[%c19] : memref<98xf32, #tpu.memory_space<smem>>
    %c20 = arith.constant 20 : index
    %20 = memref.load %arg1[%c20] : memref<98xf32, #tpu.memory_space<smem>>
    %c21 = arith.constant 21 : index
    %21 = memref.load %arg1[%c21] : memref<98xf32, #tpu.memory_space<smem>>
    %c22 = arith.constant 22 : index
    %22 = memref.load %arg1[%c22] : memref<98xf32, #tpu.memory_space<smem>>
    %c23 = arith.constant 23 : index
    %23 = memref.load %arg1[%c23] : memref<98xf32, #tpu.memory_space<smem>>
    %c24 = arith.constant 24 : index
    %24 = memref.load %arg1[%c24] : memref<98xf32, #tpu.memory_space<smem>>
    %c25 = arith.constant 25 : index
    %25 = memref.load %arg1[%c25] : memref<98xf32, #tpu.memory_space<smem>>
    %c26 = arith.constant 26 : index
    %26 = memref.load %arg1[%c26] : memref<98xf32, #tpu.memory_space<smem>>
    %c27 = arith.constant 27 : index
    %27 = memref.load %arg1[%c27] : memref<98xf32, #tpu.memory_space<smem>>
    %c28 = arith.constant 28 : index
    %28 = memref.load %arg1[%c28] : memref<98xf32, #tpu.memory_space<smem>>
    %c29 = arith.constant 29 : index
    %29 = memref.load %arg1[%c29] : memref<98xf32, #tpu.memory_space<smem>>
    %c30 = arith.constant 30 : index
    %30 = memref.load %arg1[%c30] : memref<98xf32, #tpu.memory_space<smem>>
    %c31 = arith.constant 31 : index
    %31 = memref.load %arg1[%c31] : memref<98xf32, #tpu.memory_space<smem>>
    %c32 = arith.constant 32 : index
    %32 = memref.load %arg1[%c32] : memref<98xf32, #tpu.memory_space<smem>>
    %c33 = arith.constant 33 : index
    %33 = memref.load %arg1[%c33] : memref<98xf32, #tpu.memory_space<smem>>
    %c34 = arith.constant 34 : index
    %34 = memref.load %arg1[%c34] : memref<98xf32, #tpu.memory_space<smem>>
    %c35 = arith.constant 35 : index
    %35 = memref.load %arg1[%c35] : memref<98xf32, #tpu.memory_space<smem>>
    %c36 = arith.constant 36 : index
    %36 = memref.load %arg1[%c36] : memref<98xf32, #tpu.memory_space<smem>>
    %c37 = arith.constant 37 : index
    %37 = memref.load %arg1[%c37] : memref<98xf32, #tpu.memory_space<smem>>
    %c38 = arith.constant 38 : index
    %38 = memref.load %arg1[%c38] : memref<98xf32, #tpu.memory_space<smem>>
    %c39 = arith.constant 39 : index
    %39 = memref.load %arg1[%c39] : memref<98xf32, #tpu.memory_space<smem>>
    %c40 = arith.constant 40 : index
    %40 = memref.load %arg1[%c40] : memref<98xf32, #tpu.memory_space<smem>>
    %c41 = arith.constant 41 : index
    %41 = memref.load %arg1[%c41] : memref<98xf32, #tpu.memory_space<smem>>
    %c42 = arith.constant 42 : index
    %42 = memref.load %arg1[%c42] : memref<98xf32, #tpu.memory_space<smem>>
    %c43 = arith.constant 43 : index
    %43 = memref.load %arg1[%c43] : memref<98xf32, #tpu.memory_space<smem>>
    %c44 = arith.constant 44 : index
    %44 = memref.load %arg1[%c44] : memref<98xf32, #tpu.memory_space<smem>>
    %c45 = arith.constant 45 : index
    %45 = memref.load %arg1[%c45] : memref<98xf32, #tpu.memory_space<smem>>
    %c46 = arith.constant 46 : index
    %46 = memref.load %arg1[%c46] : memref<98xf32, #tpu.memory_space<smem>>
    %c47 = arith.constant 47 : index
    %47 = memref.load %arg1[%c47] : memref<98xf32, #tpu.memory_space<smem>>
    %c48 = arith.constant 48 : index
    %48 = memref.load %arg1[%c48] : memref<98xf32, #tpu.memory_space<smem>>
    %c49 = arith.constant 49 : index
    %49 = memref.load %arg1[%c49] : memref<98xf32, #tpu.memory_space<smem>>
    %c50 = arith.constant 50 : index
    %50 = memref.load %arg1[%c50] : memref<98xf32, #tpu.memory_space<smem>>
    %c51 = arith.constant 51 : index
    %51 = memref.load %arg1[%c51] : memref<98xf32, #tpu.memory_space<smem>>
    %c52 = arith.constant 52 : index
    %52 = memref.load %arg1[%c52] : memref<98xf32, #tpu.memory_space<smem>>
    %c53 = arith.constant 53 : index
    %53 = memref.load %arg1[%c53] : memref<98xf32, #tpu.memory_space<smem>>
    %c54 = arith.constant 54 : index
    %54 = memref.load %arg1[%c54] : memref<98xf32, #tpu.memory_space<smem>>
    %c55 = arith.constant 55 : index
    %55 = memref.load %arg1[%c55] : memref<98xf32, #tpu.memory_space<smem>>
    %c56 = arith.constant 56 : index
    %56 = memref.load %arg1[%c56] : memref<98xf32, #tpu.memory_space<smem>>
    %c57 = arith.constant 57 : index
    %57 = memref.load %arg1[%c57] : memref<98xf32, #tpu.memory_space<smem>>
    %c58 = arith.constant 58 : index
    %58 = memref.load %arg1[%c58] : memref<98xf32, #tpu.memory_space<smem>>
    %c59 = arith.constant 59 : index
    %59 = memref.load %arg1[%c59] : memref<98xf32, #tpu.memory_space<smem>>
    %c60 = arith.constant 60 : index
    %60 = memref.load %arg1[%c60] : memref<98xf32, #tpu.memory_space<smem>>
    %c61 = arith.constant 61 : index
    %61 = memref.load %arg1[%c61] : memref<98xf32, #tpu.memory_space<smem>>
    %c62 = arith.constant 62 : index
    %62 = memref.load %arg1[%c62] : memref<98xf32, #tpu.memory_space<smem>>
    %c63 = arith.constant 63 : index
    %63 = memref.load %arg1[%c63] : memref<98xf32, #tpu.memory_space<smem>>
    %c64 = arith.constant 64 : index
    %64 = memref.load %arg1[%c64] : memref<98xf32, #tpu.memory_space<smem>>
    %c65 = arith.constant 65 : index
    %65 = memref.load %arg1[%c65] : memref<98xf32, #tpu.memory_space<smem>>
    %c66 = arith.constant 66 : index
    %66 = memref.load %arg1[%c66] : memref<98xf32, #tpu.memory_space<smem>>
    %c67 = arith.constant 67 : index
    %67 = memref.load %arg1[%c67] : memref<98xf32, #tpu.memory_space<smem>>
    %c68 = arith.constant 68 : index
    %68 = memref.load %arg1[%c68] : memref<98xf32, #tpu.memory_space<smem>>
    %c69 = arith.constant 69 : index
    %69 = memref.load %arg1[%c69] : memref<98xf32, #tpu.memory_space<smem>>
    %c70 = arith.constant 70 : index
    %70 = memref.load %arg1[%c70] : memref<98xf32, #tpu.memory_space<smem>>
    %c71 = arith.constant 71 : index
    %71 = memref.load %arg1[%c71] : memref<98xf32, #tpu.memory_space<smem>>
    %c72 = arith.constant 72 : index
    %72 = memref.load %arg1[%c72] : memref<98xf32, #tpu.memory_space<smem>>
    %c73 = arith.constant 73 : index
    %73 = memref.load %arg1[%c73] : memref<98xf32, #tpu.memory_space<smem>>
    %c74 = arith.constant 74 : index
    %74 = memref.load %arg1[%c74] : memref<98xf32, #tpu.memory_space<smem>>
    %c75 = arith.constant 75 : index
    %75 = memref.load %arg1[%c75] : memref<98xf32, #tpu.memory_space<smem>>
    %c76 = arith.constant 76 : index
    %76 = memref.load %arg1[%c76] : memref<98xf32, #tpu.memory_space<smem>>
    %c77 = arith.constant 77 : index
    %77 = memref.load %arg1[%c77] : memref<98xf32, #tpu.memory_space<smem>>
    %c78 = arith.constant 78 : index
    %78 = memref.load %arg1[%c78] : memref<98xf32, #tpu.memory_space<smem>>
    %c79 = arith.constant 79 : index
    %79 = memref.load %arg1[%c79] : memref<98xf32, #tpu.memory_space<smem>>
    %c80 = arith.constant 80 : index
    %80 = memref.load %arg1[%c80] : memref<98xf32, #tpu.memory_space<smem>>
    %c81 = arith.constant 81 : index
    %81 = memref.load %arg1[%c81] : memref<98xf32, #tpu.memory_space<smem>>
    %c82 = arith.constant 82 : index
    %82 = memref.load %arg1[%c82] : memref<98xf32, #tpu.memory_space<smem>>
    %c83 = arith.constant 83 : index
    %83 = memref.load %arg1[%c83] : memref<98xf32, #tpu.memory_space<smem>>
    %c84 = arith.constant 84 : index
    %84 = memref.load %arg1[%c84] : memref<98xf32, #tpu.memory_space<smem>>
    %c85 = arith.constant 85 : index
    %85 = memref.load %arg1[%c85] : memref<98xf32, #tpu.memory_space<smem>>
    %c86 = arith.constant 86 : index
    %86 = memref.load %arg1[%c86] : memref<98xf32, #tpu.memory_space<smem>>
    %c87 = arith.constant 87 : index
    %87 = memref.load %arg1[%c87] : memref<98xf32, #tpu.memory_space<smem>>
    %c88 = arith.constant 88 : index
    %88 = memref.load %arg1[%c88] : memref<98xf32, #tpu.memory_space<smem>>
    %c89 = arith.constant 89 : index
    %89 = memref.load %arg1[%c89] : memref<98xf32, #tpu.memory_space<smem>>
    %c90 = arith.constant 90 : index
    %90 = memref.load %arg1[%c90] : memref<98xf32, #tpu.memory_space<smem>>
    %c91 = arith.constant 91 : index
    %91 = memref.load %arg1[%c91] : memref<98xf32, #tpu.memory_space<smem>>
    %c92 = arith.constant 92 : index
    %92 = memref.load %arg1[%c92] : memref<98xf32, #tpu.memory_space<smem>>
    %c93 = arith.constant 93 : index
    %93 = memref.load %arg1[%c93] : memref<98xf32, #tpu.memory_space<smem>>
    %c94 = arith.constant 94 : index
    %94 = memref.load %arg1[%c94] : memref<98xf32, #tpu.memory_space<smem>>
    %c95 = arith.constant 95 : index
    %95 = memref.load %arg1[%c95] : memref<98xf32, #tpu.memory_space<smem>>
    %c96 = arith.constant 96 : index
    %96 = memref.load %arg1[%c96] : memref<98xf32, #tpu.memory_space<smem>>
    %c97 = arith.constant 97 : index
    %97 = memref.load %arg1[%c97] : memref<98xf32, #tpu.memory_space<smem>>
    %cst = arith.constant 0.000000e+00 : f32
    %98 = vector.broadcast %cst : f32 to vector<2x24x128xf32>
    %c0_0 = arith.constant 0 : index
    %c0_1 = arith.constant 0 : index
    %c0_2 = arith.constant 0 : index
    %99 = vector.load %arg4[%c0_0, %c0_1, %c0_2] : memref<2x24x128xf32, #tpu.memory_space<vmem>>, vector<2x24x128xf32>
    tpu.vector_store %arg4[%c0_0, %c0_1, %c0_2], %98 {strides = array<i32>} : memref<2x24x128xf32, #tpu.memory_space<vmem>>, vector<2x24x128xf32>,
    %c0_3 = arith.constant 0 : index
    %c0_4 = arith.constant 0 : index
    %c0_5 = arith.constant 0 : index
    %c0_6 = arith.constant 0 : index
    %100 = vector.load %arg2[%c0_3, %c0_4, %c0_5, %c0_6] : memref<2x4x16x16xf32, #tpu.memory_space<vmem>>, vector<1x1x16x16xf32>
    %101 = vector.shape_cast %100 : vector<1x1x16x16xf32> to vector<16x16xf32>
    %c0_7 = arith.constant 0 : index
    %c1_8 = arith.constant 1 : index
    %c0_9 = arith.constant 0 : index
    %c0_10 = arith.constant 0 : index
    %102 = vector.load %arg2[%c0_7, %c1_8, %c0_9, %c0_10] : memref<2x4x16x16xf32, #tpu.memory_space<vmem>>, vector<1x1x16x16xf32>
    %103 = vector.shape_cast %102 : vector<1x1x16x16xf32> to vector<16x16xf32>
    %104 = arith.addf %101, %103 : vector<16x16xf32>
    %105 = arith.maximumf %101, %103 : vector<16x16xf32>
    %c0_11 = arith.constant 0 : index
    %c2_12 = arith.constant 2 : index
    %c0_13 = arith.constant 0 : index
    %c0_14 = arith.constant 0 : index
    %106 = vector.load %arg2[%c0_11, %c2_12, %c0_13, %c0_14] : memref<2x4x16x16xf32, #tpu.memory_space<vmem>>, vector<1x1x16x16xf32>
    %107 = vector.shape_cast %106 : vector<1x1x16x16xf32> to vector<16x16xf32>
    %108 = arith.addf %104, %107 : vector<16x16xf32>
    %109 = arith.maximumf %105, %107 : vector<16x16xf32>
    %c0_15 = arith.constant 0 : index
    %c3_16 = arith.constant 3 : index
    %c0_17 = arith.constant 0 : index
    %c0_18 = arith.constant 0 : index
    %110 = vector.load %arg2[%c0_15, %c3_16, %c0_17, %c0_18] : memref<2x4x16x16xf32, #tpu.memory_space<vmem>>, vector<1x1x16x16xf32>
    %111 = vector.shape_cast %110 : vector<1x1x16x16xf32> to vector<16x16xf32>
    %112 = arith.addf %108, %111 : vector<16x16xf32>
    %113 = arith.maximumf %109, %111 : vector<16x16xf32>
    %cst_19 = arith.constant 2.500000e-01 : f32
    %114 = vector.broadcast %cst_19 : f32 to vector<16x16xf32>
    %115 = arith.mulf %112, %114 : vector<16x16xf32>
    %c0_20 = arith.constant 0 : index
    %c3_21 = arith.constant 3 : index
    %c0_22 = arith.constant 0 : index
    %116 = vector.load %arg4[%c0_20, %c3_21, %c0_22] : memref<2x24x128xf32, #tpu.memory_space<vmem>>, vector<1x16x16xf32>
    %117 = vector.shape_cast %116 : vector<1x16x16xf32> to vector<16x16xf32>
    %118 = vector.shape_cast %115 : vector<16x16xf32> to vector<1x16x16xf32>
    tpu.vector_store %arg4[%c0_20, %c3_21, %c0_22], %118 {strides = array<i32>} : memref<2x24x128xf32, #tpu.memory_space<vmem>>, vector<1x16x16xf32>,
    %c1_23 = arith.constant 1 : index
    %c3_24 = arith.constant 3 : index
    %c0_25 = arith.constant 0 : index
    %119 = vector.load %arg4[%c1_23, %c3_24, %c0_25] : memref<2x24x128xf32, #tpu.memory_space<vmem>>, vector<1x16x16xf32>
    %120 = vector.shape_cast %119 : vector<1x16x16xf32> to vector<16x16xf32>
    %121 = vector.shape_cast %113 : vector<16x16xf32> to vector<1x16x16xf32>
    tpu.vector_store %arg4[%c1_23, %c3_24, %c0_25], %121 {strides = array<i32>} : memref<2x24x128xf32, #tpu.memory_space<vmem>>, vector<1x16x16xf32>,
    %cst_26 = arith.constant 0.000000e+00 : f32
    %122 = vector.broadcast %cst_26 : f32 to vector<16x128xf32>
    %c0_27 = arith.constant 0 : index
    %c0_28 = arith.constant 0 : index
    %c0_29 = arith.constant 0 : index
    %123 = vector.load %arg4[%c0_27, %c0_28, %c0_29] : memref<2x24x128xf32, #tpu.memory_space<vmem>>, vector<1x16x128xf32>
    %124 = vector.shape_cast %123 : vector<1x16x128xf32> to vector<16x128xf32>
    %c3_i32 = arith.constant 3 : i32
    %125 = tpu.dynamic_rotate %124 by %c3_i32 dim 1 : vector<16x128xf32>, i32 -> vector<16x128xf32>
    %126 = vector.broadcast %0 : f32 to vector<16x128xf32>
    %127 = arith.mulf %126, %125 : vector<16x128xf32>
    %128 = arith.addf %122, %127 : vector<16x128xf32>
    %c2_i32 = arith.constant 2 : i32
    %129 = tpu.dynamic_rotate %124 by %c2_i32 dim 1 : vector<16x128xf32>, i32 -> vector<16x128xf32>
    %130 = vector.broadcast %1 : f32 to vector<16x128xf32>
    %131 = arith.mulf %130, %129 : vector<16x128xf32>
    %132 = arith.addf %128, %131 : vector<16x128xf32>
    %c1_i32 = arith.constant 1 : i32
    %133 = tpu.dynamic_rotate %124 by %c1_i32 dim 1 : vector<16x128xf32>, i32 -> vector<16x128xf32>
    %134 = vector.broadcast %2 : f32 to vector<16x128xf32>
    %135 = arith.mulf %134, %133 : vector<16x128xf32>
    %136 = arith.addf %132, %135 : vector<16x128xf32>
    %137 = vector.broadcast %3 : f32 to vector<16x128xf32>
    %138 = arith.mulf %137, %124 : vector<16x128xf32>
    %139 = arith.addf %136, %138 : vector<16x128xf32>
    %c127_i32 = arith.constant 127 : i32
    %140 = tpu.dynamic_rotate %124 by %c127_i32 dim 1 : vector<16x128xf32>, i32 -> vector<16x128xf32>
    %141 = vector.broadcast %4 : f32 to vector<16x128xf32>
    %142 = arith.mulf %141, %140 : vector<16x128xf32>
    %143 = arith.addf %139, %142 : vector<16x128xf32>
    %c126_i32 = arith.constant 126 : i32
    %144 = tpu.dynamic_rotate %124 by %c126_i32 dim 1 : vector<16x128xf32>, i32 -> vector<16x128xf32>
    %145 = vector.broadcast %5 : f32 to vector<16x128xf32>
    %146 = arith.mulf %145, %144 : vector<16x128xf32>
    %147 = arith.addf %143, %146 : vector<16x128xf32>
    %c125_i32 = arith.constant 125 : i32
    %148 = tpu.dynamic_rotate %124 by %c125_i32 dim 1 : vector<16x128xf32>, i32 -> vector<16x128xf32>
    %149 = vector.broadcast %6 : f32 to vector<16x128xf32>
    %150 = arith.mulf %149, %148 : vector<16x128xf32>
    %151 = arith.addf %147, %150 : vector<16x128xf32>
    %c0_30 = arith.constant 0 : index
    %c1_31 = arith.constant 1 : index
    %c0_32 = arith.constant 0 : index
    %152 = vector.load %arg4[%c0_30, %c1_31, %c0_32] : memref<2x24x128xf32, #tpu.memory_space<vmem>>, vector<1x16x128xf32>
    %153 = vector.shape_cast %152 : vector<1x16x128xf32> to vector<16x128xf32>
    %c3_i32_33 = arith.constant 3 : i32
    %154 = tpu.dynamic_rotate %153 by %c3_i32_33 dim 1 : vector<16x128xf32>, i32 -> vector<16x128xf32>
    %155 = vector.broadcast %7 : f32 to vector<16x128xf32>
    %156 = arith.mulf %155, %154 : vector<16x128xf32>
    %157 = arith.addf %151, %156 : vector<16x128xf32>
    %c2_i32_34 = arith.constant 2 : i32
    %158 = tpu.dynamic_rotate %153 by %c2_i32_34 dim 1 : vector<16x128xf32>, i32 -> vector<16x128xf32>
    %159 = vector.broadcast %8 : f32 to vector<16x128xf32>
    %160 = arith.mulf %159, %158 : vector<16x128xf32>
    %161 = arith.addf %157, %160 : vector<16x128xf32>
    %c1_i32_35 = arith.constant 1 : i32
    %162 = tpu.dynamic_rotate %153 by %c1_i32_35 dim 1 : vector<16x128xf32>, i32 -> vector<16x128xf32>
    %163 = vector.broadcast %9 : f32 to vector<16x128xf32>
    %164 = arith.mulf %163, %162 : vector<16x128xf32>
    %165 = arith.addf %161, %164 : vector<16x128xf32>
    %166 = vector.broadcast %10 : f32 to vector<16x128xf32>
    %167 = arith.mulf %166, %153 : vector<16x128xf32>
    %168 = arith.addf %165, %167 : vector<16x128xf32>
    %c127_i32_36 = arith.constant 127 : i32
    %169 = tpu.dynamic_rotate %153 by %c127_i32_36 dim 1 : vector<16x128xf32>, i32 -> vector<16x128xf32>
    %170 = vector.broadcast %11 : f32 to vector<16x128xf32>
    %171 = arith.mulf %170, %169 : vector<16x128xf32>
    %172 = arith.addf %168, %171 : vector<16x128xf32>
    %c126_i32_37 = arith.constant 126 : i32
    %173 = tpu.dynamic_rotate %153 by %c126_i32_37 dim 1 : vector<16x128xf32>, i32 -> vector<16x128xf32>
    %174 = vector.broadcast %12 : f32 to vector<16x128xf32>
    %175 = arith.mulf %174, %173 : vector<16x128xf32>
    %176 = arith.addf %172, %175 : vector<16x128xf32>
    %c125_i32_38 = arith.constant 125 : i32
    %177 = tpu.dynamic_rotate %153 by %c125_i32_38 dim 1 : vector<16x128xf32>, i32 -> vector<16x128xf32>
    %178 = vector.broadcast %13 : f32 to vector<16x128xf32>
    %179 = arith.mulf %178, %177 : vector<16x128xf32>
    %180 = arith.addf %176, %179 : vector<16x128xf32>
    %c0_39 = arith.constant 0 : index
    %c2_40 = arith.constant 2 : index
    %c0_41 = arith.constant 0 : index
    %181 = vector.load %arg4[%c0_39, %c2_40, %c0_41] : memref<2x24x128xf32, #tpu.memory_space<vmem>>, vector<1x16x128xf32>
    %182 = vector.shape_cast %181 : vector<1x16x128xf32> to vector<16x128xf32>
    %c3_i32_42 = arith.constant 3 : i32
    %183 = tpu.dynamic_rotate %182 by %c3_i32_42 dim 1 : vector<16x128xf32>, i32 -> vector<16x128xf32>
    %184 = vector.broadcast %14 : f32 to vector<16x128xf32>
    %185 = arith.mulf %184, %183 : vector<16x128xf32>
    %186 = arith.addf %180, %185 : vector<16x128xf32>
    %c2_i32_43 = arith.constant 2 : i32
    %187 = tpu.dynamic_rotate %182 by %c2_i32_43 dim 1 : vector<16x128xf32>, i32 -> vector<16x128xf32>
    %188 = vector.broadcast %15 : f32 to vector<16x128xf32>
    %189 = arith.mulf %188, %187 : vector<16x128xf32>
    %190 = arith.addf %186, %189 : vector<16x128xf32>
    %c1_i32_44 = arith.constant 1 : i32
    %191 = tpu.dynamic_rotate %182 by %c1_i32_44 dim 1 : vector<16x128xf32>, i32 -> vector<16x128xf32>
    %192 = vector.broadcast %16 : f32 to vector<16x128xf32>
    %193 = arith.mulf %192, %191 : vector<16x128xf32>
    %194 = arith.addf %190, %193 : vector<16x128xf32>
    %195 = vector.broadcast %17 : f32 to vector<16x128xf32>
    %196 = arith.mulf %195, %182 : vector<16x128xf32>
    %197 = arith.addf %194, %196 : vector<16x128xf32>
    %c127_i32_45 = arith.constant 127 : i32
    %198 = tpu.dynamic_rotate %182 by %c127_i32_45 dim 1 : vector<16x128xf32>, i32 -> vector<16x128xf32>
    %199 = vector.broadcast %18 : f32 to vector<16x128xf32>
    %200 = arith.mulf %199, %198 : vector<16x128xf32>
    %201 = arith.addf %197, %200 : vector<16x128xf32>
    %c126_i32_46 = arith.constant 126 : i32
    %202 = tpu.dynamic_rotate %182 by %c126_i32_46 dim 1 : vector<16x128xf32>, i32 -> vector<16x128xf32>
    %203 = vector.broadcast %19 : f32 to vector<16x128xf32>
    %204 = arith.mulf %203, %202 : vector<16x128xf32>
    %205 = arith.addf %201, %204 : vector<16x128xf32>
    %c125_i32_47 = arith.constant 125 : i32
    %206 = tpu.dynamic_rotate %182 by %c125_i32_47 dim 1 : vector<16x128xf32>, i32 -> vector<16x128xf32>
    %207 = vector.broadcast %20 : f32 to vector<16x128xf32>
    %208 = arith.mulf %207, %206 : vector<16x128xf32>
    %209 = arith.addf %205, %208 : vector<16x128xf32>
    %c0_48 = arith.constant 0 : index
    %c3_49 = arith.constant 3 : index
    %c0_50 = arith.constant 0 : index
    %210 = vector.load %arg4[%c0_48, %c3_49, %c0_50] : memref<2x24x128xf32, #tpu.memory_space<vmem>>, vector<1x16x128xf32>
    %211 = vector.shape_cast %210 : vector<1x16x128xf32> to vector<16x128xf32>
    %c3_i32_51 = arith.constant 3 : i32
    %212 = tpu.dynamic_rotate %211 by %c3_i32_51 dim 1 : vector<16x128xf32>, i32 -> vector<16x128xf32>
    %213 = vector.broadcast %21 : f32 to vector<16x128xf32>
    %214 = arith.mulf %213, %212 : vector<16x128xf32>
    %215 = arith.addf %209, %214 : vector<16x128xf32>
    %c2_i32_52 = arith.constant 2 : i32
    %216 = tpu.dynamic_rotate %211 by %c2_i32_52 dim 1 : vector<16x128xf32>, i32 -> vector<16x128xf32>
    %217 = vector.broadcast %22 : f32 to vector<16x128xf32>
    %218 = arith.mulf %217, %216 : vector<16x128xf32>
    %219 = arith.addf %215, %218 : vector<16x128xf32>
    %c1_i32_53 = arith.constant 1 : i32
    %220 = tpu.dynamic_rotate %211 by %c1_i32_53 dim 1 : vector<16x128xf32>, i32 -> vector<16x128xf32>
    %221 = vector.broadcast %23 : f32 to vector<16x128xf32>
    %222 = arith.mulf %221, %220 : vector<16x128xf32>
    %223 = arith.addf %219, %222 : vector<16x128xf32>
    %224 = vector.broadcast %24 : f32 to vector<16x128xf32>
    %225 = arith.mulf %224, %211 : vector<16x128xf32>
    %226 = arith.addf %223, %225 : vector<16x128xf32>
    %c127_i32_54 = arith.constant 127 : i32
    %227 = tpu.dynamic_rotate %211 by %c127_i32_54 dim 1 : vector<16x128xf32>, i32 -> vector<16x128xf32>
    %228 = vector.broadcast %25 : f32 to vector<16x128xf32>
    %229 = arith.mulf %228, %227 : vector<16x128xf32>
    %230 = arith.addf %226, %229 : vector<16x128xf32>
    %c126_i32_55 = arith.constant 126 : i32
    %231 = tpu.dynamic_rotate %211 by %c126_i32_55 dim 1 : vector<16x128xf32>, i32 -> vector<16x128xf32>
    %232 = vector.broadcast %26 : f32 to vector<16x128xf32>
    %233 = arith.mulf %232, %231 : vector<16x128xf32>
    %234 = arith.addf %230, %233 : vector<16x128xf32>
    %c125_i32_56 = arith.constant 125 : i32
    %235 = tpu.dynamic_rotate %211 by %c125_i32_56 dim 1 : vector<16x128xf32>, i32 -> vector<16x128xf32>
    %236 = vector.broadcast %27 : f32 to vector<16x128xf32>
    %237 = arith.mulf %236, %235 : vector<16x128xf32>
    %238 = arith.addf %234, %237 : vector<16x128xf32>
    %c0_57 = arith.constant 0 : index
    %c4_58 = arith.constant 4 : index
    %c0_59 = arith.constant 0 : index
    %239 = vector.load %arg4[%c0_57, %c4_58, %c0_59] : memref<2x24x128xf32, #tpu.memory_space<vmem>>, vector<1x16x128xf32>
    %240 = vector.shape_cast %239 : vector<1x16x128xf32> to vector<16x128xf32>
    %c3_i32_60 = arith.constant 3 : i32
    %241 = tpu.dynamic_rotate %240 by %c3_i32_60 dim 1 : vector<16x128xf32>, i32 -> vector<16x128xf32>
    %242 = vector.broadcast %28 : f32 to vector<16x128xf32>
    %243 = arith.mulf %242, %241 : vector<16x128xf32>
    %244 = arith.addf %238, %243 : vector<16x128xf32>
    %c2_i32_61 = arith.constant 2 : i32
    %245 = tpu.dynamic_rotate %240 by %c2_i32_61 dim 1 : vector<16x128xf32>, i32 -> vector<16x128xf32>
    %246 = vector.broadcast %29 : f32 to vector<16x128xf32>
    %247 = arith.mulf %246, %245 : vector<16x128xf32>
    %248 = arith.addf %244, %247 : vector<16x128xf32>
    %c1_i32_62 = arith.constant 1 : i32
    %249 = tpu.dynamic_rotate %240 by %c1_i32_62 dim 1 : vector<16x128xf32>, i32 -> vector<16x128xf32>
    %250 = vector.broadcast %30 : f32 to vector<16x128xf32>
    %251 = arith.mulf %250, %249 : vector<16x128xf32>
    %252 = arith.addf %248, %251 : vector<16x128xf32>
    %253 = vector.broadcast %31 : f32 to vector<16x128xf32>
    %254 = arith.mulf %253, %240 : vector<16x128xf32>
    %255 = arith.addf %252, %254 : vector<16x128xf32>
    %c127_i32_63 = arith.constant 127 : i32
    %256 = tpu.dynamic_rotate %240 by %c127_i32_63 dim 1 : vector<16x128xf32>, i32 -> vector<16x128xf32>
    %257 = vector.broadcast %32 : f32 to vector<16x128xf32>
    %258 = arith.mulf %257, %256 : vector<16x128xf32>
    %259 = arith.addf %255, %258 : vector<16x128xf32>
    %c126_i32_64 = arith.constant 126 : i32
    %260 = tpu.dynamic_rotate %240 by %c126_i32_64 dim 1 : vector<16x128xf32>, i32 -> vector<16x128xf32>
    %261 = vector.broadcast %33 : f32 to vector<16x128xf32>
    %262 = arith.mulf %261, %260 : vector<16x128xf32>
    %263 = arith.addf %259, %262 : vector<16x128xf32>
    %c125_i32_65 = arith.constant 125 : i32
    %264 = tpu.dynamic_rotate %240 by %c125_i32_65 dim 1 : vector<16x128xf32>, i32 -> vector<16x128xf32>
    %265 = vector.broadcast %34 : f32 to vector<16x128xf32>
    %266 = arith.mulf %265, %264 : vector<16x128xf32>
    %267 = arith.addf %263, %266 : vector<16x128xf32>
    %c0_66 = arith.constant 0 : index
    %c5_67 = arith.constant 5 : index
    %c0_68 = arith.constant 0 : index
    %268 = vector.load %arg4[%c0_66, %c5_67, %c0_68] : memref<2x24x128xf32, #tpu.memory_space<vmem>>, vector<1x16x128xf32>
    %269 = vector.shape_cast %268 : vector<1x16x128xf32> to vector<16x128xf32>
    %c3_i32_69 = arith.constant 3 : i32
    %270 = tpu.dynamic_rotate %269 by %c3_i32_69 dim 1 : vector<16x128xf32>, i32 -> vector<16x128xf32>
    %271 = vector.broadcast %35 : f32 to vector<16x128xf32>
    %272 = arith.mulf %271, %270 : vector<16x128xf32>
    %273 = arith.addf %267, %272 : vector<16x128xf32>
    %c2_i32_70 = arith.constant 2 : i32
    %274 = tpu.dynamic_rotate %269 by %c2_i32_70 dim 1 : vector<16x128xf32>, i32 -> vector<16x128xf32>
    %275 = vector.broadcast %36 : f32 to vector<16x128xf32>
    %276 = arith.mulf %275, %274 : vector<16x128xf32>
    %277 = arith.addf %273, %276 : vector<16x128xf32>
    %c1_i32_71 = arith.constant 1 : i32
    %278 = tpu.dynamic_rotate %269 by %c1_i32_71 dim 1 : vector<16x128xf32>, i32 -> vector<16x128xf32>
    %279 = vector.broadcast %37 : f32 to vector<16x128xf32>
    %280 = arith.mulf %279, %278 : vector<16x128xf32>
    %281 = arith.addf %277, %280 : vector<16x128xf32>
    %282 = vector.broadcast %38 : f32 to vector<16x128xf32>
    %283 = arith.mulf %282, %269 : vector<16x128xf32>
    %284 = arith.addf %281, %283 : vector<16x128xf32>
    %c127_i32_72 = arith.constant 127 : i32
    %285 = tpu.dynamic_rotate %269 by %c127_i32_72 dim 1 : vector<16x128xf32>, i32 -> vector<16x128xf32>
    %286 = vector.broadcast %39 : f32 to vector<16x128xf32>
    %287 = arith.mulf %286, %285 : vector<16x128xf32>
    %288 = arith.addf %284, %287 : vector<16x128xf32>
    %c126_i32_73 = arith.constant 126 : i32
    %289 = tpu.dynamic_rotate %269 by %c126_i32_73 dim 1 : vector<16x128xf32>, i32 -> vector<16x128xf32>
    %290 = vector.broadcast %40 : f32 to vector<16x128xf32>
    %291 = arith.mulf %290, %289 : vector<16x128xf32>
    %292 = arith.addf %288, %291 : vector<16x128xf32>
    %c125_i32_74 = arith.constant 125 : i32
    %293 = tpu.dynamic_rotate %269 by %c125_i32_74 dim 1 : vector<16x128xf32>, i32 -> vector<16x128xf32>
    %294 = vector.broadcast %41 : f32 to vector<16x128xf32>
    %295 = arith.mulf %294, %293 : vector<16x128xf32>
    %296 = arith.addf %292, %295 : vector<16x128xf32>
    %c0_75 = arith.constant 0 : index
    %c6_76 = arith.constant 6 : index
    %c0_77 = arith.constant 0 : index
    %297 = vector.load %arg4[%c0_75, %c6_76, %c0_77] : memref<2x24x128xf32, #tpu.memory_space<vmem>>, vector<1x16x128xf32>
    %298 = vector.shape_cast %297 : vector<1x16x128xf32> to vector<16x128xf32>
    %c3_i32_78 = arith.constant 3 : i32
    %299 = tpu.dynamic_rotate %298 by %c3_i32_78 dim 1 : vector<16x128xf32>, i32 -> vector<16x128xf32>
    %300 = vector.broadcast %42 : f32 to vector<16x128xf32>
    %301 = arith.mulf %300, %299 : vector<16x128xf32>
    %302 = arith.addf %296, %301 : vector<16x128xf32>
    %c2_i32_79 = arith.constant 2 : i32
    %303 = tpu.dynamic_rotate %298 by %c2_i32_79 dim 1 : vector<16x128xf32>, i32 -> vector<16x128xf32>
    %304 = vector.broadcast %43 : f32 to vector<16x128xf32>
    %305 = arith.mulf %304, %303 : vector<16x128xf32>
    %306 = arith.addf %302, %305 : vector<16x128xf32>
    %c1_i32_80 = arith.constant 1 : i32
    %307 = tpu.dynamic_rotate %298 by %c1_i32_80 dim 1 : vector<16x128xf32>, i32 -> vector<16x128xf32>
    %308 = vector.broadcast %44 : f32 to vector<16x128xf32>
    %309 = arith.mulf %308, %307 : vector<16x128xf32>
    %310 = arith.addf %306, %309 : vector<16x128xf32>
    %311 = vector.broadcast %45 : f32 to vector<16x128xf32>
    %312 = arith.mulf %311, %298 : vector<16x128xf32>
    %313 = arith.addf %310, %312 : vector<16x128xf32>
    %c127_i32_81 = arith.constant 127 : i32
    %314 = tpu.dynamic_rotate %298 by %c127_i32_81 dim 1 : vector<16x128xf32>, i32 -> vector<16x128xf32>
    %315 = vector.broadcast %46 : f32 to vector<16x128xf32>
    %316 = arith.mulf %315, %314 : vector<16x128xf32>
    %317 = arith.addf %313, %316 : vector<16x128xf32>
    %c126_i32_82 = arith.constant 126 : i32
    %318 = tpu.dynamic_rotate %298 by %c126_i32_82 dim 1 : vector<16x128xf32>, i32 -> vector<16x128xf32>
    %319 = vector.broadcast %47 : f32 to vector<16x128xf32>
    %320 = arith.mulf %319, %318 : vector<16x128xf32>
    %321 = arith.addf %317, %320 : vector<16x128xf32>
    %c125_i32_83 = arith.constant 125 : i32
    %322 = tpu.dynamic_rotate %298 by %c125_i32_83 dim 1 : vector<16x128xf32>, i32 -> vector<16x128xf32>
    %323 = vector.broadcast %48 : f32 to vector<16x128xf32>
    %324 = arith.mulf %323, %322 : vector<16x128xf32>
    %325 = arith.addf %321, %324 : vector<16x128xf32>
    %c1_84 = arith.constant 1 : index
    %c0_85 = arith.constant 0 : index
    %c0_86 = arith.constant 0 : index
    %326 = vector.load %arg4[%c1_84, %c0_85, %c0_86] : memref<2x24x128xf32, #tpu.memory_space<vmem>>, vector<1x16x128xf32>
    %327 = vector.shape_cast %326 : vector<1x16x128xf32> to vector<16x128xf32>
    %c3_i32_87 = arith.constant 3 : i32
    %328 = tpu.dynamic_rotate %327 by %c3_i32_87 dim 1 : vector<16x128xf32>, i32 -> vector<16x128xf32>
    %329 = vector.broadcast %49 : f32 to vector<16x128xf32>
    %330 = arith.mulf %329, %328 : vector<16x128xf32>
    %331 = arith.addf %325, %330 : vector<16x128xf32>
    %c2_i32_88 = arith.constant 2 : i32
    %332 = tpu.dynamic_rotate %327 by %c2_i32_88 dim 1 : vector<16x128xf32>, i32 -> vector<16x128xf32>
    %333 = vector.broadcast %50 : f32 to vector<16x128xf32>
    %334 = arith.mulf %333, %332 : vector<16x128xf32>
    %335 = arith.addf %331, %334 : vector<16x128xf32>
    %c1_i32_89 = arith.constant 1 : i32
    %336 = tpu.dynamic_rotate %327 by %c1_i32_89 dim 1 : vector<16x128xf32>, i32 -> vector<16x128xf32>
    %337 = vector.broadcast %51 : f32 to vector<16x128xf32>
    %338 = arith.mulf %337, %336 : vector<16x128xf32>
    %339 = arith.addf %335, %338 : vector<16x128xf32>
    %340 = vector.broadcast %52 : f32 to vector<16x128xf32>
    %341 = arith.mulf %340, %327 : vector<16x128xf32>
    %342 = arith.addf %339, %341 : vector<16x128xf32>
    %c127_i32_90 = arith.constant 127 : i32
    %343 = tpu.dynamic_rotate %327 by %c127_i32_90 dim 1 : vector<16x128xf32>, i32 -> vector<16x128xf32>
    %344 = vector.broadcast %53 : f32 to vector<16x128xf32>
    %345 = arith.mulf %344, %343 : vector<16x128xf32>
    %346 = arith.addf %342, %345 : vector<16x128xf32>
    %c126_i32_91 = arith.constant 126 : i32
    %347 = tpu.dynamic_rotate %327 by %c126_i32_91 dim 1 : vector<16x128xf32>, i32 -> vector<16x128xf32>
    %348 = vector.broadcast %54 : f32 to vector<16x128xf32>
    %349 = arith.mulf %348, %347 : vector<16x128xf32>
    %350 = arith.addf %346, %349 : vector<16x128xf32>
    %c125_i32_92 = arith.constant 125 : i32
    %351 = tpu.dynamic_rotate %327 by %c125_i32_92 dim 1 : vector<16x128xf32>, i32 -> vector<16x128xf32>
    %352 = vector.broadcast %55 : f32 to vector<16x128xf32>
    %353 = arith.mulf %352, %351 : vector<16x128xf32>
    %354 = arith.addf %350, %353 : vector<16x128xf32>
    %c1_93 = arith.constant 1 : index
    %c1_94 = arith.constant 1 : index
    %c0_95 = arith.constant 0 : index
    %355 = vector.load %arg4[%c1_93, %c1_94, %c0_95] : memref<2x24x128xf32, #tpu.memory_space<vmem>>, vector<1x16x128xf32>
    %356 = vector.shape_cast %355 : vector<1x16x128xf32> to vector<16x128xf32>
    %c3_i32_96 = arith.constant 3 : i32
    %357 = tpu.dynamic_rotate %356 by %c3_i32_96 dim 1 : vector<16x128xf32>, i32 -> vector<16x128xf32>
    %358 = vector.broadcast %56 : f32 to vector<16x128xf32>
    %359 = arith.mulf %358, %357 : vector<16x128xf32>
    %360 = arith.addf %354, %359 : vector<16x128xf32>
    %c2_i32_97 = arith.constant 2 : i32
    %361 = tpu.dynamic_rotate %356 by %c2_i32_97 dim 1 : vector<16x128xf32>, i32 -> vector<16x128xf32>
    %362 = vector.broadcast %57 : f32 to vector<16x128xf32>
    %363 = arith.mulf %362, %361 : vector<16x128xf32>
    %364 = arith.addf %360, %363 : vector<16x128xf32>
    %c1_i32_98 = arith.constant 1 : i32
    %365 = tpu.dynamic_rotate %356 by %c1_i32_98 dim 1 : vector<16x128xf32>, i32 -> vector<16x128xf32>
    %366 = vector.broadcast %58 : f32 to vector<16x128xf32>
    %367 = arith.mulf %366, %365 : vector<16x128xf32>
    %368 = arith.addf %364, %367 : vector<16x128xf32>
    %369 = vector.broadcast %59 : f32 to vector<16x128xf32>
    %370 = arith.mulf %369, %356 : vector<16x128xf32>
    %371 = arith.addf %368, %370 : vector<16x128xf32>
    %c127_i32_99 = arith.constant 127 : i32
    %372 = tpu.dynamic_rotate %356 by %c127_i32_99 dim 1 : vector<16x128xf32>, i32 -> vector<16x128xf32>
    %373 = vector.broadcast %60 : f32 to vector<16x128xf32>
    %374 = arith.mulf %373, %372 : vector<16x128xf32>
    %375 = arith.addf %371, %374 : vector<16x128xf32>
    %c126_i32_100 = arith.constant 126 : i32
    %376 = tpu.dynamic_rotate %356 by %c126_i32_100 dim 1 : vector<16x128xf32>, i32 -> vector<16x128xf32>
    %377 = vector.broadcast %61 : f32 to vector<16x128xf32>
    %378 = arith.mulf %377, %376 : vector<16x128xf32>
    %379 = arith.addf %375, %378 : vector<16x128xf32>
    %c125_i32_101 = arith.constant 125 : i32
    %380 = tpu.dynamic_rotate %356 by %c125_i32_101 dim 1 : vector<16x128xf32>, i32 -> vector<16x128xf32>
    %381 = vector.broadcast %62 : f32 to vector<16x128xf32>
    %382 = arith.mulf %381, %380 : vector<16x128xf32>
    %383 = arith.addf %379, %382 : vector<16x128xf32>
    %c1_102 = arith.constant 1 : index
    %c2_103 = arith.constant 2 : index
    %c0_104 = arith.constant 0 : index
    %384 = vector.load %arg4[%c1_102, %c2_103, %c0_104] : memref<2x24x128xf32, #tpu.memory_space<vmem>>, vector<1x16x128xf32>
    %385 = vector.shape_cast %384 : vector<1x16x128xf32> to vector<16x128xf32>
    %c3_i32_105 = arith.constant 3 : i32
    %386 = tpu.dynamic_rotate %385 by %c3_i32_105 dim 1 : vector<16x128xf32>, i32 -> vector<16x128xf32>
    %387 = vector.broadcast %63 : f32 to vector<16x128xf32>
    %388 = arith.mulf %387, %386 : vector<16x128xf32>
    %389 = arith.addf %383, %388 : vector<16x128xf32>
    %c2_i32_106 = arith.constant 2 : i32
    %390 = tpu.dynamic_rotate %385 by %c2_i32_106 dim 1 : vector<16x128xf32>, i32 -> vector<16x128xf32>
    %391 = vector.broadcast %64 : f32 to vector<16x128xf32>
    %392 = arith.mulf %391, %390 : vector<16x128xf32>
    %393 = arith.addf %389, %392 : vector<16x128xf32>
    %c1_i32_107 = arith.constant 1 : i32
    %394 = tpu.dynamic_rotate %385 by %c1_i32_107 dim 1 : vector<16x128xf32>, i32 -> vector<16x128xf32>
    %395 = vector.broadcast %65 : f32 to vector<16x128xf32>
    %396 = arith.mulf %395, %394 : vector<16x128xf32>
    %397 = arith.addf %393, %396 : vector<16x128xf32>
    %398 = vector.broadcast %66 : f32 to vector<16x128xf32>
    %399 = arith.mulf %398, %385 : vector<16x128xf32>
    %400 = arith.addf %397, %399 : vector<16x128xf32>
    %c127_i32_108 = arith.constant 127 : i32
    %401 = tpu.dynamic_rotate %385 by %c127_i32_108 dim 1 : vector<16x128xf32>, i32 -> vector<16x128xf32>
    %402 = vector.broadcast %67 : f32 to vector<16x128xf32>
    %403 = arith.mulf %402, %401 : vector<16x128xf32>
    %404 = arith.addf %400, %403 : vector<16x128xf32>
    %c126_i32_109 = arith.constant 126 : i32
    %405 = tpu.dynamic_rotate %385 by %c126_i32_109 dim 1 : vector<16x128xf32>, i32 -> vector<16x128xf32>
    %406 = vector.broadcast %68 : f32 to vector<16x128xf32>
    %407 = arith.mulf %406, %405 : vector<16x128xf32>
    %408 = arith.addf %404, %407 : vector<16x128xf32>
    %c125_i32_110 = arith.constant 125 : i32
    %409 = tpu.dynamic_rotate %385 by %c125_i32_110 dim 1 : vector<16x128xf32>, i32 -> vector<16x128xf32>
    %410 = vector.broadcast %69 : f32 to vector<16x128xf32>
    %411 = arith.mulf %410, %409 : vector<16x128xf32>
    %412 = arith.addf %408, %411 : vector<16x128xf32>
    %c1_111 = arith.constant 1 : index
    %c3_112 = arith.constant 3 : index
    %c0_113 = arith.constant 0 : index
    %413 = vector.load %arg4[%c1_111, %c3_112, %c0_113] : memref<2x24x128xf32, #tpu.memory_space<vmem>>, vector<1x16x128xf32>
    %414 = vector.shape_cast %413 : vector<1x16x128xf32> to vector<16x128xf32>
    %c3_i32_114 = arith.constant 3 : i32
    %415 = tpu.dynamic_rotate %414 by %c3_i32_114 dim 1 : vector<16x128xf32>, i32 -> vector<16x128xf32>
    %416 = vector.broadcast %70 : f32 to vector<16x128xf32>
    %417 = arith.mulf %416, %415 : vector<16x128xf32>
    %418 = arith.addf %412, %417 : vector<16x128xf32>
    %c2_i32_115 = arith.constant 2 : i32
    %419 = tpu.dynamic_rotate %414 by %c2_i32_115 dim 1 : vector<16x128xf32>, i32 -> vector<16x128xf32>
    %420 = vector.broadcast %71 : f32 to vector<16x128xf32>
    %421 = arith.mulf %420, %419 : vector<16x128xf32>
    %422 = arith.addf %418, %421 : vector<16x128xf32>
    %c1_i32_116 = arith.constant 1 : i32
    %423 = tpu.dynamic_rotate %414 by %c1_i32_116 dim 1 : vector<16x128xf32>, i32 -> vector<16x128xf32>
    %424 = vector.broadcast %72 : f32 to vector<16x128xf32>
    %425 = arith.mulf %424, %423 : vector<16x128xf32>
    %426 = arith.addf %422, %425 : vector<16x128xf32>
    %427 = vector.broadcast %73 : f32 to vector<16x128xf32>
    %428 = arith.mulf %427, %414 : vector<16x128xf32>
    %429 = arith.addf %426, %428 : vector<16x128xf32>
    %c127_i32_117 = arith.constant 127 : i32
    %430 = tpu.dynamic_rotate %414 by %c127_i32_117 dim 1 : vector<16x128xf32>, i32 -> vector<16x128xf32>
    %431 = vector.broadcast %74 : f32 to vector<16x128xf32>
    %432 = arith.mulf %431, %430 : vector<16x128xf32>
    %433 = arith.addf %429, %432 : vector<16x128xf32>
    %c126_i32_118 = arith.constant 126 : i32
    %434 = tpu.dynamic_rotate %414 by %c126_i32_118 dim 1 : vector<16x128xf32>, i32 -> vector<16x128xf32>
    %435 = vector.broadcast %75 : f32 to vector<16x128xf32>
    %436 = arith.mulf %435, %434 : vector<16x128xf32>
    %437 = arith.addf %433, %436 : vector<16x128xf32>
    %c125_i32_119 = arith.constant 125 : i32
    %438 = tpu.dynamic_rotate %414 by %c125_i32_119 dim 1 : vector<16x128xf32>, i32 -> vector<16x128xf32>
    %439 = vector.broadcast %76 : f32 to vector<16x128xf32>
    %440 = arith.mulf %439, %438 : vector<16x128xf32>
    %441 = arith.addf %437, %440 : vector<16x128xf32>
    %c1_120 = arith.constant 1 : index
    %c4_121 = arith.constant 4 : index
    %c0_122 = arith.constant 0 : index
    %442 = vector.load %arg4[%c1_120, %c4_121, %c0_122] : memref<2x24x128xf32, #tpu.memory_space<vmem>>, vector<1x16x128xf32>
    %443 = vector.shape_cast %442 : vector<1x16x128xf32> to vector<16x128xf32>
    %c3_i32_123 = arith.constant 3 : i32
    %444 = tpu.dynamic_rotate %443 by %c3_i32_123 dim 1 : vector<16x128xf32>, i32 -> vector<16x128xf32>
    %445 = vector.broadcast %77 : f32 to vector<16x128xf32>
    %446 = arith.mulf %445, %444 : vector<16x128xf32>
    %447 = arith.addf %441, %446 : vector<16x128xf32>
    %c2_i32_124 = arith.constant 2 : i32
    %448 = tpu.dynamic_rotate %443 by %c2_i32_124 dim 1 : vector<16x128xf32>, i32 -> vector<16x128xf32>
    %449 = vector.broadcast %78 : f32 to vector<16x128xf32>
    %450 = arith.mulf %449, %448 : vector<16x128xf32>
    %451 = arith.addf %447, %450 : vector<16x128xf32>
    %c1_i32_125 = arith.constant 1 : i32
    %452 = tpu.dynamic_rotate %443 by %c1_i32_125 dim 1 : vector<16x128xf32>, i32 -> vector<16x128xf32>
    %453 = vector.broadcast %79 : f32 to vector<16x128xf32>
    %454 = arith.mulf %453, %452 : vector<16x128xf32>
    %455 = arith.addf %451, %454 : vector<16x128xf32>
    %456 = vector.broadcast %80 : f32 to vector<16x128xf32>
    %457 = arith.mulf %456, %443 : vector<16x128xf32>
    %458 = arith.addf %455, %457 : vector<16x128xf32>
    %c127_i32_126 = arith.constant 127 : i32
    %459 = tpu.dynamic_rotate %443 by %c127_i32_126 dim 1 : vector<16x128xf32>, i32 -> vector<16x128xf32>
    %460 = vector.broadcast %81 : f32 to vector<16x128xf32>
    %461 = arith.mulf %460, %459 : vector<16x128xf32>
    %462 = arith.addf %458, %461 : vector<16x128xf32>
    %c126_i32_127 = arith.constant 126 : i32
    %463 = tpu.dynamic_rotate %443 by %c126_i32_127 dim 1 : vector<16x128xf32>, i32 -> vector<16x128xf32>
    %464 = vector.broadcast %82 : f32 to vector<16x128xf32>
    %465 = arith.mulf %464, %463 : vector<16x128xf32>
    %466 = arith.addf %462, %465 : vector<16x128xf32>
    %c125_i32_128 = arith.constant 125 : i32
    %467 = tpu.dynamic_rotate %443 by %c125_i32_128 dim 1 : vector<16x128xf32>, i32 -> vector<16x128xf32>
    %468 = vector.broadcast %83 : f32 to vector<16x128xf32>
    %469 = arith.mulf %468, %467 : vector<16x128xf32>
    %470 = arith.addf %466, %469 : vector<16x128xf32>
    %c1_129 = arith.constant 1 : index
    %c5_130 = arith.constant 5 : index
    %c0_131 = arith.constant 0 : index
    %471 = vector.load %arg4[%c1_129, %c5_130, %c0_131] : memref<2x24x128xf32, #tpu.memory_space<vmem>>, vector<1x16x128xf32>
    %472 = vector.shape_cast %471 : vector<1x16x128xf32> to vector<16x128xf32>
    %c3_i32_132 = arith.constant 3 : i32
    %473 = tpu.dynamic_rotate %472 by %c3_i32_132 dim 1 : vector<16x128xf32>, i32 -> vector<16x128xf32>
    %474 = vector.broadcast %84 : f32 to vector<16x128xf32>
    %475 = arith.mulf %474, %473 : vector<16x128xf32>
    %476 = arith.addf %470, %475 : vector<16x128xf32>
    %c2_i32_133 = arith.constant 2 : i32
    %477 = tpu.dynamic_rotate %472 by %c2_i32_133 dim 1 : vector<16x128xf32>, i32 -> vector<16x128xf32>
    %478 = vector.broadcast %85 : f32 to vector<16x128xf32>
    %479 = arith.mulf %478, %477 : vector<16x128xf32>
    %480 = arith.addf %476, %479 : vector<16x128xf32>
    %c1_i32_134 = arith.constant 1 : i32
    %481 = tpu.dynamic_rotate %472 by %c1_i32_134 dim 1 : vector<16x128xf32>, i32 -> vector<16x128xf32>
    %482 = vector.broadcast %86 : f32 to vector<16x128xf32>
    %483 = arith.mulf %482, %481 : vector<16x128xf32>
    %484 = arith.addf %480, %483 : vector<16x128xf32>
    %485 = vector.broadcast %87 : f32 to vector<16x128xf32>
    %486 = arith.mulf %485, %472 : vector<16x128xf32>
    %487 = arith.addf %484, %486 : vector<16x128xf32>
    %c127_i32_135 = arith.constant 127 : i32
    %488 = tpu.dynamic_rotate %472 by %c127_i32_135 dim 1 : vector<16x128xf32>, i32 -> vector<16x128xf32>
    %489 = vector.broadcast %88 : f32 to vector<16x128xf32>
    %490 = arith.mulf %489, %488 : vector<16x128xf32>
    %491 = arith.addf %487, %490 : vector<16x128xf32>
    %c126_i32_136 = arith.constant 126 : i32
    %492 = tpu.dynamic_rotate %472 by %c126_i32_136 dim 1 : vector<16x128xf32>, i32 -> vector<16x128xf32>
    %493 = vector.broadcast %89 : f32 to vector<16x128xf32>
    %494 = arith.mulf %493, %492 : vector<16x128xf32>
    %495 = arith.addf %491, %494 : vector<16x128xf32>
    %c125_i32_137 = arith.constant 125 : i32
    %496 = tpu.dynamic_rotate %472 by %c125_i32_137 dim 1 : vector<16x128xf32>, i32 -> vector<16x128xf32>
    %497 = vector.broadcast %90 : f32 to vector<16x128xf32>
    %498 = arith.mulf %497, %496 : vector<16x128xf32>
    %499 = arith.addf %495, %498 : vector<16x128xf32>
    %c1_138 = arith.constant 1 : index
    %c6_139 = arith.constant 6 : index
    %c0_140 = arith.constant 0 : index
    %500 = vector.load %arg4[%c1_138, %c6_139, %c0_140] : memref<2x24x128xf32, #tpu.memory_space<vmem>>, vector<1x16x128xf32>
    %501 = vector.shape_cast %500 : vector<1x16x128xf32> to vector<16x128xf32>
    %c3_i32_141 = arith.constant 3 : i32
    %502 = tpu.dynamic_rotate %501 by %c3_i32_141 dim 1 : vector<16x128xf32>, i32 -> vector<16x128xf32>
    %503 = vector.broadcast %91 : f32 to vector<16x128xf32>
    %504 = arith.mulf %503, %502 : vector<16x128xf32>
    %505 = arith.addf %499, %504 : vector<16x128xf32>
    %c2_i32_142 = arith.constant 2 : i32
    %506 = tpu.dynamic_rotate %501 by %c2_i32_142 dim 1 : vector<16x128xf32>, i32 -> vector<16x128xf32>
    %507 = vector.broadcast %92 : f32 to vector<16x128xf32>
    %508 = arith.mulf %507, %506 : vector<16x128xf32>
    %509 = arith.addf %505, %508 : vector<16x128xf32>
    %c1_i32_143 = arith.constant 1 : i32
    %510 = tpu.dynamic_rotate %501 by %c1_i32_143 dim 1 : vector<16x128xf32>, i32 -> vector<16x128xf32>
    %511 = vector.broadcast %93 : f32 to vector<16x128xf32>
    %512 = arith.mulf %511, %510 : vector<16x128xf32>
    %513 = arith.addf %509, %512 : vector<16x128xf32>
    %514 = vector.broadcast %94 : f32 to vector<16x128xf32>
    %515 = arith.mulf %514, %501 : vector<16x128xf32>
    %516 = arith.addf %513, %515 : vector<16x128xf32>
    %c127_i32_144 = arith.constant 127 : i32
    %517 = tpu.dynamic_rotate %501 by %c127_i32_144 dim 1 : vector<16x128xf32>, i32 -> vector<16x128xf32>
    %518 = vector.broadcast %95 : f32 to vector<16x128xf32>
    %519 = arith.mulf %518, %517 : vector<16x128xf32>
    %520 = arith.addf %516, %519 : vector<16x128xf32>
    %c126_i32_145 = arith.constant 126 : i32
    %521 = tpu.dynamic_rotate %501 by %c126_i32_145 dim 1 : vector<16x128xf32>, i32 -> vector<16x128xf32>
    %522 = vector.broadcast %96 : f32 to vector<16x128xf32>
    %523 = arith.mulf %522, %521 : vector<16x128xf32>
    %524 = arith.addf %520, %523 : vector<16x128xf32>
    %c125_i32_146 = arith.constant 125 : i32
    %525 = tpu.dynamic_rotate %501 by %c125_i32_146 dim 1 : vector<16x128xf32>, i32 -> vector<16x128xf32>
    %526 = vector.broadcast %97 : f32 to vector<16x128xf32>
    %527 = arith.mulf %526, %525 : vector<16x128xf32>
    %528 = arith.addf %524, %527 : vector<16x128xf32>
    %529 = vector.extract_strided_slice %528 {offsets = [0, 0], sizes = [16, 16], strides = [1, 1]} : vector<16x128xf32> to vector<16x16xf32>
    %530 = arith.negf %529 : vector<16x16xf32>
    %531 = math.exp %530 : vector<16x16xf32>
    %cst_147 = arith.constant 1.000000e+00 : f32
    %532 = vector.broadcast %cst_147 : f32 to vector<16x16xf32>
    %533 = arith.addf %532, %531 : vector<16x16xf32>
    %534 = arith.divf %532, %533 : vector<16x16xf32>
    %c0_148 = arith.constant 0 : index
    %c0_149 = arith.constant 0 : index
    %c0_150 = arith.constant 0 : index
    %c0_151 = arith.constant 0 : index
    %535 = vector.load %arg3[%c0_148, %c0_149, %c0_150, %c0_151] : memref<2x1x16x16xf32, #tpu.memory_space<vmem>>, vector<1x1x16x16xf32>
    %536 = vector.shape_cast %535 : vector<1x1x16x16xf32> to vector<16x16xf32>
    %537 = vector.shape_cast %534 : vector<16x16xf32> to vector<1x1x16x16xf32>
    tpu.vector_store %arg3[%c0_148, %c0_149, %c0_150, %c0_151], %537 {strides = array<i32>} : memref<2x1x16x16xf32, #tpu.memory_space<vmem>>, vector<1x1x16x16xf32>,
    %c1_152 = arith.constant 1 : index
    %c0_153 = arith.constant 0 : index
    %c0_154 = arith.constant 0 : index
    %c0_155 = arith.constant 0 : index
    %538 = vector.load %arg2[%c1_152, %c0_153, %c0_154, %c0_155] : memref<2x4x16x16xf32, #tpu.memory_space<vmem>>, vector<1x1x16x16xf32>
    %539 = vector.shape_cast %538 : vector<1x1x16x16xf32> to vector<16x16xf32>
    %c1_156 = arith.constant 1 : index
    %c1_157 = arith.constant 1 : index
    %c0_158 = arith.constant 0 : index
    %c0_159 = arith.constant 0 : index
    %540 = vector.load %arg2[%c1_156, %c1_157, %c0_158, %c0_159] : memref<2x4x16x16xf32, #tpu.memory_space<vmem>>, vector<1x1x16x16xf32>
    %541 = vector.shape_cast %540 : vector<1x1x16x16xf32> to vector<16x16xf32>
    %542 = arith.addf %539, %541 : vector<16x16xf32>
    %543 = arith.maximumf %539, %541 : vector<16x16xf32>
    %c1_160 = arith.constant 1 : index
    %c2_161 = arith.constant 2 : index
    %c0_162 = arith.constant 0 : index
    %c0_163 = arith.constant 0 : index
    %544 = vector.load %arg2[%c1_160, %c2_161, %c0_162, %c0_163] : memref<2x4x16x16xf32, #tpu.memory_space<vmem>>, vector<1x1x16x16xf32>
    %545 = vector.shape_cast %544 : vector<1x1x16x16xf32> to vector<16x16xf32>
    %546 = arith.addf %542, %545 : vector<16x16xf32>
    %547 = arith.maximumf %543, %545 : vector<16x16xf32>
    %c1_164 = arith.constant 1 : index
    %c3_165 = arith.constant 3 : index
    %c0_166 = arith.constant 0 : index
    %c0_167 = arith.constant 0 : index
    %548 = vector.load %arg2[%c1_164, %c3_165, %c0_166, %c0_167] : memref<2x4x16x16xf32, #tpu.memory_space<vmem>>, vector<1x1x16x16xf32>
    %549 = vector.shape_cast %548 : vector<1x1x16x16xf32> to vector<16x16xf32>
    %550 = arith.addf %546, %549 : vector<16x16xf32>
    %551 = arith.maximumf %547, %549 : vector<16x16xf32>
    %cst_168 = arith.constant 2.500000e-01 : f32
    %552 = vector.broadcast %cst_168 : f32 to vector<16x16xf32>
    %553 = arith.mulf %550, %552 : vector<16x16xf32>
    %c0_169 = arith.constant 0 : index
    %c3_170 = arith.constant 3 : index
    %c0_171 = arith.constant 0 : index
    %554 = vector.load %arg4[%c0_169, %c3_170, %c0_171] : memref<2x24x128xf32, #tpu.memory_space<vmem>>, vector<1x16x16xf32>
    %555 = vector.shape_cast %554 : vector<1x16x16xf32> to vector<16x16xf32>
    %556 = vector.shape_cast %553 : vector<16x16xf32> to vector<1x16x16xf32>
    tpu.vector_store %arg4[%c0_169, %c3_170, %c0_171], %556 {strides = array<i32>} : memref<2x24x128xf32, #tpu.memory_space<vmem>>, vector<1x16x16xf32>,
    %c1_172 = arith.constant 1 : index
    %c3_173 = arith.constant 3 : index
    %c0_174 = arith.constant 0 : index
    %557 = vector.load %arg4[%c1_172, %c3_173, %c0_174] : memref<2x24x128xf32, #tpu.memory_space<vmem>>, vector<1x16x16xf32>
    %558 = vector.shape_cast %557 : vector<1x16x16xf32> to vector<16x16xf32>
    %559 = vector.shape_cast %551 : vector<16x16xf32> to vector<1x16x16xf32>
    tpu.vector_store %arg4[%c1_172, %c3_173, %c0_174], %559 {strides = array<i32>} : memref<2x24x128xf32, #tpu.memory_space<vmem>>, vector<1x16x16xf32>,
    %cst_175 = arith.constant 0.000000e+00 : f32
    %560 = vector.broadcast %cst_175 : f32 to vector<16x128xf32>
    %c0_176 = arith.constant 0 : index
    %c0_177 = arith.constant 0 : index
    %c0_178 = arith.constant 0 : index
    %561 = vector.load %arg4[%c0_176, %c0_177, %c0_178] : memref<2x24x128xf32, #tpu.memory_space<vmem>>, vector<1x16x128xf32>
    %562 = vector.shape_cast %561 : vector<1x16x128xf32> to vector<16x128xf32>
    %c3_i32_179 = arith.constant 3 : i32
    %563 = tpu.dynamic_rotate %562 by %c3_i32_179 dim 1 : vector<16x128xf32>, i32 -> vector<16x128xf32>
    %564 = vector.broadcast %0 : f32 to vector<16x128xf32>
    %565 = arith.mulf %564, %563 : vector<16x128xf32>
    %566 = arith.addf %560, %565 : vector<16x128xf32>
    %c2_i32_180 = arith.constant 2 : i32
    %567 = tpu.dynamic_rotate %562 by %c2_i32_180 dim 1 : vector<16x128xf32>, i32 -> vector<16x128xf32>
    %568 = vector.broadcast %1 : f32 to vector<16x128xf32>
    %569 = arith.mulf %568, %567 : vector<16x128xf32>
    %570 = arith.addf %566, %569 : vector<16x128xf32>
    %c1_i32_181 = arith.constant 1 : i32
    %571 = tpu.dynamic_rotate %562 by %c1_i32_181 dim 1 : vector<16x128xf32>, i32 -> vector<16x128xf32>
    %572 = vector.broadcast %2 : f32 to vector<16x128xf32>
    %573 = arith.mulf %572, %571 : vector<16x128xf32>
    %574 = arith.addf %570, %573 : vector<16x128xf32>
    %575 = vector.broadcast %3 : f32 to vector<16x128xf32>
    %576 = arith.mulf %575, %562 : vector<16x128xf32>
    %577 = arith.addf %574, %576 : vector<16x128xf32>
    %c127_i32_182 = arith.constant 127 : i32
    %578 = tpu.dynamic_rotate %562 by %c127_i32_182 dim 1 : vector<16x128xf32>, i32 -> vector<16x128xf32>
    %579 = vector.broadcast %4 : f32 to vector<16x128xf32>
    %580 = arith.mulf %579, %578 : vector<16x128xf32>
    %581 = arith.addf %577, %580 : vector<16x128xf32>
    %c126_i32_183 = arith.constant 126 : i32
    %582 = tpu.dynamic_rotate %562 by %c126_i32_183 dim 1 : vector<16x128xf32>, i32 -> vector<16x128xf32>
    %583 = vector.broadcast %5 : f32 to vector<16x128xf32>
    %584 = arith.mulf %583, %582 : vector<16x128xf32>
    %585 = arith.addf %581, %584 : vector<16x128xf32>
    %c125_i32_184 = arith.constant 125 : i32
    %586 = tpu.dynamic_rotate %562 by %c125_i32_184 dim 1 : vector<16x128xf32>, i32 -> vector<16x128xf32>
    %587 = vector.broadcast %6 : f32 to vector<16x128xf32>
    %588 = arith.mulf %587, %586 : vector<16x128xf32>
    %589 = arith.addf %585, %588 : vector<16x128xf32>
    %c0_185 = arith.constant 0 : index
    %c1_186 = arith.constant 1 : index
    %c0_187 = arith.constant 0 : index
    %590 = vector.load %arg4[%c0_185, %c1_186, %c0_187] : memref<2x24x128xf32, #tpu.memory_space<vmem>>, vector<1x16x128xf32>
    %591 = vector.shape_cast %590 : vector<1x16x128xf32> to vector<16x128xf32>
    %c3_i32_188 = arith.constant 3 : i32
    %592 = tpu.dynamic_rotate %591 by %c3_i32_188 dim 1 : vector<16x128xf32>, i32 -> vector<16x128xf32>
    %593 = vector.broadcast %7 : f32 to vector<16x128xf32>
    %594 = arith.mulf %593, %592 : vector<16x128xf32>
    %595 = arith.addf %589, %594 : vector<16x128xf32>
    %c2_i32_189 = arith.constant 2 : i32
    %596 = tpu.dynamic_rotate %591 by %c2_i32_189 dim 1 : vector<16x128xf32>, i32 -> vector<16x128xf32>
    %597 = vector.broadcast %8 : f32 to vector<16x128xf32>
    %598 = arith.mulf %597, %596 : vector<16x128xf32>
    %599 = arith.addf %595, %598 : vector<16x128xf32>
    %c1_i32_190 = arith.constant 1 : i32
    %600 = tpu.dynamic_rotate %591 by %c1_i32_190 dim 1 : vector<16x128xf32>, i32 -> vector<16x128xf32>
    %601 = vector.broadcast %9 : f32 to vector<16x128xf32>
    %602 = arith.mulf %601, %600 : vector<16x128xf32>
    %603 = arith.addf %599, %602 : vector<16x128xf32>
    %604 = vector.broadcast %10 : f32 to vector<16x128xf32>
    %605 = arith.mulf %604, %591 : vector<16x128xf32>
    %606 = arith.addf %603, %605 : vector<16x128xf32>
    %c127_i32_191 = arith.constant 127 : i32
    %607 = tpu.dynamic_rotate %591 by %c127_i32_191 dim 1 : vector<16x128xf32>, i32 -> vector<16x128xf32>
    %608 = vector.broadcast %11 : f32 to vector<16x128xf32>
    %609 = arith.mulf %608, %607 : vector<16x128xf32>
    %610 = arith.addf %606, %609 : vector<16x128xf32>
    %c126_i32_192 = arith.constant 126 : i32
    %611 = tpu.dynamic_rotate %591 by %c126_i32_192 dim 1 : vector<16x128xf32>, i32 -> vector<16x128xf32>
    %612 = vector.broadcast %12 : f32 to vector<16x128xf32>
    %613 = arith.mulf %612, %611 : vector<16x128xf32>
    %614 = arith.addf %610, %613 : vector<16x128xf32>
    %c125_i32_193 = arith.constant 125 : i32
    %615 = tpu.dynamic_rotate %591 by %c125_i32_193 dim 1 : vector<16x128xf32>, i32 -> vector<16x128xf32>
    %616 = vector.broadcast %13 : f32 to vector<16x128xf32>
    %617 = arith.mulf %616, %615 : vector<16x128xf32>
    %618 = arith.addf %614, %617 : vector<16x128xf32>
    %c0_194 = arith.constant 0 : index
    %c2_195 = arith.constant 2 : index
    %c0_196 = arith.constant 0 : index
    %619 = vector.load %arg4[%c0_194, %c2_195, %c0_196] : memref<2x24x128xf32, #tpu.memory_space<vmem>>, vector<1x16x128xf32>
    %620 = vector.shape_cast %619 : vector<1x16x128xf32> to vector<16x128xf32>
    %c3_i32_197 = arith.constant 3 : i32
    %621 = tpu.dynamic_rotate %620 by %c3_i32_197 dim 1 : vector<16x128xf32>, i32 -> vector<16x128xf32>
    %622 = vector.broadcast %14 : f32 to vector<16x128xf32>
    %623 = arith.mulf %622, %621 : vector<16x128xf32>
    %624 = arith.addf %618, %623 : vector<16x128xf32>
    %c2_i32_198 = arith.constant 2 : i32
    %625 = tpu.dynamic_rotate %620 by %c2_i32_198 dim 1 : vector<16x128xf32>, i32 -> vector<16x128xf32>
    %626 = vector.broadcast %15 : f32 to vector<16x128xf32>
    %627 = arith.mulf %626, %625 : vector<16x128xf32>
    %628 = arith.addf %624, %627 : vector<16x128xf32>
    %c1_i32_199 = arith.constant 1 : i32
    %629 = tpu.dynamic_rotate %620 by %c1_i32_199 dim 1 : vector<16x128xf32>, i32 -> vector<16x128xf32>
    %630 = vector.broadcast %16 : f32 to vector<16x128xf32>
    %631 = arith.mulf %630, %629 : vector<16x128xf32>
    %632 = arith.addf %628, %631 : vector<16x128xf32>
    %633 = vector.broadcast %17 : f32 to vector<16x128xf32>
    %634 = arith.mulf %633, %620 : vector<16x128xf32>
    %635 = arith.addf %632, %634 : vector<16x128xf32>
    %c127_i32_200 = arith.constant 127 : i32
    %636 = tpu.dynamic_rotate %620 by %c127_i32_200 dim 1 : vector<16x128xf32>, i32 -> vector<16x128xf32>
    %637 = vector.broadcast %18 : f32 to vector<16x128xf32>
    %638 = arith.mulf %637, %636 : vector<16x128xf32>
    %639 = arith.addf %635, %638 : vector<16x128xf32>
    %c126_i32_201 = arith.constant 126 : i32
    %640 = tpu.dynamic_rotate %620 by %c126_i32_201 dim 1 : vector<16x128xf32>, i32 -> vector<16x128xf32>
    %641 = vector.broadcast %19 : f32 to vector<16x128xf32>
    %642 = arith.mulf %641, %640 : vector<16x128xf32>
    %643 = arith.addf %639, %642 : vector<16x128xf32>
    %c125_i32_202 = arith.constant 125 : i32
    %644 = tpu.dynamic_rotate %620 by %c125_i32_202 dim 1 : vector<16x128xf32>, i32 -> vector<16x128xf32>
    %645 = vector.broadcast %20 : f32 to vector<16x128xf32>
    %646 = arith.mulf %645, %644 : vector<16x128xf32>
    %647 = arith.addf %643, %646 : vector<16x128xf32>
    %c0_203 = arith.constant 0 : index
    %c3_204 = arith.constant 3 : index
    %c0_205 = arith.constant 0 : index
    %648 = vector.load %arg4[%c0_203, %c3_204, %c0_205] : memref<2x24x128xf32, #tpu.memory_space<vmem>>, vector<1x16x128xf32>
    %649 = vector.shape_cast %648 : vector<1x16x128xf32> to vector<16x128xf32>
    %c3_i32_206 = arith.constant 3 : i32
    %650 = tpu.dynamic_rotate %649 by %c3_i32_206 dim 1 : vector<16x128xf32>, i32 -> vector<16x128xf32>
    %651 = vector.broadcast %21 : f32 to vector<16x128xf32>
    %652 = arith.mulf %651, %650 : vector<16x128xf32>
    %653 = arith.addf %647, %652 : vector<16x128xf32>
    %c2_i32_207 = arith.constant 2 : i32
    %654 = tpu.dynamic_rotate %649 by %c2_i32_207 dim 1 : vector<16x128xf32>, i32 -> vector<16x128xf32>
    %655 = vector.broadcast %22 : f32 to vector<16x128xf32>
    %656 = arith.mulf %655, %654 : vector<16x128xf32>
    %657 = arith.addf %653, %656 : vector<16x128xf32>
    %c1_i32_208 = arith.constant 1 : i32
    %658 = tpu.dynamic_rotate %649 by %c1_i32_208 dim 1 : vector<16x128xf32>, i32 -> vector<16x128xf32>
    %659 = vector.broadcast %23 : f32 to vector<16x128xf32>
    %660 = arith.mulf %659, %658 : vector<16x128xf32>
    %661 = arith.addf %657, %660 : vector<16x128xf32>
    %662 = vector.broadcast %24 : f32 to vector<16x128xf32>
    %663 = arith.mulf %662, %649 : vector<16x128xf32>
    %664 = arith.addf %661, %663 : vector<16x128xf32>
    %c127_i32_209 = arith.constant 127 : i32
    %665 = tpu.dynamic_rotate %649 by %c127_i32_209 dim 1 : vector<16x128xf32>, i32 -> vector<16x128xf32>
    %666 = vector.broadcast %25 : f32 to vector<16x128xf32>
    %667 = arith.mulf %666, %665 : vector<16x128xf32>
    %668 = arith.addf %664, %667 : vector<16x128xf32>
    %c126_i32_210 = arith.constant 126 : i32
    %669 = tpu.dynamic_rotate %649 by %c126_i32_210 dim 1 : vector<16x128xf32>, i32 -> vector<16x128xf32>
    %670 = vector.broadcast %26 : f32 to vector<16x128xf32>
    %671 = arith.mulf %670, %669 : vector<16x128xf32>
    %672 = arith.addf %668, %671 : vector<16x128xf32>
    %c125_i32_211 = arith.constant 125 : i32
    %673 = tpu.dynamic_rotate %649 by %c125_i32_211 dim 1 : vector<16x128xf32>, i32 -> vector<16x128xf32>
    %674 = vector.broadcast %27 : f32 to vector<16x128xf32>
    %675 = arith.mulf %674, %673 : vector<16x128xf32>
    %676 = arith.addf %672, %675 : vector<16x128xf32>
    %c0_212 = arith.constant 0 : index
    %c4_213 = arith.constant 4 : index
    %c0_214 = arith.constant 0 : index
    %677 = vector.load %arg4[%c0_212, %c4_213, %c0_214] : memref<2x24x128xf32, #tpu.memory_space<vmem>>, vector<1x16x128xf32>
    %678 = vector.shape_cast %677 : vector<1x16x128xf32> to vector<16x128xf32>
    %c3_i32_215 = arith.constant 3 : i32
    %679 = tpu.dynamic_rotate %678 by %c3_i32_215 dim 1 : vector<16x128xf32>, i32 -> vector<16x128xf32>
    %680 = vector.broadcast %28 : f32 to vector<16x128xf32>
    %681 = arith.mulf %680, %679 : vector<16x128xf32>
    %682 = arith.addf %676, %681 : vector<16x128xf32>
    %c2_i32_216 = arith.constant 2 : i32
    %683 = tpu.dynamic_rotate %678 by %c2_i32_216 dim 1 : vector<16x128xf32>, i32 -> vector<16x128xf32>
    %684 = vector.broadcast %29 : f32 to vector<16x128xf32>
    %685 = arith.mulf %684, %683 : vector<16x128xf32>
    %686 = arith.addf %682, %685 : vector<16x128xf32>
    %c1_i32_217 = arith.constant 1 : i32
    %687 = tpu.dynamic_rotate %678 by %c1_i32_217 dim 1 : vector<16x128xf32>, i32 -> vector<16x128xf32>
    %688 = vector.broadcast %30 : f32 to vector<16x128xf32>
    %689 = arith.mulf %688, %687 : vector<16x128xf32>
    %690 = arith.addf %686, %689 : vector<16x128xf32>
    %691 = vector.broadcast %31 : f32 to vector<16x128xf32>
    %692 = arith.mulf %691, %678 : vector<16x128xf32>
    %693 = arith.addf %690, %692 : vector<16x128xf32>
    %c127_i32_218 = arith.constant 127 : i32
    %694 = tpu.dynamic_rotate %678 by %c127_i32_218 dim 1 : vector<16x128xf32>, i32 -> vector<16x128xf32>
    %695 = vector.broadcast %32 : f32 to vector<16x128xf32>
    %696 = arith.mulf %695, %694 : vector<16x128xf32>
    %697 = arith.addf %693, %696 : vector<16x128xf32>
    %c126_i32_219 = arith.constant 126 : i32
    %698 = tpu.dynamic_rotate %678 by %c126_i32_219 dim 1 : vector<16x128xf32>, i32 -> vector<16x128xf32>
    %699 = vector.broadcast %33 : f32 to vector<16x128xf32>
    %700 = arith.mulf %699, %698 : vector<16x128xf32>
    %701 = arith.addf %697, %700 : vector<16x128xf32>
    %c125_i32_220 = arith.constant 125 : i32
    %702 = tpu.dynamic_rotate %678 by %c125_i32_220 dim 1 : vector<16x128xf32>, i32 -> vector<16x128xf32>
    %703 = vector.broadcast %34 : f32 to vector<16x128xf32>
    %704 = arith.mulf %703, %702 : vector<16x128xf32>
    %705 = arith.addf %701, %704 : vector<16x128xf32>
    %c0_221 = arith.constant 0 : index
    %c5_222 = arith.constant 5 : index
    %c0_223 = arith.constant 0 : index
    %706 = vector.load %arg4[%c0_221, %c5_222, %c0_223] : memref<2x24x128xf32, #tpu.memory_space<vmem>>, vector<1x16x128xf32>
    %707 = vector.shape_cast %706 : vector<1x16x128xf32> to vector<16x128xf32>
    %c3_i32_224 = arith.constant 3 : i32
    %708 = tpu.dynamic_rotate %707 by %c3_i32_224 dim 1 : vector<16x128xf32>, i32 -> vector<16x128xf32>
    %709 = vector.broadcast %35 : f32 to vector<16x128xf32>
    %710 = arith.mulf %709, %708 : vector<16x128xf32>
    %711 = arith.addf %705, %710 : vector<16x128xf32>
    %c2_i32_225 = arith.constant 2 : i32
    %712 = tpu.dynamic_rotate %707 by %c2_i32_225 dim 1 : vector<16x128xf32>, i32 -> vector<16x128xf32>
    %713 = vector.broadcast %36 : f32 to vector<16x128xf32>
    %714 = arith.mulf %713, %712 : vector<16x128xf32>
    %715 = arith.addf %711, %714 : vector<16x128xf32>
    %c1_i32_226 = arith.constant 1 : i32
    %716 = tpu.dynamic_rotate %707 by %c1_i32_226 dim 1 : vector<16x128xf32>, i32 -> vector<16x128xf32>
    %717 = vector.broadcast %37 : f32 to vector<16x128xf32>
    %718 = arith.mulf %717, %716 : vector<16x128xf32>
    %719 = arith.addf %715, %718 : vector<16x128xf32>
    %720 = vector.broadcast %38 : f32 to vector<16x128xf32>
    %721 = arith.mulf %720, %707 : vector<16x128xf32>
    %722 = arith.addf %719, %721 : vector<16x128xf32>
    %c127_i32_227 = arith.constant 127 : i32
    %723 = tpu.dynamic_rotate %707 by %c127_i32_227 dim 1 : vector<16x128xf32>, i32 -> vector<16x128xf32>
    %724 = vector.broadcast %39 : f32 to vector<16x128xf32>
    %725 = arith.mulf %724, %723 : vector<16x128xf32>
    %726 = arith.addf %722, %725 : vector<16x128xf32>
    %c126_i32_228 = arith.constant 126 : i32
    %727 = tpu.dynamic_rotate %707 by %c126_i32_228 dim 1 : vector<16x128xf32>, i32 -> vector<16x128xf32>
    %728 = vector.broadcast %40 : f32 to vector<16x128xf32>
    %729 = arith.mulf %728, %727 : vector<16x128xf32>
    %730 = arith.addf %726, %729 : vector<16x128xf32>
    %c125_i32_229 = arith.constant 125 : i32
    %731 = tpu.dynamic_rotate %707 by %c125_i32_229 dim 1 : vector<16x128xf32>, i32 -> vector<16x128xf32>
    %732 = vector.broadcast %41 : f32 to vector<16x128xf32>
    %733 = arith.mulf %732, %731 : vector<16x128xf32>
    %734 = arith.addf %730, %733 : vector<16x128xf32>
    %c0_230 = arith.constant 0 : index
    %c6_231 = arith.constant 6 : index
    %c0_232 = arith.constant 0 : index
    %735 = vector.load %arg4[%c0_230, %c6_231, %c0_232] : memref<2x24x128xf32, #tpu.memory_space<vmem>>, vector<1x16x128xf32>
    %736 = vector.shape_cast %735 : vector<1x16x128xf32> to vector<16x128xf32>
    %c3_i32_233 = arith.constant 3 : i32
    %737 = tpu.dynamic_rotate %736 by %c3_i32_233 dim 1 : vector<16x128xf32>, i32 -> vector<16x128xf32>
    %738 = vector.broadcast %42 : f32 to vector<16x128xf32>
    %739 = arith.mulf %738, %737 : vector<16x128xf32>
    %740 = arith.addf %734, %739 : vector<16x128xf32>
    %c2_i32_234 = arith.constant 2 : i32
    %741 = tpu.dynamic_rotate %736 by %c2_i32_234 dim 1 : vector<16x128xf32>, i32 -> vector<16x128xf32>
    %742 = vector.broadcast %43 : f32 to vector<16x128xf32>
    %743 = arith.mulf %742, %741 : vector<16x128xf32>
    %744 = arith.addf %740, %743 : vector<16x128xf32>
    %c1_i32_235 = arith.constant 1 : i32
    %745 = tpu.dynamic_rotate %736 by %c1_i32_235 dim 1 : vector<16x128xf32>, i32 -> vector<16x128xf32>
    %746 = vector.broadcast %44 : f32 to vector<16x128xf32>
    %747 = arith.mulf %746, %745 : vector<16x128xf32>
    %748 = arith.addf %744, %747 : vector<16x128xf32>
    %749 = vector.broadcast %45 : f32 to vector<16x128xf32>
    %750 = arith.mulf %749, %736 : vector<16x128xf32>
    %751 = arith.addf %748, %750 : vector<16x128xf32>
    %c127_i32_236 = arith.constant 127 : i32
    %752 = tpu.dynamic_rotate %736 by %c127_i32_236 dim 1 : vector<16x128xf32>, i32 -> vector<16x128xf32>
    %753 = vector.broadcast %46 : f32 to vector<16x128xf32>
    %754 = arith.mulf %753, %752 : vector<16x128xf32>
    %755 = arith.addf %751, %754 : vector<16x128xf32>
    %c126_i32_237 = arith.constant 126 : i32
    %756 = tpu.dynamic_rotate %736 by %c126_i32_237 dim 1 : vector<16x128xf32>, i32 -> vector<16x128xf32>
    %757 = vector.broadcast %47 : f32 to vector<16x128xf32>
    %758 = arith.mulf %757, %756 : vector<16x128xf32>
    %759 = arith.addf %755, %758 : vector<16x128xf32>
    %c125_i32_238 = arith.constant 125 : i32
    %760 = tpu.dynamic_rotate %736 by %c125_i32_238 dim 1 : vector<16x128xf32>, i32 -> vector<16x128xf32>
    %761 = vector.broadcast %48 : f32 to vector<16x128xf32>
    %762 = arith.mulf %761, %760 : vector<16x128xf32>
    %763 = arith.addf %759, %762 : vector<16x128xf32>
    %c1_239 = arith.constant 1 : index
    %c0_240 = arith.constant 0 : index
    %c0_241 = arith.constant 0 : index
    %764 = vector.load %arg4[%c1_239, %c0_240, %c0_241] : memref<2x24x128xf32, #tpu.memory_space<vmem>>, vector<1x16x128xf32>
    %765 = vector.shape_cast %764 : vector<1x16x128xf32> to vector<16x128xf32>
    %c3_i32_242 = arith.constant 3 : i32
    %766 = tpu.dynamic_rotate %765 by %c3_i32_242 dim 1 : vector<16x128xf32>, i32 -> vector<16x128xf32>
    %767 = vector.broadcast %49 : f32 to vector<16x128xf32>
    %768 = arith.mulf %767, %766 : vector<16x128xf32>
    %769 = arith.addf %763, %768 : vector<16x128xf32>
    %c2_i32_243 = arith.constant 2 : i32
    %770 = tpu.dynamic_rotate %765 by %c2_i32_243 dim 1 : vector<16x128xf32>, i32 -> vector<16x128xf32>
    %771 = vector.broadcast %50 : f32 to vector<16x128xf32>
    %772 = arith.mulf %771, %770 : vector<16x128xf32>
    %773 = arith.addf %769, %772 : vector<16x128xf32>
    %c1_i32_244 = arith.constant 1 : i32
    %774 = tpu.dynamic_rotate %765 by %c1_i32_244 dim 1 : vector<16x128xf32>, i32 -> vector<16x128xf32>
    %775 = vector.broadcast %51 : f32 to vector<16x128xf32>
    %776 = arith.mulf %775, %774 : vector<16x128xf32>
    %777 = arith.addf %773, %776 : vector<16x128xf32>
    %778 = vector.broadcast %52 : f32 to vector<16x128xf32>
    %779 = arith.mulf %778, %765 : vector<16x128xf32>
    %780 = arith.addf %777, %779 : vector<16x128xf32>
    %c127_i32_245 = arith.constant 127 : i32
    %781 = tpu.dynamic_rotate %765 by %c127_i32_245 dim 1 : vector<16x128xf32>, i32 -> vector<16x128xf32>
    %782 = vector.broadcast %53 : f32 to vector<16x128xf32>
    %783 = arith.mulf %782, %781 : vector<16x128xf32>
    %784 = arith.addf %780, %783 : vector<16x128xf32>
    %c126_i32_246 = arith.constant 126 : i32
    %785 = tpu.dynamic_rotate %765 by %c126_i32_246 dim 1 : vector<16x128xf32>, i32 -> vector<16x128xf32>
    %786 = vector.broadcast %54 : f32 to vector<16x128xf32>
    %787 = arith.mulf %786, %785 : vector<16x128xf32>
    %788 = arith.addf %784, %787 : vector<16x128xf32>
    %c125_i32_247 = arith.constant 125 : i32
    %789 = tpu.dynamic_rotate %765 by %c125_i32_247 dim 1 : vector<16x128xf32>, i32 -> vector<16x128xf32>
    %790 = vector.broadcast %55 : f32 to vector<16x128xf32>
    %791 = arith.mulf %790, %789 : vector<16x128xf32>
    %792 = arith.addf %788, %791 : vector<16x128xf32>
    %c1_248 = arith.constant 1 : index
    %c1_249 = arith.constant 1 : index
    %c0_250 = arith.constant 0 : index
    %793 = vector.load %arg4[%c1_248, %c1_249, %c0_250] : memref<2x24x128xf32, #tpu.memory_space<vmem>>, vector<1x16x128xf32>
    %794 = vector.shape_cast %793 : vector<1x16x128xf32> to vector<16x128xf32>
    %c3_i32_251 = arith.constant 3 : i32
    %795 = tpu.dynamic_rotate %794 by %c3_i32_251 dim 1 : vector<16x128xf32>, i32 -> vector<16x128xf32>
    %796 = vector.broadcast %56 : f32 to vector<16x128xf32>
    %797 = arith.mulf %796, %795 : vector<16x128xf32>
    %798 = arith.addf %792, %797 : vector<16x128xf32>
    %c2_i32_252 = arith.constant 2 : i32
    %799 = tpu.dynamic_rotate %794 by %c2_i32_252 dim 1 : vector<16x128xf32>, i32 -> vector<16x128xf32>
    %800 = vector.broadcast %57 : f32 to vector<16x128xf32>
    %801 = arith.mulf %800, %799 : vector<16x128xf32>
    %802 = arith.addf %798, %801 : vector<16x128xf32>
    %c1_i32_253 = arith.constant 1 : i32
    %803 = tpu.dynamic_rotate %794 by %c1_i32_253 dim 1 : vector<16x128xf32>, i32 -> vector<16x128xf32>
    %804 = vector.broadcast %58 : f32 to vector<16x128xf32>
    %805 = arith.mulf %804, %803 : vector<16x128xf32>
    %806 = arith.addf %802, %805 : vector<16x128xf32>
    %807 = vector.broadcast %59 : f32 to vector<16x128xf32>
    %808 = arith.mulf %807, %794 : vector<16x128xf32>
    %809 = arith.addf %806, %808 : vector<16x128xf32>
    %c127_i32_254 = arith.constant 127 : i32
    %810 = tpu.dynamic_rotate %794 by %c127_i32_254 dim 1 : vector<16x128xf32>, i32 -> vector<16x128xf32>
    %811 = vector.broadcast %60 : f32 to vector<16x128xf32>
    %812 = arith.mulf %811, %810 : vector<16x128xf32>
    %813 = arith.addf %809, %812 : vector<16x128xf32>
    %c126_i32_255 = arith.constant 126 : i32
    %814 = tpu.dynamic_rotate %794 by %c126_i32_255 dim 1 : vector<16x128xf32>, i32 -> vector<16x128xf32>
    %815 = vector.broadcast %61 : f32 to vector<16x128xf32>
    %816 = arith.mulf %815, %814 : vector<16x128xf32>
    %817 = arith.addf %813, %816 : vector<16x128xf32>
    %c125_i32_256 = arith.constant 125 : i32
    %818 = tpu.dynamic_rotate %794 by %c125_i32_256 dim 1 : vector<16x128xf32>, i32 -> vector<16x128xf32>
    %819 = vector.broadcast %62 : f32 to vector<16x128xf32>
    %820 = arith.mulf %819, %818 : vector<16x128xf32>
    %821 = arith.addf %817, %820 : vector<16x128xf32>
    %c1_257 = arith.constant 1 : index
    %c2_258 = arith.constant 2 : index
    %c0_259 = arith.constant 0 : index
    %822 = vector.load %arg4[%c1_257, %c2_258, %c0_259] : memref<2x24x128xf32, #tpu.memory_space<vmem>>, vector<1x16x128xf32>
    %823 = vector.shape_cast %822 : vector<1x16x128xf32> to vector<16x128xf32>
    %c3_i32_260 = arith.constant 3 : i32
    %824 = tpu.dynamic_rotate %823 by %c3_i32_260 dim 1 : vector<16x128xf32>, i32 -> vector<16x128xf32>
    %825 = vector.broadcast %63 : f32 to vector<16x128xf32>
    %826 = arith.mulf %825, %824 : vector<16x128xf32>
    %827 = arith.addf %821, %826 : vector<16x128xf32>
    %c2_i32_261 = arith.constant 2 : i32
    %828 = tpu.dynamic_rotate %823 by %c2_i32_261 dim 1 : vector<16x128xf32>, i32 -> vector<16x128xf32>
    %829 = vector.broadcast %64 : f32 to vector<16x128xf32>
    %830 = arith.mulf %829, %828 : vector<16x128xf32>
    %831 = arith.addf %827, %830 : vector<16x128xf32>
    %c1_i32_262 = arith.constant 1 : i32
    %832 = tpu.dynamic_rotate %823 by %c1_i32_262 dim 1 : vector<16x128xf32>, i32 -> vector<16x128xf32>
    %833 = vector.broadcast %65 : f32 to vector<16x128xf32>
    %834 = arith.mulf %833, %832 : vector<16x128xf32>
    %835 = arith.addf %831, %834 : vector<16x128xf32>
    %836 = vector.broadcast %66 : f32 to vector<16x128xf32>
    %837 = arith.mulf %836, %823 : vector<16x128xf32>
    %838 = arith.addf %835, %837 : vector<16x128xf32>
    %c127_i32_263 = arith.constant 127 : i32
    %839 = tpu.dynamic_rotate %823 by %c127_i32_263 dim 1 : vector<16x128xf32>, i32 -> vector<16x128xf32>
    %840 = vector.broadcast %67 : f32 to vector<16x128xf32>
    %841 = arith.mulf %840, %839 : vector<16x128xf32>
    %842 = arith.addf %838, %841 : vector<16x128xf32>
    %c126_i32_264 = arith.constant 126 : i32
    %843 = tpu.dynamic_rotate %823 by %c126_i32_264 dim 1 : vector<16x128xf32>, i32 -> vector<16x128xf32>
    %844 = vector.broadcast %68 : f32 to vector<16x128xf32>
    %845 = arith.mulf %844, %843 : vector<16x128xf32>
    %846 = arith.addf %842, %845 : vector<16x128xf32>
    %c125_i32_265 = arith.constant 125 : i32
    %847 = tpu.dynamic_rotate %823 by %c125_i32_265 dim 1 : vector<16x128xf32>, i32 -> vector<16x128xf32>
    %848 = vector.broadcast %69 : f32 to vector<16x128xf32>
    %849 = arith.mulf %848, %847 : vector<16x128xf32>
    %850 = arith.addf %846, %849 : vector<16x128xf32>
    %c1_266 = arith.constant 1 : index
    %c3_267 = arith.constant 3 : index
    %c0_268 = arith.constant 0 : index
    %851 = vector.load %arg4[%c1_266, %c3_267, %c0_268] : memref<2x24x128xf32, #tpu.memory_space<vmem>>, vector<1x16x128xf32>
    %852 = vector.shape_cast %851 : vector<1x16x128xf32> to vector<16x128xf32>
    %c3_i32_269 = arith.constant 3 : i32
    %853 = tpu.dynamic_rotate %852 by %c3_i32_269 dim 1 : vector<16x128xf32>, i32 -> vector<16x128xf32>
    %854 = vector.broadcast %70 : f32 to vector<16x128xf32>
    %855 = arith.mulf %854, %853 : vector<16x128xf32>
    %856 = arith.addf %850, %855 : vector<16x128xf32>
    %c2_i32_270 = arith.constant 2 : i32
    %857 = tpu.dynamic_rotate %852 by %c2_i32_270 dim 1 : vector<16x128xf32>, i32 -> vector<16x128xf32>
    %858 = vector.broadcast %71 : f32 to vector<16x128xf32>
    %859 = arith.mulf %858, %857 : vector<16x128xf32>
    %860 = arith.addf %856, %859 : vector<16x128xf32>
    %c1_i32_271 = arith.constant 1 : i32
    %861 = tpu.dynamic_rotate %852 by %c1_i32_271 dim 1 : vector<16x128xf32>, i32 -> vector<16x128xf32>
    %862 = vector.broadcast %72 : f32 to vector<16x128xf32>
    %863 = arith.mulf %862, %861 : vector<16x128xf32>
    %864 = arith.addf %860, %863 : vector<16x128xf32>
    %865 = vector.broadcast %73 : f32 to vector<16x128xf32>
    %866 = arith.mulf %865, %852 : vector<16x128xf32>
    %867 = arith.addf %864, %866 : vector<16x128xf32>
    %c127_i32_272 = arith.constant 127 : i32
    %868 = tpu.dynamic_rotate %852 by %c127_i32_272 dim 1 : vector<16x128xf32>, i32 -> vector<16x128xf32>
    %869 = vector.broadcast %74 : f32 to vector<16x128xf32>
    %870 = arith.mulf %869, %868 : vector<16x128xf32>
    %871 = arith.addf %867, %870 : vector<16x128xf32>
    %c126_i32_273 = arith.constant 126 : i32
    %872 = tpu.dynamic_rotate %852 by %c126_i32_273 dim 1 : vector<16x128xf32>, i32 -> vector<16x128xf32>
    %873 = vector.broadcast %75 : f32 to vector<16x128xf32>
    %874 = arith.mulf %873, %872 : vector<16x128xf32>
    %875 = arith.addf %871, %874 : vector<16x128xf32>
    %c125_i32_274 = arith.constant 125 : i32
    %876 = tpu.dynamic_rotate %852 by %c125_i32_274 dim 1 : vector<16x128xf32>, i32 -> vector<16x128xf32>
    %877 = vector.broadcast %76 : f32 to vector<16x128xf32>
    %878 = arith.mulf %877, %876 : vector<16x128xf32>
    %879 = arith.addf %875, %878 : vector<16x128xf32>
    %c1_275 = arith.constant 1 : index
    %c4_276 = arith.constant 4 : index
    %c0_277 = arith.constant 0 : index
    %880 = vector.load %arg4[%c1_275, %c4_276, %c0_277] : memref<2x24x128xf32, #tpu.memory_space<vmem>>, vector<1x16x128xf32>
    %881 = vector.shape_cast %880 : vector<1x16x128xf32> to vector<16x128xf32>
    %c3_i32_278 = arith.constant 3 : i32
    %882 = tpu.dynamic_rotate %881 by %c3_i32_278 dim 1 : vector<16x128xf32>, i32 -> vector<16x128xf32>
    %883 = vector.broadcast %77 : f32 to vector<16x128xf32>
    %884 = arith.mulf %883, %882 : vector<16x128xf32>
    %885 = arith.addf %879, %884 : vector<16x128xf32>
    %c2_i32_279 = arith.constant 2 : i32
    %886 = tpu.dynamic_rotate %881 by %c2_i32_279 dim 1 : vector<16x128xf32>, i32 -> vector<16x128xf32>
    %887 = vector.broadcast %78 : f32 to vector<16x128xf32>
    %888 = arith.mulf %887, %886 : vector<16x128xf32>
    %889 = arith.addf %885, %888 : vector<16x128xf32>
    %c1_i32_280 = arith.constant 1 : i32
    %890 = tpu.dynamic_rotate %881 by %c1_i32_280 dim 1 : vector<16x128xf32>, i32 -> vector<16x128xf32>
    %891 = vector.broadcast %79 : f32 to vector<16x128xf32>
    %892 = arith.mulf %891, %890 : vector<16x128xf32>
    %893 = arith.addf %889, %892 : vector<16x128xf32>
    %894 = vector.broadcast %80 : f32 to vector<16x128xf32>
    %895 = arith.mulf %894, %881 : vector<16x128xf32>
    %896 = arith.addf %893, %895 : vector<16x128xf32>
    %c127_i32_281 = arith.constant 127 : i32
    %897 = tpu.dynamic_rotate %881 by %c127_i32_281 dim 1 : vector<16x128xf32>, i32 -> vector<16x128xf32>
    %898 = vector.broadcast %81 : f32 to vector<16x128xf32>
    %899 = arith.mulf %898, %897 : vector<16x128xf32>
    %900 = arith.addf %896, %899 : vector<16x128xf32>
    %c126_i32_282 = arith.constant 126 : i32
    %901 = tpu.dynamic_rotate %881 by %c126_i32_282 dim 1 : vector<16x128xf32>, i32 -> vector<16x128xf32>
    %902 = vector.broadcast %82 : f32 to vector<16x128xf32>
    %903 = arith.mulf %902, %901 : vector<16x128xf32>
    %904 = arith.addf %900, %903 : vector<16x128xf32>
    %c125_i32_283 = arith.constant 125 : i32
    %905 = tpu.dynamic_rotate %881 by %c125_i32_283 dim 1 : vector<16x128xf32>, i32 -> vector<16x128xf32>
    %906 = vector.broadcast %83 : f32 to vector<16x128xf32>
    %907 = arith.mulf %906, %905 : vector<16x128xf32>
    %908 = arith.addf %904, %907 : vector<16x128xf32>
    %c1_284 = arith.constant 1 : index
    %c5_285 = arith.constant 5 : index
    %c0_286 = arith.constant 0 : index
    %909 = vector.load %arg4[%c1_284, %c5_285, %c0_286] : memref<2x24x128xf32, #tpu.memory_space<vmem>>, vector<1x16x128xf32>
    %910 = vector.shape_cast %909 : vector<1x16x128xf32> to vector<16x128xf32>
    %c3_i32_287 = arith.constant 3 : i32
    %911 = tpu.dynamic_rotate %910 by %c3_i32_287 dim 1 : vector<16x128xf32>, i32 -> vector<16x128xf32>
    %912 = vector.broadcast %84 : f32 to vector<16x128xf32>
    %913 = arith.mulf %912, %911 : vector<16x128xf32>
    %914 = arith.addf %908, %913 : vector<16x128xf32>
    %c2_i32_288 = arith.constant 2 : i32
    %915 = tpu.dynamic_rotate %910 by %c2_i32_288 dim 1 : vector<16x128xf32>, i32 -> vector<16x128xf32>
    %916 = vector.broadcast %85 : f32 to vector<16x128xf32>
    %917 = arith.mulf %916, %915 : vector<16x128xf32>
    %918 = arith.addf %914, %917 : vector<16x128xf32>
    %c1_i32_289 = arith.constant 1 : i32
    %919 = tpu.dynamic_rotate %910 by %c1_i32_289 dim 1 : vector<16x128xf32>, i32 -> vector<16x128xf32>
    %920 = vector.broadcast %86 : f32 to vector<16x128xf32>
    %921 = arith.mulf %920, %919 : vector<16x128xf32>
    %922 = arith.addf %918, %921 : vector<16x128xf32>
    %923 = vector.broadcast %87 : f32 to vector<16x128xf32>
    %924 = arith.mulf %923, %910 : vector<16x128xf32>
    %925 = arith.addf %922, %924 : vector<16x128xf32>
    %c127_i32_290 = arith.constant 127 : i32
    %926 = tpu.dynamic_rotate %910 by %c127_i32_290 dim 1 : vector<16x128xf32>, i32 -> vector<16x128xf32>
    %927 = vector.broadcast %88 : f32 to vector<16x128xf32>
    %928 = arith.mulf %927, %926 : vector<16x128xf32>
    %929 = arith.addf %925, %928 : vector<16x128xf32>
    %c126_i32_291 = arith.constant 126 : i32
    %930 = tpu.dynamic_rotate %910 by %c126_i32_291 dim 1 : vector<16x128xf32>, i32 -> vector<16x128xf32>
    %931 = vector.broadcast %89 : f32 to vector<16x128xf32>
    %932 = arith.mulf %931, %930 : vector<16x128xf32>
    %933 = arith.addf %929, %932 : vector<16x128xf32>
    %c125_i32_292 = arith.constant 125 : i32
    %934 = tpu.dynamic_rotate %910 by %c125_i32_292 dim 1 : vector<16x128xf32>, i32 -> vector<16x128xf32>
    %935 = vector.broadcast %90 : f32 to vector<16x128xf32>
    %936 = arith.mulf %935, %934 : vector<16x128xf32>
    %937 = arith.addf %933, %936 : vector<16x128xf32>
    %c1_293 = arith.constant 1 : index
    %c6_294 = arith.constant 6 : index
    %c0_295 = arith.constant 0 : index
    %938 = vector.load %arg4[%c1_293, %c6_294, %c0_295] : memref<2x24x128xf32, #tpu.memory_space<vmem>>, vector<1x16x128xf32>
    %939 = vector.shape_cast %938 : vector<1x16x128xf32> to vector<16x128xf32>
    %c3_i32_296 = arith.constant 3 : i32
    %940 = tpu.dynamic_rotate %939 by %c3_i32_296 dim 1 : vector<16x128xf32>, i32 -> vector<16x128xf32>
    %941 = vector.broadcast %91 : f32 to vector<16x128xf32>
    %942 = arith.mulf %941, %940 : vector<16x128xf32>
    %943 = arith.addf %937, %942 : vector<16x128xf32>
    %c2_i32_297 = arith.constant 2 : i32
    %944 = tpu.dynamic_rotate %939 by %c2_i32_297 dim 1 : vector<16x128xf32>, i32 -> vector<16x128xf32>
    %945 = vector.broadcast %92 : f32 to vector<16x128xf32>
    %946 = arith.mulf %945, %944 : vector<16x128xf32>
    %947 = arith.addf %943, %946 : vector<16x128xf32>
    %c1_i32_298 = arith.constant 1 : i32
    %948 = tpu.dynamic_rotate %939 by %c1_i32_298 dim 1 : vector<16x128xf32>, i32 -> vector<16x128xf32>
    %949 = vector.broadcast %93 : f32 to vector<16x128xf32>
    %950 = arith.mulf %949, %948 : vector<16x128xf32>
    %951 = arith.addf %947, %950 : vector<16x128xf32>
    %952 = vector.broadcast %94 : f32 to vector<16x128xf32>
    %953 = arith.mulf %952, %939 : vector<16x128xf32>
    %954 = arith.addf %951, %953 : vector<16x128xf32>
    %c127_i32_299 = arith.constant 127 : i32
    %955 = tpu.dynamic_rotate %939 by %c127_i32_299 dim 1 : vector<16x128xf32>, i32 -> vector<16x128xf32>
    %956 = vector.broadcast %95 : f32 to vector<16x128xf32>
    %957 = arith.mulf %956, %955 : vector<16x128xf32>
    %958 = arith.addf %954, %957 : vector<16x128xf32>
    %c126_i32_300 = arith.constant 126 : i32
    %959 = tpu.dynamic_rotate %939 by %c126_i32_300 dim 1 : vector<16x128xf32>, i32 -> vector<16x128xf32>
    %960 = vector.broadcast %96 : f32 to vector<16x128xf32>
    %961 = arith.mulf %960, %959 : vector<16x128xf32>
    %962 = arith.addf %958, %961 : vector<16x128xf32>
    %c125_i32_301 = arith.constant 125 : i32
    %963 = tpu.dynamic_rotate %939 by %c125_i32_301 dim 1 : vector<16x128xf32>, i32 -> vector<16x128xf32>
    %964 = vector.broadcast %97 : f32 to vector<16x128xf32>
    %965 = arith.mulf %964, %963 : vector<16x128xf32>
    %966 = arith.addf %962, %965 : vector<16x128xf32>
    %967 = vector.extract_strided_slice %966 {offsets = [0, 0], sizes = [16, 16], strides = [1, 1]} : vector<16x128xf32> to vector<16x16xf32>
    %968 = arith.negf %967 : vector<16x16xf32>
    %969 = math.exp %968 : vector<16x16xf32>
    %cst_302 = arith.constant 1.000000e+00 : f32
    %970 = vector.broadcast %cst_302 : f32 to vector<16x16xf32>
    %971 = arith.addf %970, %969 : vector<16x16xf32>
    %972 = arith.divf %970, %971 : vector<16x16xf32>
    %c1_303 = arith.constant 1 : index
    %c0_304 = arith.constant 0 : index
    %c0_305 = arith.constant 0 : index
    %c0_306 = arith.constant 0 : index
    %973 = vector.load %arg3[%c1_303, %c0_304, %c0_305, %c0_306] : memref<2x1x16x16xf32, #tpu.memory_space<vmem>>, vector<1x1x16x16xf32>
    %974 = vector.shape_cast %973 : vector<1x1x16x16xf32> to vector<16x16xf32>
    %975 = vector.shape_cast %972 : vector<16x16xf32> to vector<1x1x16x16xf32>
    tpu.vector_store %arg3[%c1_303, %c0_304, %c0_305, %c0_306], %975 {strides = array<i32>} : memref<2x1x16x16xf32, #tpu.memory_space<vmem>>, vector<1x1x16x16xf32>,
    return
  }
  func.func @transform_0(%arg0: i32) -> i32 {
    %c0_i32 = arith.constant 0 : i32
    %c0_i32_0 = arith.constant 0 : i32
    return %c0_i32 : i32
  }
  func.func @transform_1(%arg0: i32) -> (i32, i32, i32, i32) {
    %c0_i32 = arith.constant 0 : i32
    %c0_i32_0 = arith.constant 0 : i32
    %c0_i32_1 = arith.constant 0 : i32
    %c0_i32_2 = arith.constant 0 : i32
    return %arg0, %c0_i32, %c0_i32_0, %c0_i32_1 : i32, i32, i32, i32
  }
  func.func @transform_2(%arg0: i32) -> (i32, i32, i32, i32) {
    %c0_i32 = arith.constant 0 : i32
    %c0_i32_0 = arith.constant 0 : i32
    %c0_i32_1 = arith.constant 0 : i32
    %c0_i32_2 = arith.constant 0 : i32
    return %arg0, %c0_i32, %c0_i32_0, %c0_i32_1 : i32, i32, i32, i32
  }
}

</mosaic_0001>

<bundles_post_ra>
// kernel: spatial_attention.1
= control target key start
LH: loop header
LB: loop body
LE: loop exit
PB: predicated region body
PF: predicated region fallthrough
CT: control target
= control target key end

     0   :  { %7 = vsyncpa [#allocation6], 0  ;;  %s3966_s0 = inlined_call_operand.vmem [shape: f32[98], index: 0, kind: input, shape index: {}]   ;;  %s3967_s1 = inlined_call_operand.hbm [shape: f32[2,4,16,16], index: 1, kind: input, shape index: {}]   ;;  %s3968_s2 = inlined_call_operand.hbm [shape: f32[2,1,16,16], index: 2, kind: output, shape index: {}]  }
   0x1   :  { %8 = vsyncpa [#allocation4], 0 }
   0x2   :  { %9 = vsyncpa [#allocation5], 0  ;;  %s16_s11 = sshll.u32 %s3966_s0, 4  ;;  %s17_s11 = int_to_ptr.vmem [resolvable:$true] %s16_s11 }
   0x3   :  { %s2003_s12 = scalar_lea.vmem %s17_s11, 16  ;;  %p2008_p1 = scmp.lt.s32.totalorder %s17_s11, %s17_s11 }
   0x4   :  { %p2004_p0 = scmp.ne.s32.totalorder %s17_s11, %s2003_s12  ;;  %p2009_p2 = scmp.lt.s32.totalorder %s2003_s12, %s2003_s12 }
   0x6   :  { %p2010_p3 = por %p2009_p2, %p2008_p1 }
   0x8   :  { %p2011_p4 = pnand %p2010_p3, %p2004_p0 }
   0xa   :  { %2014 = shalt.err (!%p2011_p4)
}
   0xb   :  { %s2065_s13 = smov [#allocation3]   ;;  %s2066_s14 = smov [#allocation7]  }
   0xc   :  { %19 = dma.vmem_to_smem %s17_s11, 16, %s2065_s13, [#allocation6]  }
   0xd   :  { %s25_s15 = sshll.u32 %s2066_s14, 4  ;;  %s2015_s18 = scalar_lea.hbm %s3967_s1, 2048  ;;  %s26_s15 = int_to_ptr.vmem [resolvable:$true] %s25_s15 }
   0xe   :  { %p2016_p5 = scmp.ne.s32.totalorder %s3967_s1, %s2015_s18  ;;  %p2019_p6 = scmp.lt.u32.totalorder %s2015_s18, %s3967_s1 }
  0x10   :  { %p2021_p7 = pnand %p2019_p6, %p2016_p5 }
  0x12   :  { %2024 = shalt.err (!%p2021_p7)
}
  0x13   :  { %s2025_s22 = scalar_lea.vmem %s26_s15, 2048  ;;  %p2030_p9 = scmp.lt.s32.totalorder %s26_s15, %s26_s15 }
  0x14   :  { %p2026_p8 = scmp.ne.s32.totalorder %s26_s15, %s2025_s22  ;;  %p2031_p10 = scmp.lt.s32.totalorder %s2025_s22, %s2025_s22 }
  0x16   :  { %p2032_p11 = por %p2031_p10, %p2030_p9 }
  0x18   :  { %p2033_p12 = pnand %p2032_p11, %p2026_p8 }
  0x1a   :  { %2036 = shalt.err (!%p2033_p12)
}
  0x1b   :  { %s2067_s23 = smov 128   ;;  %s2068_s24 = smov 8  }
  0x1c   :  { %31 = dma.hbm_to_vmem [thread:$0]  %s3967_s1, 2048, %s26_s15, [#allocation4], %s2067_s23, %s2067_s23, %s2068_s24  }
  0x1d   :  { %2059 = dma.done.wait [#allocation6], 16  }
  0x1e   :  { %2060 = vsyncadd [#allocation6], 4294967280 }
  0x1f   :  { %2061 = dma.done.wait [#allocation4], 2048  }
  0x20   :  { %2062 = vsyncadd [#allocation4], 4294965248 }
  0x21   :  { %38 = sfence }
  0x22   :  { %v143_v0 = vld [vmem:[#allocation7] sm:$0xff]  ;;  %v146_v1 = vld [vmem:[#allocation7 + $0x10] sm:$0xff]  ;;  %v2069_v3 = vmov 0.0   ;;  %v144_v6 = vld [vmem:[#allocation7 + $0x8] sm:$0xff]  ;;  %vm168_vm0 = vcmask 130048   ;;  %s2070_s1 = smov 2  }
  0x23   :  { %v153_v2 = vld [vmem:[#allocation7 + $0x20] sm:$0xff]  ;;  %137 = vst [vmem:[#allocation2] sm:$0xff] %v2069_v3  ;;  %138 = vst [vmem:[#allocation2 + $0x8] sm:$0xff] %v2069_v3  ;;  %v148_v4 = vadd.f32 %v146_v1, %v143_v0  ;;  %v150_v5 = vmax.f32 %v143_v0, %v146_v1  ;;  %v147_v7 = vld [vmem:[#allocation7 + $0x18] sm:$0xff]  ;;  %s2071_s27 = smov 3   ;;  %s2072_s28 = smov 1  }
  0x24   :  { %139 = vst [vmem:[#allocation2 + $0x10] sm:$0xff] %v2069_v3  ;;  %140 = vst [vmem:[#allocation2 + $0x18] sm:$0xff] %v2069_v3  ;;  %v160_v8 = vld [vmem:[#allocation7 + $0x30] sm:$0xff]  ;;  %v149_v9 = vadd.f32 %v147_v7, %v144_v6  ;;  %v154_v10 = vld [vmem:[#allocation7 + $0x28] sm:$0xff]  ;;  %s2073_s29 = smov 127   ;;  %s2074_s30 = smov 126   ;;  %v151_v24 = vmax.f32 %v144_v6, %v147_v7 }
  0x25   :  { %141 = vst [vmem:[#allocation2 + $0x20] sm:$0xff] %v2069_v3  ;;  %142 = vst [vmem:[#allocation2 + $0x28] sm:$0xff] %v2069_v3  ;;  %v155_v11 = vadd.f32 %v153_v2, %v148_v4  ;;  %v157_v12 = vmax.f32 %v150_v5, %v153_v2  ;;  %v161_v13 = vld [vmem:[#allocation7 + $0x38] sm:$0xff]  ;;  %s2075_s3 = smov 125   ;;  %s1861_s4 = sld [smem:[#allocation3 + $0x1]] }
  0x26   :  { %v156_v14 = vadd.f32 %v154_v10, %v149_v9  ;;  %v158_v25 = vmax.f32 %v151_v24, %v154_v10  ;;  %s39_s5 = sld [smem:[#allocation3]]  ;;  %s1862_s6 = sld [smem:[#allocation3 + $0x2]]  ;;  %v1047_v24 = vld [vmem:[#allocation7 + $0x58] sm:$0xff] }
  0x27   :  { %v162_v15 = vadd.f32 %v160_v8, %v155_v11  ;;  %v164_v16 = vmax.f32 %v157_v12, %v160_v8  ;;  %s2414_s7 = sld [smem:[#allocation3 + $0x3]]  ;;  %s1864_s8 = sld [smem:[#allocation3 + $0x4]] }
  0x28   :  { %v163_v17 = vadd.f32 %v161_v13, %v156_v14  ;;  %v165_v26 = vmax.f32 %v158_v25, %v161_v13  ;;  %s1865_s9 = sld [smem:[#allocation3 + $0x5]]  ;;  %s1866_s10 = sld [smem:[#allocation3 + $0x6]] }
  0x29   :  { %v166_v18 = vmul.f32 0.25, %v162_v15  ;;  %172 = vst.msk [vmem:[#allocation2 + $0x1b] sm:$0xff] %vm168_vm0, %v164_v16  ;;  %s1867_s11 = sld [smem:[#allocation3 + $0x7]]  ;;  %s1868_s12 = sld [smem:[#allocation3 + $0x8]] }
  0x2a   :  { %v167_v19 = vmul.f32 0.25, %v163_v17  ;;  %173 = vst.msk [vmem:[#allocation2 + $0x23] sm:$0xff] %vm168_vm0, %v165_v26  ;;  %v1043_v17 = vld [vmem:[#allocation7 + $0x40] sm:$0xff]  ;;  %s1869_s13 = sld [smem:[#allocation3 + $0x9]]  ;;  %s2495_s14 = sld [smem:[#allocation3 + $0xa]] }
  0x2b   :  { %169 = vst.msk [vmem:[#allocation2 + $0x3] sm:$0xff] %vm168_vm0, %v166_v18  ;;  %v1044_v18 = vld [vmem:[#allocation7 + $0x48] sm:$0xff]  ;;  %v2420_v26 = vstv %s1861_s4  ;;  %s1871_s15 = sld [smem:[#allocation3 + $0xb]]  ;;  %s1872_s16 = sld [smem:[#allocation3 + $0xc]] }
  0x2c   :  { %170 = vst.msk [vmem:[#allocation2 + $0xb] sm:$0xff] %vm168_vm0, %v167_v19  ;;  %v1046_v19 = vld [vmem:[#allocation7 + $0x50] sm:$0xff]  ;;  %s1873_s17 = sld [smem:[#allocation3 + $0xd]]  ;;  %s1874_s18 = sld [smem:[#allocation3 + $0xe]] }
  0x2d   :  { %v1048_v25 = vadd.f32 %v1046_v19, %v1043_v17  ;;  %v2430_v17 = vstv %s1862_s6  ;;  %s1875_s19 = sld [smem:[#allocation3 + $0xf]]  ;;  %s1876_s20 = sld [smem:[#allocation3 + $0x10]] }
  0x2e   :  { %4117 = vst [vmem:[#allocation23_spill] sm:$0xff] %v2430_v17  ;;  %s1877_s0 = sld [smem:[#allocation3 + $0x11]]  ;;  %s1878_s21 = sld [smem:[#allocation3 + $0x12]] }
  0x2f   :  { %s1879_s22 = sld [smem:[#allocation3 + $0x13]]  ;;  %s1880_s25 = sld [smem:[#allocation3 + $0x14]] }
  0x30   :  { %v601_v0 = vld [vmem:[#allocation2 + $0x18] sm:$0xff]  ;;  %s1881_s26 = sld [smem:[#allocation3 + $0x15]]  ;;  %s1882_s4 = sld [smem:[#allocation3 + $0x16]] }
  0x31   :  { %v2362_v63 = vld [vmem:[#allocation2 + $0x20] sm:$0xff]  ;;  %s1884_s6 = sld [smem:[#allocation3 + $0x18]] }
  0x32   :  { %v2113_v20 = vld [vmem:[#allocation2] sm:$0xff]  ;;  %4114 = vst [vmem:[#allocation20_spill] sm:$0xff] %v2362_v63 }
  0x33   :  { %185 = vrot.lane.b32.xlu1 %v2113_v20, %s2070_s1  ;;  %176 = vrot.lane.b32.xlu0 %v2113_v20, %s2071_s27  ;;  %v2119_v21 = vld [vmem:[#allocation2 + $0x8] sm:$0xff]  ;;  %v2408_v14 = vld [vmem:[#allocation2 + $0x19] sm:$0xff] }
  0x34   :  { %v2141_v22 = vld [vmem:[#allocation2 + $0x9] sm:$0xff]  ;;  %v2143_v23 = vld [vmem:[#allocation2 + $0x1] sm:$0xff] }
  0x35   :  { %v2170_v27 = vld [vmem:[#allocation2 + $0xa] sm:$0xff]  ;;  %v2172_v28 = vld [vmem:[#allocation2 + $0x2] sm:$0xff] }
  0x36   :  { %v2198_v29 = vld [vmem:[#allocation2 + $0xb] sm:$0xff]  ;;  %v2200_v30 = vld [vmem:[#allocation2 + $0x3] sm:$0xff] }
  0x37   :  { %187 = vrot.lane.b32.xlu1 %v2119_v21, %s2070_s1  ;;  %178 = vrot.lane.b32.xlu0 %v2119_v21, %s2071_s27  ;;  %4106 = vst [vmem:[#allocation12_spill] sm:$0xff] %v2198_v29  ;;  %4107 = vst [vmem:[#allocation13_spill] sm:$0xff] %v2200_v30  ;;  %v2226_v31 = vld [vmem:[#allocation2 + $0xc] sm:$0xff]  ;;  %v2228_v32 = vld [vmem:[#allocation2 + $0x4] sm:$0xff] }
  0x38   :  { %4108 = vst [vmem:[#allocation14_spill] sm:$0xff] %v2226_v31  ;;  %4109 = vst [vmem:[#allocation15_spill] sm:$0xff] %v2228_v32  ;;  %v2258_v35 = vld [vmem:[#allocation2 + $0xd] sm:$0xff]  ;;  %v2260_v36 = vld [vmem:[#allocation2 + $0x5] sm:$0xff] }
  0x39   :  { %4110 = vst [vmem:[#allocation16_spill] sm:$0xff] %v2258_v35  ;;  %4111 = vst [vmem:[#allocation17_spill] sm:$0xff] %v2260_v36  ;;  %v2310_v49 = vld [vmem:[#allocation2 + $0xe] sm:$0xff]  ;;  %v2312_v50 = vld [vmem:[#allocation2 + $0x6] sm:$0xff] }
  0x3a   :  { %4112 = vst [vmem:[#allocation18_spill] sm:$0xff] %v2310_v49  ;;  %4113 = vst [vmem:[#allocation19_spill] sm:$0xff] %v2312_v50  ;;  %v2406_v13 = vld [vmem:[#allocation2 + $0x21] sm:$0xff] }
  0x3b   :  { %196 = vrot.lane.b32.xlu1 %v2119_v21, %s2072_s28  ;;  %194 = vrot.lane.b32.xlu0 %v2113_v20, %s2072_s28 }
  0x3f   :  { %210 = vrot.lane.b32.xlu1 %v2119_v21, %s2073_s29  ;;  %208 = vrot.lane.b32.xlu0 %v2113_v20, %s2073_s29 }
  0x43   :  { %219 = vrot.lane.b32.xlu1 %v2119_v21, %s2074_s30  ;;  %217 = vrot.lane.b32.xlu0 %v2113_v20, %s2074_s30 }
  0x47   :  { %228 = vrot.lane.b32.xlu1 %v2119_v21, %s2075_s3  ;;  %226 = vrot.lane.b32.xlu0 %v2113_v20, %s2075_s3 }
  0x4b   :  { %239 = vrot.lane.b32.xlu1 %v2141_v22, %s2071_s27  ;;  %237 = vrot.lane.b32.xlu0 %v2143_v23, %s2071_s27 }
  0x4f   :  { %248 = vrot.lane.b32.xlu1 %v2141_v22, %s2070_s1  ;;  %246 = vrot.lane.b32.xlu0 %v2143_v23, %s2070_s1 }
  0x53   :  { %257 = vrot.lane.b32.xlu1 %v2141_v22, %s2072_s28  ;;  %255 = vrot.lane.b32.xlu0 %v2143_v23, %s2072_s28 }
  0x57   :  { %271 = vrot.lane.b32.xlu1 %v2141_v22, %s2073_s29  ;;  %269 = vrot.lane.b32.xlu0 %v2143_v23, %s2073_s29 }
  0x5b   :  { %280 = vrot.lane.b32.xlu1 %v2141_v22, %s2074_s30  ;;  %278 = vrot.lane.b32.xlu0 %v2143_v23, %s2074_s30 }
  0x5f   :  { %289 = vrot.lane.b32.xlu1 %v2141_v22, %s2075_s3  ;;  %287 = vrot.lane.b32.xlu0 %v2143_v23, %s2075_s3 }
  0x63   :  { %300 = vrot.lane.b32.xlu1 %v2170_v27, %s2071_s27  ;;  %298 = vrot.lane.b32.xlu0 %v2172_v28, %s2071_s27 }
  0x67   :  { %309 = vrot.lane.b32.xlu1 %v2170_v27, %s2070_s1  ;;  %307 = vrot.lane.b32.xlu0 %v2172_v28, %s2070_s1 }
  0x6b   :  { %318 = vrot.lane.b32.xlu1 %v2170_v27, %s2072_s28  ;;  %316 = vrot.lane.b32.xlu0 %v2172_v28, %s2072_s28 }
  0x6f   :  { %332 = vrot.lane.b32.xlu1 %v2170_v27, %s2073_s29  ;;  %330 = vrot.lane.b32.xlu0 %v2172_v28, %s2073_s29 }
  0x73   :  { %341 = vrot.lane.b32.xlu1 %v2170_v27, %s2074_s30  ;;  %339 = vrot.lane.b32.xlu0 %v2172_v28, %s2074_s30 }
  0x77   :  { %350 = vrot.lane.b32.xlu1 %v2170_v27, %s2075_s3  ;;  %348 = vrot.lane.b32.xlu0 %v2172_v28, %s2075_s3 }
  0x7b   :  { %361 = vrot.lane.b32.xlu1 %v2198_v29, %s2071_s27  ;;  %359 = vrot.lane.b32.xlu0 %v2200_v30, %s2071_s27 }
  0x7f   :  { %370 = vrot.lane.b32.xlu1 %v2198_v29, %s2070_s1  ;;  %368 = vrot.lane.b32.xlu0 %v2200_v30, %s2070_s1 }
  0x83   :  { %379 = vrot.lane.b32.xlu1 %v2198_v29, %s2072_s28  ;;  %377 = vrot.lane.b32.xlu0 %v2200_v30, %s2072_s28 }
  0x87   :  { %393 = vrot.lane.b32.xlu1 %v2198_v29, %s2073_s29  ;;  %391 = vrot.lane.b32.xlu0 %v2200_v30, %s2073_s29 }
  0x8b   :  { %402 = vrot.lane.b32.xlu1 %v2198_v29, %s2074_s30  ;;  %400 = vrot.lane.b32.xlu0 %v2200_v30, %s2074_s30 }
  0x8f   :  { %411 = vrot.lane.b32.xlu1 %v2198_v29, %s2075_s3  ;;  %409 = vrot.lane.b32.xlu0 %v2200_v30, %s2075_s3  ;;  %v1060_v30 = vld [vmem:[#allocation7 + $0x70] sm:$0xff]  ;;  %v1061_v29 = vld [vmem:[#allocation7 + $0x78] sm:$0xff] }
  0x93   :  { %422 = vrot.lane.b32.xlu1 %v2226_v31, %s2071_s27  ;;  %420 = vrot.lane.b32.xlu0 %v2228_v32, %s2071_s27 }
  0x97   :  { %431 = vrot.lane.b32.xlu1 %v2226_v31, %s2070_s1  ;;  %429 = vrot.lane.b32.xlu0 %v2228_v32, %s2070_s1 }
  0x9b   :  { %440 = vrot.lane.b32.xlu1 %v2226_v31, %s2072_s28  ;;  %438 = vrot.lane.b32.xlu0 %v2228_v32, %s2072_s28 }
  0x9f   :  { %454 = vrot.lane.b32.xlu1 %v2226_v31, %s2073_s29  ;;  %452 = vrot.lane.b32.xlu0 %v2228_v32, %s2073_s29 }
  0xa3   :  { %463 = vrot.lane.b32.xlu1 %v2226_v31, %s2074_s30  ;;  %461 = vrot.lane.b32.xlu0 %v2228_v32, %s2074_s30 }
  0xa5   :  { %v2250_v33 = vpop.permute.xlu1 %185  ;;  %v2252_v34 = vpop.permute.xlu0 %176 }
  0xa7   :  { %472 = vrot.lane.b32.xlu1 %v2226_v31, %s2075_s3  ;;  %470 = vrot.lane.b32.xlu0 %v2228_v32, %s2075_s3 }
  0xa9   :  { %v2262_v37 = vpop.permute.xlu1 %187  ;;  %v2264_v38 = vpop.permute.xlu0 %178 }
  0xab   :  { %483 = vrot.lane.b32.xlu1 %v2258_v35, %s2071_s27  ;;  %481 = vrot.lane.b32.xlu0 %v2260_v36, %s2071_s27 }
  0xad   :  { %v2270_v39 = vpop.permute.xlu1 %196  ;;  %v2272_v40 = vpop.permute.xlu0 %194 }
  0xaf   :  { %492 = vrot.lane.b32.xlu1 %v2258_v35, %s2070_s1  ;;  %490 = vrot.lane.b32.xlu0 %v2260_v36, %s2070_s1 }
  0xb1   :  { %v2278_v41 = vpop.permute.xlu1 %210  ;;  %v2280_v42 = vpop.permute.xlu0 %208 }
  0xb3   :  { %501 = vrot.lane.b32.xlu1 %v2258_v35, %s2072_s28  ;;  %499 = vrot.lane.b32.xlu0 %v2260_v36, %s2072_s28 }
  0xb5   :  { %v2286_v43 = vpop.permute.xlu1 %219  ;;  %v2288_v44 = vpop.permute.xlu0 %217 }
  0xb7   :  { %515 = vrot.lane.b32.xlu1 %v2258_v35, %s2073_s29  ;;  %513 = vrot.lane.b32.xlu0 %v2260_v36, %s2073_s29 }
  0xb9   :  { %v2294_v45 = vpop.permute.xlu1 %228  ;;  %v2296_v46 = vpop.permute.xlu0 %226 }
  0xbb   :  { %524 = vrot.lane.b32.xlu1 %v2258_v35, %s2074_s30  ;;  %522 = vrot.lane.b32.xlu0 %v2260_v36, %s2074_s30 }
  0xbd   :  { %v2302_v47 = vpop.permute.xlu1 %239  ;;  %v2304_v48 = vpop.permute.xlu0 %237 }
  0xbf   :  { %533 = vrot.lane.b32.xlu1 %v2258_v35, %s2075_s3  ;;  %531 = vrot.lane.b32.xlu0 %v2260_v36, %s2075_s3 }
  0xc1   :  { %v2314_v51 = vpop.permute.xlu1 %248  ;;  %v2316_v52 = vpop.permute.xlu0 %246 }
  0xc3   :  { %544 = vrot.lane.b32.xlu1 %v2310_v49, %s2071_s27  ;;  %542 = vrot.lane.b32.xlu0 %v2312_v50, %s2071_s27 }
  0xc5   :  { %v2322_v53 = vpop.permute.xlu1 %257  ;;  %v2324_v54 = vpop.permute.xlu0 %255 }
  0xc7   :  { %553 = vrot.lane.b32.xlu1 %v2310_v49, %s2070_s1  ;;  %551 = vrot.lane.b32.xlu0 %v2312_v50, %s2070_s1 }
  0xc9   :  { %v2330_v55 = vpop.permute.xlu1 %271  ;;  %v2332_v56 = vpop.permute.xlu0 %269 }
  0xcb   :  { %562 = vrot.lane.b32.xlu1 %v2310_v49, %s2072_s28  ;;  %560 = vrot.lane.b32.xlu0 %v2312_v50, %s2072_s28 }
  0xcd   :  { %v2338_v57 = vpop.permute.xlu1 %280  ;;  %v2340_v58 = vpop.permute.xlu0 %278 }
  0xcf   :  { %576 = vrot.lane.b32.xlu1 %v2310_v49, %s2073_s29  ;;  %574 = vrot.lane.b32.xlu0 %v2312_v50, %s2073_s29 }
  0xd1   :  { %v2346_v59 = vpop.permute.xlu1 %289  ;;  %v2348_v60 = vpop.permute.xlu0 %287 }
  0xd3   :  { %585 = vrot.lane.b32.xlu1 %v2310_v49, %s2074_s30  ;;  %583 = vrot.lane.b32.xlu0 %v2312_v50, %s2074_s30 }
  0xd5   :  { %v2354_v61 = vpop.permute.xlu1 %300  ;;  %v2356_v62 = vpop.permute.xlu0 %298 }
  0xd7   :  { %594 = vrot.lane.b32.xlu1 %v2310_v49, %s2075_s3  ;;  %592 = vrot.lane.b32.xlu0 %v2312_v50, %s2075_s3  ;;  %v1054_v50 = vld [vmem:[#allocation7 + $0x68] sm:$0xff]  ;;  %v2422_v49 = vstv %s39_s5  ;;  %s1883_s5 = sld [smem:[#allocation3 + $0x17]] }
  0xd9   :  { %v2364_v1 = vpop.permute.xlu1 %309  ;;  %v2366_v2 = vpop.permute.xlu0 %307 }
  0xdb   :  { %605 = vrot.lane.b32.xlu1 %v2362_v63, %s2071_s27  ;;  %603 = vrot.lane.b32.xlu0 %v601_v0, %s2071_s27 }
  0xdd   :  { %v2371_v3 = vpop.permute.xlu1 %318  ;;  %v2373_v4 = vpop.permute.xlu0 %316 }
  0xdf   :  { %614 = vrot.lane.b32.xlu1 %v2362_v63, %s2070_s1  ;;  %612 = vrot.lane.b32.xlu0 %v601_v0, %s2070_s1 }
  0xe1   :  { %v2378_v5 = vpop.permute.xlu1 %332  ;;  %v2380_v6 = vpop.permute.xlu0 %330 }
  0xe3   :  { %623 = vrot.lane.b32.xlu1 %v2362_v63, %s2072_s28  ;;  %621 = vrot.lane.b32.xlu0 %v601_v0, %s2072_s28 }
  0xe5   :  { %v2385_v7 = vpop.permute.xlu1 %341  ;;  %v2387_v8 = vpop.permute.xlu0 %339 }
  0xe7   :  { %637 = vrot.lane.b32.xlu1 %v2362_v63, %s2073_s29  ;;  %635 = vrot.lane.b32.xlu0 %v601_v0, %s2073_s29 }
  0xe9   :  { %v2392_v9 = vpop.permute.xlu1 %350  ;;  %v2394_v10 = vpop.permute.xlu0 %348 }
  0xeb   :  { %646 = vrot.lane.b32.xlu1 %v2362_v63, %s2074_s30  ;;  %644 = vrot.lane.b32.xlu0 %v601_v0, %s2074_s30 }
  0xed   :  { %v2399_v11 = vpop.permute.xlu1 %361  ;;  %v2401_v12 = vpop.permute.xlu0 %359 }
  0xef   :  { %655 = vrot.lane.b32.xlu1 %v2362_v63, %s2075_s3  ;;  %653 = vrot.lane.b32.xlu0 %v601_v0, %s2075_s3  ;;  %v1049_v0 = vadd.f32 %v1047_v24, %v1044_v18  ;;  %v1053_v63 = vld [vmem:[#allocation7 + $0x60] sm:$0xff] }
  0xf0   :  { %v1055_v32 = vadd.f32 %v1053_v63, %v1048_v25  ;;  %v181_v63 = vmul.f32 %v2422_v49, %v2252_v34 }
  0xf1   :  { %v2410_v15 = vpop.permute.xlu1 %370  ;;  %v2412_v16 = vpop.permute.xlu0 %368  ;;  %v1056_v31 = vadd.f32 %v1054_v50, %v1049_v0  ;;  %v191_v50 = vmul.f32 %v2420_v26, %v2262_v37 }
  0xf2   :  { %4115 = vst [vmem:[#allocation21_spill] sm:$0xff] %v2412_v16  ;;  %v190_v16 = vmul.f32 %v2420_v26, %v2250_v33  ;;  %v1062_v18 = vadd.f32 %v1060_v30, %v1055_v32  ;;  %v182_v33 = vmul.f32 %v2422_v49, %v2264_v38  ;;  %v199_v30 = vmul.f32 %v2430_v17, %v2272_v40 }
  0xf3   :  { %666 = vrot.lane.b32.xlu1 %v2406_v13, %s2071_s27  ;;  %664 = vrot.lane.b32.xlu0 %v2408_v14, %s2071_s27  ;;  %v1063_v19 = vadd.f32 %v1061_v29, %v1056_v31  ;;  %v2451_v32 = vstv %s2414_s7  ;;  %s1885_s7 = sld [smem:[#allocation3 + $0x19]] }
  0xf4   :  { %v1066_v0 = vmul.f32 0.25, %v1062_v18  ;;  %v192_v31 = vadd.f32 %v190_v16, %v181_v63  ;;  %v193_v34 = vadd.f32 %v191_v50, %v182_v33  ;;  %v205_v40 = vmul.f32 %v2451_v32, %v2119_v21 }
  0xf5   :  { %v2424_v36 = vpop.permute.xlu1 %379  ;;  %v2426_v35 = vpop.permute.xlu0 %377  ;;  %v1067_v29 = vmul.f32 0.25, %v1063_v19  ;;  %v2467_v19 = vstv %s1864_s8  ;;  %v2473_v16 = vstv %s1865_s9  ;;  %s1886_s8 = sld [smem:[#allocation3 + $0x1a]]  ;;  %s1887_s9 = sld [smem:[#allocation3 + $0x1b]] }
  0xf6   :  { %4116 = vst [vmem:[#allocation22_spill] sm:$0xff] %v2426_v35  ;;  %v200_v35 = vmul.f32 %v2430_v17, %v2270_v39  ;;  %1068 = vst.msk [vmem:[#allocation2 + $0x3] sm:$0xff] %vm168_vm0, %v1066_v0  ;;  %v201_v18 = vadd.f32 %v199_v30, %v192_v31  ;;  %v204_v17 = vmul.f32 %v2451_v32, %v2113_v20  ;;  %v2483_v0 = vstv %s1866_s10  ;;  %s1888_s10 = sld [smem:[#allocation3 + $0x1c]] }
  0xf7   :  { %675 = vrot.lane.b32.xlu1 %v2406_v13, %s2070_s1  ;;  %673 = vrot.lane.b32.xlu0 %v2408_v14, %s2070_s1  ;;  %1069 = vst.msk [vmem:[#allocation2 + $0xb] sm:$0xff] %vm168_vm0, %v1067_v29  ;;  %v214_v20 = vmul.f32 %v2467_v19, %v2278_v41  ;;  %v213_v33 = vmul.f32 %v2467_v19, %v2280_v42  ;;  %v2493_v29 = vstv %s1867_s11  ;;  %s1889_s11 = sld [smem:[#allocation3 + $0x1d]] }
  0xf8   :  { %v202_v39 = vadd.f32 %v200_v35, %v193_v34  ;;  %v206_v50 = vadd.f32 %v204_v17, %v201_v18  ;;  %v223_v30 = vmul.f32 %v2473_v16, %v2286_v43  ;;  %v222_v17 = vmul.f32 %v2473_v16, %v2288_v44 }
  0xf9   :  { %v2442_v24 = vpop.permute.xlu1 %393  ;;  %v2444_v25 = vpop.permute.xlu0 %391  ;;  %v2505_v43 = vstv %s1868_s12  ;;  %s1890_s12 = sld [smem:[#allocation3 + $0x1e]] }
  0xfa   :  { %v207_v21 = vadd.f32 %v205_v40, %v202_v39  ;;  %v215_v34 = vadd.f32 %v213_v33, %v206_v50  ;;  %v232_v39 = vmul.f32 %v2483_v0, %v2294_v45  ;;  %v231_v40 = vmul.f32 %v2483_v0, %v2296_v46  ;;  %v2515_v45 = vld [vmem:[#allocation2 + $0x22] sm:$0xff] }
  0xfb   :  { %684 = vrot.lane.b32.xlu1 %v2406_v13, %s2072_s28  ;;  %682 = vrot.lane.b32.xlu0 %v2408_v14, %s2072_s28  ;;  %v242_v50 = vmul.f32 %v2493_v29, %v2304_v48  ;;  %v2519_v46 = vstv %s1869_s13  ;;  %v251_v48 = vmul.f32 %v2505_v43, %v2316_v52  ;;  %s1891_s13 = sld [smem:[#allocation3 + $0x1f]] }
  0xfc   :  { %v216_v31 = vadd.f32 %v214_v20, %v207_v21  ;;  %v224_v18 = vadd.f32 %v222_v17, %v215_v34  ;;  %v243_v21 = vmul.f32 %v2493_v29, %v2302_v47  ;;  %v2517_v20 = vld [vmem:[#allocation2 + $0x1a] sm:$0xff]  ;;  %4118 = vst [vmem:[#allocation24_spill] sm:$0xff] %v2519_v46  ;;  %v252_v47 = vmul.f32 %v2505_v43, %v2314_v51 }
  0xfd   :  { %v2458_v37 = vpop.permute.xlu1 %402  ;;  %v2460_v38 = vpop.permute.xlu0 %400  ;;  %v261_v34 = vmul.f32 %v2519_v46, %v2322_v53 }
  0xfe   :  { %v225_v44 = vadd.f32 %v223_v30, %v216_v31  ;;  %v233_v30 = vadd.f32 %v231_v40, %v224_v18  ;;  %v2538_v40 = vstv %s2495_s14  ;;  %s1892_s14 = sld [smem:[#allocation3 + $0x20]] }
  0xff   :  { %698 = vrot.lane.b32.xlu1 %v2406_v13, %s2073_s29  ;;  %696 = vrot.lane.b32.xlu0 %v2408_v14, %s2073_s29  ;;  %4119 = vst [vmem:[#allocation25_spill] sm:$0xff] %v2538_v40 }
 0x100   :  { %v244_v31 = vadd.f32 %v242_v50, %v233_v30  ;;  %v265_v50 = vmul.f32 %v2538_v40, %v2143_v23 }
 0x101   :  { %v2475_v35 = vpop.permute.xlu1 %411  ;;  %v2477_v63 = vpop.permute.xlu0 %409 }
 0x102   :  { %v253_v18 = vadd.f32 %v251_v48, %v244_v31  ;;  %v2558_v48 = vstv %s1872_s16  ;;  %s1894_s16 = sld [smem:[#allocation3 + $0x22]] }
 0x103   :  { %707 = vrot.lane.b32.xlu1 %v2406_v13, %s2074_s30  ;;  %705 = vrot.lane.b32.xlu0 %v2408_v14, %s2074_s30  ;;  %4121 = vst [vmem:[#allocation27_spill] sm:$0xff] %v2558_v48 }
 0x105   :  { %v2497_v41 = vpop.permute.xlu1 %422  ;;  %v2499_v42 = vpop.permute.xlu0 %420 }
 0x107   :  { %716 = vrot.lane.b32.xlu1 %v2406_v13, %s2075_s3  ;;  %714 = vrot.lane.b32.xlu0 %v2408_v14, %s2075_s3  ;;  %v234_v14 = vadd.f32 %v232_v39, %v225_v44  ;;  %v260_v39 = vmul.f32 %v2519_v46, %v2324_v54  ;;  %v266_v54 = vmul.f32 %v2538_v40, %v2141_v22 }
 0x108   :  { %v283_v46 = vmul.f32 %v2558_v48, %v2340_v58 }
 0x109   :  { %v2521_v13 = vpop.permute.xlu1 %431  ;;  %v2523_v33 = vpop.permute.xlu0 %429  ;;  %v245_v17 = vadd.f32 %v243_v21, %v234_v14  ;;  %v262_v21 = vadd.f32 %v260_v39, %v253_v18  ;;  %v2552_v14 = vstv %s1871_s15  ;;  %v284_v18 = vmul.f32 %v2558_v48, %v2338_v57  ;;  %s1893_s15 = sld [smem:[#allocation3 + $0x21]] }
 0x10a   :  { %4120 = vst [vmem:[#allocation26_spill] sm:$0xff] %v2552_v14  ;;  %v275_v23 = vmul.f32 %v2552_v14, %v2330_v55  ;;  %v274_v31 = vmul.f32 %v2552_v14, %v2332_v56 }
 0x10b   :  { %727 = vrot.lane.b32.xlu1 %v2515_v45, %s2071_s27  ;;  %725 = vrot.lane.b32.xlu0 %v2517_v20, %s2071_s27  ;;  %v254_v44 = vadd.f32 %v252_v47, %v245_v17  ;;  %v267_v17 = vadd.f32 %v265_v50, %v262_v21  ;;  %v2588_v21 = vstv %s1875_s19  ;;  %s1897_s19 = sld [smem:[#allocation3 + $0x25]] }
 0x10d   :  { %v2540_v51 = vpop.permute.xlu1 %440  ;;  %v2542_v52 = vpop.permute.xlu0 %438  ;;  %v263_v53 = vadd.f32 %v261_v34, %v254_v44  ;;  %v2568_v34 = vstv %s1873_s17  ;;  %v276_v56 = vadd.f32 %v274_v31, %v267_v17  ;;  %v2598_v17 = vstv %s1876_s20  ;;  %s1895_s17 = sld [smem:[#allocation3 + $0x23]]  ;;  %s2822_s20 = sld [smem:[#allocation3 + $0x26]] }
 0x10e   :  { %v292_v57 = vmul.f32 %v2568_v34, %v2348_v60  ;;  %4122 = vst [vmem:[#allocation28_spill] sm:$0xff] %v2598_v17 }
 0x10f   :  { %736 = vrot.lane.b32.xlu1 %v2515_v45, %s2070_s1  ;;  %734 = vrot.lane.b32.xlu0 %v2517_v20, %s2070_s1  ;;  %v268_v22 = vadd.f32 %v266_v54, %v263_v53  ;;  %v2578_v53 = vstv %s1874_s18  ;;  %v293_v54 = vmul.f32 %v2568_v34, %v2346_v59  ;;  %v285_v14 = vadd.f32 %v283_v46, %v276_v56  ;;  %v2622_v56 = vld [vmem:[#allocation2 + $0x23] sm:$0xff]  ;;  %s1896_s18 = sld [smem:[#allocation3 + $0x24]] }
 0x110   :  { %v304_v40 = vmul.f32 %v2578_v53, %v2354_v61  ;;  %v313_v46 = vmul.f32 %v2588_v21, %v2364_v1  ;;  %v312_v61 = vmul.f32 %v2588_v21, %v2366_v2 }
 0x111   :  { %v2554_v30 = vpop.permute.xlu1 %454  ;;  %v2556_v47 = vpop.permute.xlu0 %452  ;;  %v277_v55 = vadd.f32 %v275_v23, %v268_v22  ;;  %v303_v22 = vmul.f32 %v2578_v53, %v2356_v62  ;;  %v294_v60 = vadd.f32 %v292_v57, %v285_v14  ;;  %v2616_v14 = vstv %s1877_s0  ;;  %s1899_s0 = sld [smem:[#allocation3 + $0x27]] }
 0x112   :  { %v327_v57 = vmul.f32 %v2616_v14, %v2170_v27 }
 0x113   :  { %745 = vrot.lane.b32.xlu1 %v2515_v45, %s2072_s28  ;;  %743 = vrot.lane.b32.xlu0 %v2517_v20, %s2072_s28  ;;  %v286_v48 = vadd.f32 %v284_v18, %v277_v55  ;;  %v305_v18 = vadd.f32 %v303_v22, %v294_v60  ;;  %v322_v55 = vmul.f32 %v2598_v17, %v2371_v3 }
 0x115   :  { %v2570_v39 = vpop.permute.xlu1 %463  ;;  %v2572_v44 = vpop.permute.xlu0 %461  ;;  %v295_v59 = vadd.f32 %v293_v54, %v286_v48  ;;  %v321_v48 = vmul.f32 %v2598_v17, %v2373_v4  ;;  %v314_v2 = vadd.f32 %v312_v61, %v305_v18  ;;  %v2650_v18 = vstv %s1880_s25  ;;  %s1902_s25 = sld [smem:[#allocation3 + $0x2a]] }
 0x116   :  { %4125 = vst [vmem:[#allocation31_spill] sm:$0xff] %v2650_v18 }
 0x117   :  { %759 = vrot.lane.b32.xlu1 %v2515_v45, %s2073_s29  ;;  %757 = vrot.lane.b32.xlu0 %v2517_v20, %s2073_s29  ;;  %v306_v31 = vadd.f32 %v304_v40, %v295_v59  ;;  %v2624_v40 = vld [vmem:[#allocation2 + $0x1b] sm:$0xff]  ;;  %v323_v22 = vadd.f32 %v321_v48, %v314_v2  ;;  %v2640_v59 = vstv %s1879_s22  ;;  %s1901_s22 = sld [smem:[#allocation3 + $0x29]] }
 0x118   :  { %4124 = vst [vmem:[#allocation30_spill] sm:$0xff] %v2640_v59  ;;  %v344_v48 = vmul.f32 %v2640_v59, %v2387_v8 }
 0x119   :  { %v2590_v58 = vpop.permute.xlu1 %472  ;;  %v2592_v50 = vpop.permute.xlu0 %470  ;;  %v315_v1 = vadd.f32 %v313_v46, %v306_v31 }
 0x11b   :  { %768 = vrot.lane.b32.xlu1 %v2515_v45, %s2074_s30  ;;  %766 = vrot.lane.b32.xlu0 %v2517_v20, %s2074_s30  ;;  %v324_v4 = vadd.f32 %v322_v55, %v315_v1  ;;  %v345_v55 = vmul.f32 %v2640_v59, %v2385_v7  ;;  %v2660_v1 = vstv %s1881_s26  ;;  %s1903_s26 = sld [smem:[#allocation3 + $0x2b]] }
 0x11c   :  { %4126 = vst [vmem:[#allocation32_spill] sm:$0xff] %v2660_v1 }
 0x11d   :  { %v2608_v23 = vpop.permute.xlu1 %483  ;;  %v2610_v62 = vpop.permute.xlu0 %481  ;;  %v329_v27 = vadd.f32 %v327_v57, %v324_v4  ;;  %v354_v57 = vmul.f32 %v2650_v18, %v2392_v9  ;;  %v2680_v9 = vstv %s1883_s5  ;;  %s1905_s5 = sld [smem:[#allocation3 + $0x2d]] }
 0x11e   :  { %4128 = vst [vmem:[#allocation34_spill] sm:$0xff] %v2680_v9 }
 0x11f   :  { %777 = vrot.lane.b32.xlu1 %v2515_v45, %s2075_s3  ;;  %775 = vrot.lane.b32.xlu0 %v2517_v20, %s2075_s3  ;;  %v326_v45 = vmul.f32 %v2616_v14, %v2172_v28  ;;  %v2634_v20 = vstv %s1878_s21  ;;  %s1900_s21 = sld [smem:[#allocation3 + $0x28]] }
 0x120   :  { %4123 = vst [vmem:[#allocation29_spill] sm:$0xff] %v2634_v20  ;;  %v336_v28 = vmul.f32 %v2634_v20, %v2378_v5  ;;  %v335_v31 = vmul.f32 %v2634_v20, %v2380_v6 }
 0x121   :  { %v2626_v3 = vpop.permute.xlu1 %492  ;;  %v2628_v54 = vpop.permute.xlu0 %490  ;;  %v328_v61 = vadd.f32 %v326_v45, %v323_v22  ;;  %v353_v22 = vmul.f32 %v2650_v18, %v2394_v10  ;;  %v2670_v45 = vstv %s1882_s4  ;;  %s1904_s4 = sld [smem:[#allocation3 + $0x2c]] }
 0x122   :  { %v338_v2 = vadd.f32 %v336_v28, %v329_v27  ;;  %4127 = vst [vmem:[#allocation33_spill] sm:$0xff] %v2670_v45  ;;  %v365_v27 = vmul.f32 %v2660_v1, %v2399_v11  ;;  %v374_v59 = vmul.f32 %v2670_v45, %v2410_v15 }
 0x123   :  { %788 = vrot.lane.b32.xlu1 %v2622_v56, %s2071_s27  ;;  %786 = vrot.lane.b32.xlu0 %v2624_v40, %s2071_s27  ;;  %v337_v4 = vadd.f32 %v335_v31, %v328_v61  ;;  %v364_v61 = vmul.f32 %v2660_v1, %v2401_v12 }
 0x124   :  { %v347_v7 = vadd.f32 %v345_v55, %v338_v2  ;;  %v4129_v55 = vld [vmem:[#allocation21_spill] sm:$0xff]  ;;  %v383_v2 = vmul.f32 %v2680_v9, %v2424_v36 }
 0x125   :  { %v2642_v60 = vpop.permute.xlu1 %501  ;;  %v2644_v46 = vpop.permute.xlu0 %499  ;;  %v346_v8 = vadd.f32 %v344_v48, %v337_v4  ;;  %v373_v48 = vmul.f32 %v2670_v45, %v4129_v55  ;;  %v4130_v4 = vld [vmem:[#allocation22_spill] sm:$0xff] }
 0x126   :  { %v356_v31 = vadd.f32 %v354_v57, %v347_v7  ;;  %v382_v57 = vmul.f32 %v2680_v9, %v4130_v4  ;;  %v2712_v9 = vstv %s1885_s7  ;;  %s1907_s7 = sld [smem:[#allocation3 + $0x2f]] }
 0x127   :  { %797 = vrot.lane.b32.xlu1 %v2622_v56, %s2070_s1  ;;  %795 = vrot.lane.b32.xlu0 %v2624_v40, %s2070_s1  ;;  %v355_v18 = vadd.f32 %v353_v22, %v346_v8  ;;  %v2698_v22 = vstv %s1884_s6  ;;  %4134 = vst [vmem:[#allocation22_spill] sm:$0xff] %v2712_v9  ;;  %s1906_s6 = sld [smem:[#allocation3 + $0x2e]] }
 0x128   :  { %v367_v11 = vadd.f32 %v365_v27, %v356_v31  ;;  %4131 = vst [vmem:[#allocation21_spill] sm:$0xff] %v2698_v22  ;;  %v4133_v31 = vld [vmem:[#allocation13_spill] sm:$0xff] }
 0x129   :  { %v2662_v5 = vpop.permute.xlu1 %515  ;;  %v2664_v6 = vpop.permute.xlu0 %513  ;;  %v366_v12 = vadd.f32 %v364_v61, %v355_v18  ;;  %v4132_v18 = vld [vmem:[#allocation12_spill] sm:$0xff]  ;;  %v387_v4 = vmul.f32 %v2698_v22, %v4133_v31  ;;  %v2732_v31 = vstv %s1887_s9  ;;  %s1909_s9 = sld [smem:[#allocation3 + $0x31]] }
 0x12a   :  { %v376_v8 = vadd.f32 %v374_v59, %v367_v11  ;;  %v388_v27 = vmul.f32 %v2698_v22, %v4132_v18  ;;  %v2718_v11 = vstv %s1886_s8  ;;  %v2730_v18 = vld [vmem:[#allocation2 + $0x1c] sm:$0xff]  ;;  %s1908_s8 = sld [smem:[#allocation3 + $0x30]] }
 0x12b   :  { %806 = vrot.lane.b32.xlu1 %v2622_v56, %s2072_s28  ;;  %804 = vrot.lane.b32.xlu0 %v2624_v40, %s2072_s28  ;;  %v375_v55 = vadd.f32 %v373_v48, %v366_v12  ;;  %4135 = vst [vmem:[#allocation12_spill] sm:$0xff] %v2718_v11 }
 0x12c   :  { %v385_v36 = vadd.f32 %v383_v2, %v376_v8  ;;  %v396_v8 = vmul.f32 %v2712_v9, %v2444_v25 }
 0x12d   :  { %v2682_v10 = vpop.permute.xlu1 %524  ;;  %v2684_v28 = vpop.permute.xlu0 %522  ;;  %v384_v61 = vadd.f32 %v382_v57, %v375_v55  ;;  %v397_v57 = vmul.f32 %v2712_v9, %v2442_v24  ;;  %v2728_v55 = vld [vmem:[#allocation2 + $0x24] sm:$0xff]  ;;  %v2742_v24 = vstv %s1888_s10  ;;  %v2752_v9 = vstv %s1889_s11  ;;  %s1910_s10 = sld [smem:[#allocation3 + $0x32]]  ;;  %s1911_s11 = sld [smem:[#allocation3 + $0x33]] }
 0x12e   :  { %v390_v12 = vadd.f32 %v388_v27, %v385_v36  ;;  %v406_v36 = vmul.f32 %v2718_v11, %v2458_v37  ;;  %v405_v27 = vmul.f32 %v2718_v11, %v2460_v38  ;;  %v414_v37 = vmul.f32 %v2732_v31, %v2477_v63 }
 0x12f   :  { %820 = vrot.lane.b32.xlu1 %v2622_v56, %s2073_s29  ;;  %818 = vrot.lane.b32.xlu0 %v2624_v40, %s2073_s29  ;;  %v389_v2 = vadd.f32 %v387_v4, %v384_v61  ;;  %v415_v4 = vmul.f32 %v2732_v31, %v2475_v35  ;;  %v426_v17 = vmul.f32 %v2742_v24, %v2497_v41 }
 0x130   :  { %v399_v25 = vadd.f32 %v397_v57, %v390_v12  ;;  %v425_v12 = vmul.f32 %v2742_v24, %v2499_v42  ;;  %v435_v57 = vmul.f32 %v2752_v9, %v2521_v13  ;;  %v434_v41 = vmul.f32 %v2752_v9, %v2523_v33 }
 0x131   :  { %v2700_v15 = vpop.permute.xlu1 %533  ;;  %v2702_v7 = vpop.permute.xlu0 %531  ;;  %v398_v61 = vadd.f32 %v396_v8, %v389_v2  ;;  %v2762_v2 = vstv %s1890_s12  ;;  %s1912_s12 = sld [smem:[#allocation3 + $0x34]] }
 0x132   :  { %v408_v1 = vadd.f32 %v406_v36, %v399_v25  ;;  %4136 = vst [vmem:[#allocation13_spill] sm:$0xff] %v2762_v2  ;;  %v444_v25 = vmul.f32 %v2762_v2, %v2540_v51 }
 0x133   :  { %829 = vrot.lane.b32.xlu1 %v2622_v56, %s2074_s30  ;;  %827 = vrot.lane.b32.xlu0 %v2624_v40, %s2074_s30  ;;  %v407_v20 = vadd.f32 %v405_v27, %v398_v61 }
 0x134   :  { %v417_v35 = vadd.f32 %v415_v4, %v408_v1  ;;  %v443_v1 = vmul.f32 %v2762_v2, %v2542_v52  ;;  %v4137_v4 = vld [vmem:[#allocation14_spill] sm:$0xff] }
 0x135   :  { %v2714_v59 = vpop.permute.xlu1 %544  ;;  %v2716_v48 = vpop.permute.xlu0 %542  ;;  %v416_v63 = vadd.f32 %v414_v37, %v407_v20  ;;  %v2780_v20 = vstv %s1891_s13  ;;  %s1913_s13 = sld [smem:[#allocation3 + $0x35]] }
 0x136   :  { %v428_v36 = vadd.f32 %v426_v17, %v417_v35  ;;  %v449_v52 = vmul.f32 %v2780_v20, %v4137_v4 }
 0x137   :  { %838 = vrot.lane.b32.xlu1 %v2622_v56, %s2075_s3  ;;  %836 = vrot.lane.b32.xlu0 %v2624_v40, %s2075_s3  ;;  %v427_v27 = vadd.f32 %v425_v12, %v416_v63  ;;  %v4138_v12 = vld [vmem:[#allocation15_spill] sm:$0xff]  ;;  %v2794_v63 = vstv %s1892_s14  ;;  %s1914_s14 = sld [smem:[#allocation3 + $0x36]] }
 0x138   :  { %v437_v13 = vadd.f32 %v435_v57, %v428_v36  ;;  %v448_v35 = vmul.f32 %v2780_v20, %v4138_v12  ;;  %4139 = vst [vmem:[#allocation14_spill] sm:$0xff] %v2794_v63  ;;  %v2800_v57 = vstv %s1893_s15  ;;  %s1915_s15 = sld [smem:[#allocation3 + $0x37]] }
 0x139   :  { %v2734_v22 = vpop.permute.xlu1 %553  ;;  %v2736_v45 = vpop.permute.xlu0 %551  ;;  %v436_v33 = vadd.f32 %v434_v41, %v427_v27  ;;  %4140 = vst [vmem:[#allocation15_spill] sm:$0xff] %v2800_v57  ;;  %v467_v4 = vmul.f32 %v2800_v57, %v2570_v39  ;;  %v2832_v39 = vstv %s1896_s18  ;;  %s1918_s18 = sld [smem:[#allocation3 + $0x3a]] }
 0x13a   :  { %v446_v51 = vadd.f32 %v444_v25, %v437_v13  ;;  %v457_v13 = vmul.f32 %v2794_v63, %v2556_v47  ;;  %4143 = vst [vmem:[#allocation37_spill] sm:$0xff] %v2832_v39 }
 0x13b   :  { %849 = vrot.lane.b32.xlu1 %v2728_v55, %s2071_s27  ;;  %847 = vrot.lane.b32.xlu0 %v2730_v18, %s2071_s27  ;;  %v445_v37 = vadd.f32 %v443_v1, %v436_v33  ;;  %v458_v1 = vmul.f32 %v2794_v63, %v2554_v30  ;;  %v2810_v33 = vstv %s1894_s16  ;;  %s1916_s16 = sld [smem:[#allocation3 + $0x38]] }
 0x13c   :  { %v451_v27 = vadd.f32 %v449_v52, %v446_v51  ;;  %4141 = vst [vmem:[#allocation35_spill] sm:$0xff] %v2810_v33  ;;  %v466_v51 = vmul.f32 %v2800_v57, %v2572_v44  ;;  %v2820_v52 = vstv %s1895_s17  ;;  %v475_v63 = vmul.f32 %v2810_v33, %v2592_v50  ;;  %s1917_s17 = sld [smem:[#allocation3 + $0x39]] }
 0x13d   :  { %v2754_v38 = vpop.permute.xlu1 %562  ;;  %v2756_v11 = vpop.permute.xlu0 %560  ;;  %v450_v25 = vadd.f32 %v448_v35, %v445_v37  ;;  %4142 = vst [vmem:[#allocation36_spill] sm:$0xff] %v2820_v52  ;;  %v476_v35 = vmul.f32 %v2810_v33, %v2590_v58  ;;  %v2842_v58 = vld [vmem:[#allocation2 + $0x25] sm:$0xff]  ;;  %v2846_v50 = vstv %s1897_s19  ;;  %s1919_s19 = sld [smem:[#allocation3 + $0x3b]] }
 0x13e   :  { %v460_v37 = vadd.f32 %v458_v1, %v451_v27  ;;  %v487_v27 = vmul.f32 %v2820_v52, %v2608_v23  ;;  %v2844_v1 = vld [vmem:[#allocation2 + $0x1d] sm:$0xff]  ;;  %4144 = vst [vmem:[#allocation38_spill] sm:$0xff] %v2846_v50  ;;  %v496_v23 = vmul.f32 %v2832_v39, %v2626_v3 }
 0x13f   :  { %858 = vrot.lane.b32.xlu1 %v2728_v55, %s2070_s1  ;;  %856 = vrot.lane.b32.xlu0 %v2730_v18, %s2070_s1  ;;  %v459_v12 = vadd.f32 %v457_v13, %v450_v25  ;;  %v486_v25 = vmul.f32 %v2820_v52, %v2610_v62  ;;  %v495_v62 = vmul.f32 %v2832_v39, %v2628_v54 }
 0x140   :  { %v469_v44 = vadd.f32 %v467_v4, %v460_v37  ;;  %v505_v52 = vmul.f32 %v2846_v50, %v2642_v60 }
 0x141   :  { %v2772_v8 = vpop.permute.xlu1 %576  ;;  %v2774_v42 = vpop.permute.xlu0 %574  ;;  %v468_v57 = vadd.f32 %v466_v51, %v459_v12 }
 0x142   :  { %v478_v4 = vadd.f32 %v476_v35, %v469_v44 }
 0x143   :  { %867 = vrot.lane.b32.xlu1 %v2728_v55, %s2072_s28  ;;  %865 = vrot.lane.b32.xlu0 %v2730_v18, %s2072_s28  ;;  %v477_v51 = vadd.f32 %v475_v63, %v468_v57  ;;  %v504_v63 = vmul.f32 %v2846_v50, %v2644_v46  ;;  %v2865_v57 = vstv %s2822_s20  ;;  %v2879_v50 = vstv %s1899_s0  ;;  %s1920_s20 = sld [smem:[#allocation3 + $0x3c]]  ;;  %s1921_s0 = sld [smem:[#allocation3 + $0x3d]] }
 0x144   :  { %v489_v37 = vadd.f32 %v487_v27, %v478_v4  ;;  %4145 = vst [vmem:[#allocation39_spill] sm:$0xff] %v2865_v57  ;;  %v4146_v27 = vld [vmem:[#allocation16_spill] sm:$0xff]  ;;  %v4147_v4 = vld [vmem:[#allocation17_spill] sm:$0xff] }
 0x145   :  { %v2786_v17 = vpop.permute.xlu1 %585  ;;  %v2788_v61 = vpop.permute.xlu0 %583  ;;  %v488_v12 = vadd.f32 %v486_v25, %v477_v51  ;;  %v510_v46 = vmul.f32 %v2865_v57, %v4146_v27  ;;  %v509_v51 = vmul.f32 %v2865_v57, %v4147_v4  ;;  %4148 = vst [vmem:[#allocation16_spill] sm:$0xff] %v2879_v50 }
 0x146   :  { %v498_v35 = vadd.f32 %v496_v23, %v489_v37  ;;  %v2885_v37 = vstv %s1900_s21  ;;  %s1922_s21 = sld [smem:[#allocation3 + $0x3e]] }
 0x147   :  { %881 = vrot.lane.b32.xlu1 %v2728_v55, %s2073_s29  ;;  %879 = vrot.lane.b32.xlu0 %v2730_v18, %s2073_s29  ;;  %v497_v44 = vadd.f32 %v495_v62, %v488_v12  ;;  %4149 = vst [vmem:[#allocation17_spill] sm:$0xff] %v2885_v37  ;;  %v528_v57 = vmul.f32 %v2885_v37, %v2682_v10 }
 0x148   :  { %v507_v60 = vadd.f32 %v505_v52, %v498_v35  ;;  %v518_v35 = vmul.f32 %v2879_v50, %v2664_v6  ;;  %v527_v39 = vmul.f32 %v2885_v37, %v2684_v28 }
 0x149   :  { %v2802_v41 = vpop.permute.xlu1 %594  ;;  %v2804_v36 = vpop.permute.xlu0 %592  ;;  %v506_v25 = vadd.f32 %v504_v63, %v497_v44  ;;  %v519_v63 = vmul.f32 %v2879_v50, %v2662_v5  ;;  %v2895_v44 = vstv %s1901_s22  ;;  %s1923_s22 = sld [smem:[#allocation3 + $0x3f]] }
 0x14a   :  { %v512_v52 = vadd.f32 %v510_v46, %v507_v60  ;;  %v2905_v60 = vstv %s1902_s25  ;;  %v537_v46 = vmul.f32 %v2895_v44, %v2700_v15  ;;  %v536_v10 = vmul.f32 %v2895_v44, %v2702_v7  ;;  %s1924_s25 = sld [smem:[#allocation3 + $0x40]] }
 0x14b   :  { %890 = vrot.lane.b32.xlu1 %v2728_v55, %s2074_s30  ;;  %888 = vrot.lane.b32.xlu0 %v2730_v18, %s2074_s30  ;;  %v511_v12 = vadd.f32 %v509_v51, %v506_v25  ;;  %v2915_v25 = vstv %s1903_s26  ;;  %v548_v2 = vmul.f32 %v2905_v60, %v2714_v59  ;;  %s1925_s26 = sld [smem:[#allocation3 + $0x41]] }
 0x14c   :  { %v521_v5 = vadd.f32 %v519_v63, %v512_v52  ;;  %4150 = vst [vmem:[#allocation40_spill] sm:$0xff] %v2915_v25  ;;  %v547_v52 = vmul.f32 %v2905_v60, %v2716_v48  ;;  %v556_v59 = vmul.f32 %v2915_v25, %v2736_v45 }
 0x14d   :  { %v2824_v30 = vpop.permute.xlu1 %605  ;;  %v2826_v47 = vpop.permute.xlu0 %603  ;;  %v520_v6 = vadd.f32 %v518_v35, %v511_v12  ;;  %v2925_v12 = vstv %s1904_s4  ;;  %s1926_s4 = sld [smem:[#allocation3 + $0x42]] }
 0x14e   :  { %v530_v37 = vadd.f32 %v528_v57, %v521_v5  ;;  %4151 = vst [vmem:[#allocation41_spill] sm:$0xff] %v2925_v12  ;;  %v566_v5 = vmul.f32 %v2925_v12, %v2754_v38 }
 0x14f   :  { %899 = vrot.lane.b32.xlu1 %v2728_v55, %s2075_s3  ;;  %897 = vrot.lane.b32.xlu0 %v2730_v18, %s2075_s3  ;;  %v529_v50 = vadd.f32 %v527_v39, %v520_v6  ;;  %v557_v39 = vmul.f32 %v2915_v25, %v2734_v22  ;;  %v2949_v6 = vld [vmem:[#allocation2 + $0x26] sm:$0xff]  ;;  %v2961_v25 = vstv %s1906_s6  ;;  %s3182_s6 = sld [smem:[#allocation3 + $0x44]] }
 0x150   :  { %v539_v15 = vadd.f32 %v537_v46, %v530_v37  ;;  %v565_v37 = vmul.f32 %v2925_v12, %v2756_v11 }
 0x151   :  { %v2848_v13 = vpop.permute.xlu1 %614  ;;  %v2850_v33 = vpop.permute.xlu0 %612  ;;  %v538_v7 = vadd.f32 %v536_v10, %v529_v50  ;;  %v2943_v50 = vstv %s1905_s5  ;;  %v4153_v10 = vld [vmem:[#allocation18_spill] sm:$0xff]  ;;  %s3170_s5 = sld [smem:[#allocation3 + $0x43]] }
 0x152   :  { %v550_v63 = vadd.f32 %v548_v2, %v539_v15  ;;  %4152 = vst [vmem:[#allocation42_spill] sm:$0xff] %v2943_v50  ;;  %v2951_v2 = vld [vmem:[#allocation2 + $0x1e] sm:$0xff]  ;;  %4155 = vst [vmem:[#allocation18_spill] sm:$0xff] %v2961_v25 }
 0x153   :  { %910 = vrot.lane.b32.xlu1 %v2842_v58, %s2071_s27  ;;  %908 = vrot.lane.b32.xlu0 %v2844_v1, %s2071_s27  ;;  %v549_v35 = vadd.f32 %v547_v52, %v538_v7  ;;  %v571_v52 = vmul.f32 %v2943_v50, %v4153_v10  ;;  %v4154_v7 = vld [vmem:[#allocation19_spill] sm:$0xff] }
 0x154   :  { %v559_v45 = vadd.f32 %v557_v39, %v550_v63  ;;  %v570_v12 = vmul.f32 %v2943_v50, %v4154_v7  ;;  %v2967_v39 = vstv %s1907_s7  ;;  %v2997_v50 = vstv %s1910_s10  ;;  %s3192_s7 = sld [smem:[#allocation3 + $0x45]]  ;;  %s3216_s10 = sld [smem:[#allocation3 + $0x48]] }
 0x155   :  { %v2867_v3 = vpop.permute.xlu1 %623  ;;  %v2869_v54 = vpop.permute.xlu0 %621  ;;  %v558_v22 = vadd.f32 %v556_v59, %v549_v35  ;;  %4156 = vst [vmem:[#allocation19_spill] sm:$0xff] %v2967_v39  ;;  %v589_v10 = vmul.f32 %v2967_v39, %v2786_v17  ;;  %4159 = vst [vmem:[#allocation45_spill] sm:$0xff] %v2997_v50 }
 0x156   :  { %v568_v11 = vadd.f32 %v566_v5, %v559_v45  ;;  %v579_v45 = vmul.f32 %v2961_v25, %v2774_v42 }
 0x157   :  { %919 = vrot.lane.b32.xlu1 %v2842_v58, %s2070_s1  ;;  %917 = vrot.lane.b32.xlu0 %v2844_v1, %s2070_s1  ;;  %v567_v15 = vadd.f32 %v565_v37, %v558_v22  ;;  %v580_v37 = vmul.f32 %v2961_v25, %v2772_v8  ;;  %v2977_v22 = vstv %s1908_s8  ;;  %s3200_s8 = sld [smem:[#allocation3 + $0x46]] }
 0x158   :  { %v573_v35 = vadd.f32 %v571_v52, %v568_v11  ;;  %4157 = vst [vmem:[#allocation43_spill] sm:$0xff] %v2977_v22  ;;  %v2987_v11 = vstv %s1909_s9  ;;  %v598_v7 = vmul.f32 %v2977_v22, %v2802_v41  ;;  %v597_v25 = vmul.f32 %v2977_v22, %v2804_v36  ;;  %s1931_s9 = sld [smem:[#allocation3 + $0x47]] }
 0x159   :  { %v2881_v23 = vpop.permute.xlu1 %637  ;;  %v2883_v62 = vpop.permute.xlu0 %635  ;;  %v572_v5 = vadd.f32 %v570_v12, %v567_v15  ;;  %v588_v12 = vmul.f32 %v2967_v39, %v2788_v61  ;;  %4158 = vst [vmem:[#allocation44_spill] sm:$0xff] %v2987_v11  ;;  %v3007_v41 = vstv %s1911_s11  ;;  %v618_v39 = vmul.f32 %v2997_v50, %v2848_v13  ;;  %s1933_s11 = sld [smem:[#allocation3 + $0x49]] }
 0x15a   :  { %v582_v52 = vadd.f32 %v580_v37, %v573_v35  ;;  %v609_v35 = vmul.f32 %v2987_v11, %v2824_v30  ;;  %4160 = vst [vmem:[#allocation46_spill] sm:$0xff] %v3007_v41 }
 0x15b   :  { %928 = vrot.lane.b32.xlu1 %v2842_v58, %s2072_s28  ;;  %926 = vrot.lane.b32.xlu0 %v2844_v1, %s2072_s28  ;;  %v581_v15 = vadd.f32 %v579_v45, %v572_v5  ;;  %v608_v5 = vmul.f32 %v2987_v11, %v2826_v47 }
 0x15c   :  { %v591_v17 = vadd.f32 %v589_v10, %v582_v52  ;;  %v617_v10 = vmul.f32 %v2997_v50, %v2850_v33  ;;  %v3025_v52 = vstv %s1912_s12  ;;  %s1934_s12 = sld [smem:[#allocation3 + $0x4a]] }
 0x15d   :  { %v2897_v27 = vpop.permute.xlu1 %646  ;;  %v2899_v4 = vpop.permute.xlu0 %644  ;;  %v590_v61 = vadd.f32 %v588_v12, %v581_v15  ;;  %v627_v12 = vmul.f32 %v3007_v41, %v2867_v3  ;;  %4161 = vst [vmem:[#allocation47_spill] sm:$0xff] %v3025_v52 }
 0x15e   :  { %v600_v45 = vadd.f32 %v598_v7, %v591_v17 }
 0x15f   :  { %942 = vrot.lane.b32.xlu1 %v2842_v58, %s2073_s29  ;;  %940 = vrot.lane.b32.xlu0 %v2844_v1, %s2073_s29  ;;  %v599_v22 = vadd.f32 %v597_v25, %v590_v61  ;;  %v626_v25 = vmul.f32 %v3007_v41, %v2869_v54  ;;  %v1990_v61 = vld [vmem:[#allocation2 + $0x18] sm:$0xff] }
 0x160   :  { %v611_v30 = vadd.f32 %v609_v35, %v600_v45  ;;  %v631_v35 = vmul.f32 %v1990_v61, %v3025_v52 }
 0x161   :  { %v2917_v28 = vpop.permute.xlu1 %655  ;;  %v2919_v51 = vpop.permute.xlu0 %653  ;;  %v610_v47 = vadd.f32 %v608_v5, %v599_v22  ;;  %v4162_v22 = vld [vmem:[#allocation20_spill] sm:$0xff]  ;;  %v3038_v5 = vstv %s1913_s13  ;;  %s1935_s13 = sld [smem:[#allocation3 + $0x4b]] }
 0x162   :  { %v620_v15 = vadd.f32 %v618_v39, %v611_v30  ;;  %v632_v54 = vmul.f32 %v3025_v52, %v4162_v22  ;;  %4163 = vst [vmem:[#allocation20_spill] sm:$0xff] %v3038_v5  ;;  %v3058_v22 = vstv %s1915_s15  ;;  %s1937_s15 = sld [smem:[#allocation3 + $0x4d]] }
 0x163   :  { %951 = vrot.lane.b32.xlu1 %v2842_v58, %s2074_s30  ;;  %949 = vrot.lane.b32.xlu0 %v2844_v1, %s2074_s30  ;;  %v619_v7 = vadd.f32 %v617_v10, %v610_v47  ;;  %v3044_v10 = vstv %s1914_s14  ;;  %s1936_s14 = sld [smem:[#allocation3 + $0x4c]] }
 0x164   :  { %v629_v3 = vadd.f32 %v627_v12, %v620_v15  ;;  %4164 = vst [vmem:[#allocation48_spill] sm:$0xff] %v3044_v10  ;;  %v641_v12 = vmul.f32 %v3038_v5, %v2881_v23  ;;  %v3054_v15 = vld [vmem:[#allocation2 + $0x8] sm:$0xff]  ;;  %v3068_v23 = vstv %s1916_s16  ;;  %s1938_s16 = sld [smem:[#allocation3 + $0x4e]] }
 0x165   :  { %v2935_v57 = vpop.permute.xlu1 %666  ;;  %v2937_v48 = vpop.permute.xlu0 %664  ;;  %v628_v17 = vadd.f32 %v626_v25, %v619_v7  ;;  %v640_v25 = vmul.f32 %v3038_v5, %v2883_v62  ;;  %v3056_v7 = vld [vmem:[#allocation2] sm:$0xff]  ;;  %4165 = vst [vmem:[#allocation49_spill] sm:$0xff] %v3068_v23  ;;  %v3078_v5 = vstv %s1917_s17  ;;  %s1939_s17 = sld [smem:[#allocation3 + $0x4f]] }
 0x166   :  { %v634_v30 = vadd.f32 %v632_v54, %v629_v3  ;;  %v650_v3 = vmul.f32 %v3044_v10, %v2897_v27  ;;  %v649_v54 = vmul.f32 %v3044_v10, %v2899_v4  ;;  %v658_v27 = vmul.f32 %v3058_v22, %v2919_v51  ;;  %4166 = vst [vmem:[#allocation50_spill] sm:$0xff] %v3078_v5 }
 0x167   :  { %960 = vrot.lane.b32.xlu1 %v2842_v58, %s2075_s3  ;;  %958 = vrot.lane.b32.xlu0 %v2844_v1, %s2075_s3  ;;  %v633_v47 = vadd.f32 %v631_v35, %v628_v17  ;;  %v659_v35 = vmul.f32 %v3058_v22, %v2917_v28  ;;  %v670_v11 = vmul.f32 %v3068_v23, %v2935_v57 }
 0x168   :  { %v643_v62 = vadd.f32 %v641_v12, %v634_v30  ;;  %v669_v30 = vmul.f32 %v3068_v23, %v2937_v48 }
 0x169   :  { %v2953_v38 = vpop.permute.xlu1 %675  ;;  %v2955_v46 = vpop.permute.xlu0 %673  ;;  %v642_v17 = vadd.f32 %v640_v25, %v633_v47  ;;  %v3088_v47 = vstv %s1918_s18  ;;  %s1940_s18 = sld [smem:[#allocation3 + $0x50]] }
 0x16a   :  { %v652_v41 = vadd.f32 %v650_v3, %v643_v62  ;;  %4167 = vst [vmem:[#allocation51_spill] sm:$0xff] %v3088_v47  ;;  %v679_v12 = vmul.f32 %v3078_v5, %v2953_v38  ;;  %v678_v57 = vmul.f32 %v3078_v5, %v2955_v46  ;;  %v1995_v5 = vld [vmem:[#allocation7 + $0x48] sm:$0xff] }
 0x16b   :  { %971 = vrot.lane.b32.xlu1 %v2949_v6, %s2071_s27  ;;  %969 = vrot.lane.b32.xlu0 %v2951_v2, %s2071_s27  ;;  %v651_v50 = vadd.f32 %v649_v54, %v642_v17 }
 0x16c   :  { %v661_v28 = vadd.f32 %v659_v35, %v652_v41  ;;  %v1991_v35 = vld [vmem:[#allocation2 + $0x21] sm:$0xff] }
 0x16d   :  { %v2969_v59 = vpop.permute.xlu1 %684  ;;  %v2971_v63 = vpop.permute.xlu0 %682  ;;  %v660_v51 = vadd.f32 %v658_v27, %v651_v50  ;;  %v3106_v50 = vstv %s1919_s19  ;;  %s1941_s19 = sld [smem:[#allocation3 + $0x51]] }
 0x16e   :  { %v672_v3 = vadd.f32 %v670_v11, %v661_v28  ;;  %v688_v62 = vmul.f32 %v3088_v47, %v2969_v59  ;;  %v687_v41 = vmul.f32 %v3088_v47, %v2971_v63  ;;  %4168 = vst [vmem:[#allocation52_spill] sm:$0xff] %v3106_v50  ;;  %v693_v63 = vmul.f32 %v1991_v35, %v3106_v50 }
 0x16f   :  { %980 = vrot.lane.b32.xlu1 %v2949_v6, %s2070_s1  ;;  %978 = vrot.lane.b32.xlu0 %v2951_v2, %s2070_s1  ;;  %v671_v54 = vadd.f32 %v669_v30, %v660_v51  ;;  %v1992_v30 = vld [vmem:[#allocation2 + $0x19] sm:$0xff]  ;;  %v3118_v51 = vstv %s1920_s20  ;;  %v3154_v47 = vstv %s1924_s25  ;;  %s1942_s20 = sld [smem:[#allocation3 + $0x52]]  ;;  %s1946_s25 = sld [smem:[#allocation3 + $0x56]] }
 0x170   :  { %v681_v38 = vadd.f32 %v679_v12, %v672_v3  ;;  %v692_v28 = vmul.f32 %v1992_v30, %v3106_v50  ;;  %4169 = vst [vmem:[#allocation53_spill] sm:$0xff] %v3118_v51  ;;  %v3124_v12 = vstv %s1921_s0  ;;  %4173 = vst [vmem:[#allocation57_spill] sm:$0xff] %v3154_v47  ;;  %s1943_s0 = sld [smem:[#allocation3 + $0x53]] }
 0x171   :  { %v2989_v8 = vpop.permute.xlu1 %698  ;;  %v2991_v42 = vpop.permute.xlu0 %696  ;;  %v680_v46 = vadd.f32 %v678_v57, %v671_v54  ;;  %4170 = vst [vmem:[#allocation54_spill] sm:$0xff] %v3124_v12 }
 0x172   :  { %v690_v59 = vadd.f32 %v688_v62, %v681_v38  ;;  %v701_v38 = vmul.f32 %v3118_v51, %v2991_v42 }
 0x173   :  { %989 = vrot.lane.b32.xlu1 %v2949_v6, %s2072_s28  ;;  %987 = vrot.lane.b32.xlu0 %v2951_v2, %s2072_s28  ;;  %v689_v27 = vadd.f32 %v687_v41, %v680_v46  ;;  %v702_v41 = vmul.f32 %v3118_v51, %v2989_v8  ;;  %v3134_v46 = vstv %s1922_s21  ;;  %s1944_s21 = sld [smem:[#allocation3 + $0x54]] }
 0x174   :  { %v695_v54 = vadd.f32 %v693_v63, %v690_v59  ;;  %4171 = vst [vmem:[#allocation55_spill] sm:$0xff] %v3134_v46  ;;  %v3144_v63 = vstv %s1923_s22  ;;  %s1945_s22 = sld [smem:[#allocation3 + $0x55]] }
 0x175   :  { %v3009_v36 = vpop.permute.xlu1 %707  ;;  %v3011_v37 = vpop.permute.xlu0 %705  ;;  %v694_v62 = vadd.f32 %v692_v28, %v689_v27  ;;  %4172 = vst [vmem:[#allocation56_spill] sm:$0xff] %v3144_v63 }
 0x176   :  { %v711_v35 = vmul.f32 %v3124_v12, %v3009_v36  ;;  %v710_v59 = vmul.f32 %v3124_v12, %v3011_v37  ;;  %v704_v27 = vadd.f32 %v702_v41, %v695_v54  ;;  %v3166_v41 = vld [vmem:[#allocation2 + $0x1] sm:$0xff] }
 0x177   :  { %1003 = vrot.lane.b32.xlu1 %v2949_v6, %s2073_s29  ;;  %1001 = vrot.lane.b32.xlu0 %v2951_v2, %s2073_s29  ;;  %v703_v30 = vadd.f32 %v701_v38, %v694_v62  ;;  %v1994_v12 = vld [vmem:[#allocation7 + $0x50] sm:$0xff] }
 0x178   :  { %v713_v36 = vadd.f32 %v711_v35, %v704_v27  ;;  %v3180_v27 = vstv %s1926_s4  ;;  %s1948_s4 = sld [smem:[#allocation3 + $0x58]] }
 0x179   :  { %v3027_v13 = vpop.permute.xlu1 %716  ;;  %v3029_v33 = vpop.permute.xlu0 %714  ;;  %v712_v37 = vadd.f32 %v710_v59, %v703_v30  ;;  %4175 = vst [vmem:[#allocation59_spill] sm:$0xff] %v3180_v27 }
 0x17a   :  { %v720_v28 = vmul.f32 %v3134_v46, %v3027_v13  ;;  %v719_v51 = vmul.f32 %v3134_v46, %v3029_v33  ;;  %v3164_v13 = vld [vmem:[#allocation2 + $0x9] sm:$0xff]  ;;  %v3168_v33 = vstv %s1925_s26  ;;  %s1947_s26 = sld [smem:[#allocation3 + $0x57]] }
 0x17b   :  { %1012 = vrot.lane.b32.xlu1 %v2949_v6, %s2074_s30  ;;  %1010 = vrot.lane.b32.xlu0 %v2951_v2, %s2074_s30  ;;  %4174 = vst [vmem:[#allocation58_spill] sm:$0xff] %v3168_v33 }
 0x17c   :  { %v722_v35 = vadd.f32 %v720_v28, %v713_v36  ;;  %v721_v59 = vadd.f32 %v719_v51, %v712_v37 }
 0x17d   :  { %v3040_v39 = vpop.permute.xlu1 %727  ;;  %v3042_v45 = vpop.permute.xlu0 %725 }
 0x17e   :  { %v731_v54 = vmul.f32 %v3144_v63, %v3040_v39  ;;  %v730_v62 = vmul.f32 %v3144_v63, %v3042_v45 }
 0x17f   :  { %1021 = vrot.lane.b32.xlu1 %v2949_v6, %s2075_s3  ;;  %1019 = vrot.lane.b32.xlu0 %v2951_v2, %s2075_s3 }
 0x180   :  { %v733_v30 = vadd.f32 %v731_v54, %v722_v35  ;;  %v732_v63 = vadd.f32 %v730_v62, %v721_v59  ;;  %v1996_v54 = vld [vmem:[#allocation7 + $0x58] sm:$0xff] }
 0x181   :  { %v3060_v61 = vpop.permute.xlu1 %736  ;;  %v3062_v52 = vpop.permute.xlu0 %734  ;;  %v1051_v62 = vmax.f32 %v1995_v5, %v1996_v54  ;;  %v1997_v35 = vld [vmem:[#allocation2 + $0x22] sm:$0xff]  ;;  %v2000_v5 = vld [vmem:[#allocation7 + $0x68] sm:$0xff] }
 0x182   :  { %v740_v39 = vmul.f32 %v3154_v47, %v3060_v61  ;;  %v739_v45 = vmul.f32 %v3154_v47, %v3062_v52  ;;  %v1993_v47 = vld [vmem:[#allocation7 + $0x40] sm:$0xff] }
 0x183   :  { %1076 = vrot.lane.b32.xlu1 %v3054_v15, %s2071_s27  ;;  %1074 = vrot.lane.b32.xlu0 %v3056_v7, %s2071_s27  ;;  %v1050_v50 = vmax.f32 %v1993_v47, %v1994_v12 }
 0x184   :  { %v742_v36 = vadd.f32 %v740_v39, %v733_v30  ;;  %v741_v37 = vadd.f32 %v739_v45, %v732_v63  ;;  %v1999_v63 = vld [vmem:[#allocation7 + $0x60] sm:$0xff]  ;;  %v1058_v45 = vmax.f32 %v1051_v62, %v2000_v5  ;;  %v3207_v30 = vstv %s3170_s5  ;;  %s1949_s5 = sld [smem:[#allocation3 + $0x59]] }
 0x185   :  { %v3080_v4 = vpop.permute.xlu1 %745  ;;  %v3082_v10 = vpop.permute.xlu0 %743  ;;  %v1057_v39 = vmax.f32 %v1050_v50, %v1999_v63  ;;  %v2001_v50 = vld [vmem:[#allocation7 + $0x70] sm:$0xff] }
 0x186   :  { %v749_v51 = vmul.f32 %v3168_v33, %v3080_v4  ;;  %v748_v61 = vmul.f32 %v3168_v33, %v3082_v10  ;;  %v754_v4 = vmul.f32 %v1997_v35, %v3180_v27  ;;  %v1998_v10 = vld [vmem:[#allocation2 + $0x1a] sm:$0xff]  ;;  %v3227_v33 = vstv %s3192_s7  ;;  %s1951_s7 = sld [smem:[#allocation3 + $0x5b]] }
 0x187   :  { %1084 = vrot.lane.b32.xlu1 %v3054_v15, %s2070_s1  ;;  %1082 = vrot.lane.b32.xlu0 %v3056_v7, %s2070_s1  ;;  %v753_v59 = vmul.f32 %v1998_v10, %v3180_v27  ;;  %v3214_v10 = vstv %s3182_s6  ;;  %s1950_s6 = sld [smem:[#allocation3 + $0x5a]] }
 0x188   :  { %v751_v47 = vadd.f32 %v749_v51, %v742_v36  ;;  %v750_v12 = vadd.f32 %v748_v61, %v741_v37  ;;  %v1064_v51 = vmax.f32 %v1057_v39, %v2001_v50  ;;  %v2002_v61 = vld [vmem:[#allocation7 + $0x78] sm:$0xff]  ;;  %v3250_v39 = vstv %s1931_s9  ;;  %s1954_s9 = sld [smem:[#allocation3 + $0x5e]] }
 0x189   :  { %v3098_v25 = vpop.permute.xlu1 %759  ;;  %v3100_v48 = vpop.permute.xlu0 %757  ;;  %v1065_v36 = vmax.f32 %v1058_v45, %v2002_v61 }
 0x18a   :  { %v756_v37 = vadd.f32 %v754_v4, %v751_v47  ;;  %v763_v62 = vmul.f32 %v3207_v30, %v3098_v25  ;;  %v755_v63 = vadd.f32 %v753_v59, %v750_v12  ;;  %v762_v5 = vmul.f32 %v3207_v30, %v3100_v48  ;;  %1070 = vst.msk [vmem:[#allocation2 + $0x1b] sm:$0xff] %vm168_vm0, %v1064_v51 }
 0x18b   :  { %1092 = vrot.lane.b32.xlu1 %v3054_v15, %s2072_s28  ;;  %1090 = vrot.lane.b32.xlu0 %v3056_v7, %s2072_s28  ;;  %1071 = vst.msk [vmem:[#allocation2 + $0x23] sm:$0xff] %vm168_vm0, %v1065_v36  ;;  %v3240_v59 = vstv %s3200_s8  ;;  %s1952_s8 = sld [smem:[#allocation3 + $0x5c]] }
 0x18c   :  { %v765_v48 = vadd.f32 %v763_v62, %v756_v37  ;;  %v764_v47 = vadd.f32 %v762_v5, %v755_v63  ;;  %v3257_v37 = vstv %s3216_s10  ;;  %s1953_s10 = sld [smem:[#allocation3 + $0x5d]] }
 0x18d   :  { %v3112_v11 = vpop.permute.xlu1 %768  ;;  %v3114_v17 = vpop.permute.xlu0 %766  ;;  %4176 = vst [vmem:[#allocation60_spill] sm:$0xff] %v3257_v37 }
 0x18e   :  { %v772_v4 = vmul.f32 %v3214_v10, %v3112_v11  ;;  %v771_v25 = vmul.f32 %v3214_v10, %v3114_v17 }
 0x18f   :  { %1104 = vrot.lane.b32.xlu1 %v3054_v15, %s2073_s29  ;;  %1102 = vrot.lane.b32.xlu0 %v3056_v7, %s2073_s29 }
 0x190   :  { %v774_v50 = vadd.f32 %v772_v4, %v765_v48  ;;  %v773_v51 = vadd.f32 %v771_v25, %v764_v47  ;;  %v3271_v47 = vstv %s1933_s11  ;;  %s1955_s11 = sld [smem:[#allocation3 + $0x5f]] }
 0x191   :  { %v3126_v57 = vpop.permute.xlu1 %777  ;;  %v3128_v3 = vpop.permute.xlu0 %775 }
 0x192   :  { %v781_v12 = vmul.f32 %v3227_v33, %v3126_v57  ;;  %v780_v11 = vmul.f32 %v3227_v33, %v3128_v3 }
 0x193   :  { %1112 = vrot.lane.b32.xlu1 %v3054_v15, %s2074_s30  ;;  %1110 = vrot.lane.b32.xlu0 %v3056_v7, %s2074_s30 }
 0x194   :  { %v783_v57 = vadd.f32 %v781_v12, %v774_v50  ;;  %v782_v3 = vadd.f32 %v780_v11, %v773_v51  ;;  %v3277_v12 = vld [vmem:[#allocation2 + $0xa] sm:$0xff]  ;;  %v3279_v11 = vld [vmem:[#allocation2 + $0x2] sm:$0xff] }
 0x195   :  { %v3146_v8 = vpop.permute.xlu1 %788  ;;  %v3148_v42 = vpop.permute.xlu0 %786 }
 0x196   :  { %v792_v61 = vmul.f32 %v3240_v59, %v3146_v8  ;;  %v791_v36 = vmul.f32 %v3240_v59, %v3148_v42 }
 0x197   :  { %1120 = vrot.lane.b32.xlu1 %v3054_v15, %s2075_s3  ;;  %1118 = vrot.lane.b32.xlu0 %v3056_v7, %s2075_s3 }
 0x198   :  { %v794_v5 = vadd.f32 %v792_v61, %v783_v57  ;;  %v793_v4 = vadd.f32 %v791_v36, %v782_v3  ;;  %v815_v61 = vmul.f32 %v3271_v47, %v2622_v56  ;;  %v814_v36 = vmul.f32 %v3271_v47, %v2624_v40 }
 0x199   :  { %v3172_v38 = vpop.permute.xlu1 %797  ;;  %v3174_v46 = vpop.permute.xlu0 %795  ;;  %v3285_v57 = vstv %s1934_s12  ;;  %v3291_v3 = vstv %s1935_s13  ;;  %s1956_s12 = sld [smem:[#allocation3 + $0x60]]  ;;  %s1957_s13 = sld [smem:[#allocation3 + $0x61]] }
 0x19a   :  { %v801_v62 = vmul.f32 %v3250_v39, %v3172_v38  ;;  %v800_v8 = vmul.f32 %v3250_v39, %v3174_v46  ;;  %4177 = vst [vmem:[#allocation61_spill] sm:$0xff] %v3285_v57  ;;  %4178 = vst [vmem:[#allocation62_spill] sm:$0xff] %v3291_v3 }
 0x19b   :  { %1130 = vrot.lane.b32.xlu1 %v3164_v13, %s2071_s27  ;;  %1128 = vrot.lane.b32.xlu0 %v3166_v41, %s2071_s27 }
 0x19c   :  { %v803_v46 = vadd.f32 %v801_v62, %v794_v5  ;;  %v802_v38 = vadd.f32 %v800_v8, %v793_v4 }
 0x19d   :  { %v3194_v52 = vpop.permute.xlu1 %806  ;;  %v3196_v28 = vpop.permute.xlu0 %804 }
 0x19e   :  { %v810_v25 = vmul.f32 %v3257_v37, %v3194_v52  ;;  %v809_v48 = vmul.f32 %v3257_v37, %v3196_v28 }
 0x19f   :  { %1138 = vrot.lane.b32.xlu1 %v3164_v13, %s2070_s1  ;;  %1136 = vrot.lane.b32.xlu0 %v3166_v41, %s2070_s1 }
 0x1a0   :  { %v812_v51 = vadd.f32 %v810_v25, %v803_v46  ;;  %v811_v28 = vadd.f32 %v809_v48, %v802_v38  ;;  %v3297_v25 = vstv %s1936_s14  ;;  %v3307_v38 = vstv %s1937_s15 }
 0x1a1   :  { %v3209_v54 = vpop.permute.xlu1 %820  ;;  %v3211_v35 = vpop.permute.xlu0 %818  ;;  %4179 = vst [vmem:[#allocation63_spill] sm:$0xff] %v3297_v25 }
 0x1a2   :  { %v817_v5 = vadd.f32 %v815_v61, %v812_v51  ;;  %v824_v56 = vmul.f32 %v3285_v57, %v3209_v54  ;;  %v816_v4 = vadd.f32 %v814_v36, %v811_v28  ;;  %v823_v40 = vmul.f32 %v3285_v57, %v3211_v35 }
 0x1a3   :  { %1146 = vrot.lane.b32.xlu1 %v3164_v13, %s2072_s28  ;;  %1144 = vrot.lane.b32.xlu0 %v3166_v41, %s2072_s28  ;;  %v3311_v57 = vstv %s1938_s16 }
 0x1a4   :  { %v826_v35 = vadd.f32 %v824_v56, %v817_v5  ;;  %v825_v28 = vadd.f32 %v823_v40, %v816_v4  ;;  %4180 = vst [vmem:[#allocation64_spill] sm:$0xff] %v3311_v57  ;;  %v3319_v5 = vstv %s1939_s17 }
 0x1a5   :  { %v3229_v27 = vpop.permute.xlu1 %829  ;;  %v3231_v23 = vpop.permute.xlu0 %827  ;;  %4181 = vst [vmem:[#allocation65_spill] sm:$0xff] %v3319_v5 }
 0x1a6   :  { %v833_v48 = vmul.f32 %v3291_v3, %v3229_v27  ;;  %v832_v46 = vmul.f32 %v3291_v3, %v3231_v23 }
 0x1a7   :  { %1158 = vrot.lane.b32.xlu1 %v3164_v13, %s2073_s29  ;;  %1156 = vrot.lane.b32.xlu0 %v3166_v41, %s2073_s29 }
 0x1a8   :  { %v835_v23 = vadd.f32 %v833_v48, %v826_v35  ;;  %v834_v27 = vadd.f32 %v832_v46, %v825_v28  ;;  %v3329_v35 = vstv %s1940_s18 }
 0x1a9   :  { %v839_v17 = vpop.permute.xlu1 %838  ;;  %v837_v45 = vpop.permute.xlu0 %836  ;;  %4182 = vst [vmem:[#allocation66_spill] sm:$0xff] %v3329_v35 }
 0x1aa   :  { %v842_v61 = vmul.f32 %v3297_v25, %v839_v17  ;;  %v841_v36 = vmul.f32 %v3297_v25, %v837_v45 }
 0x1ab   :  { %1166 = vrot.lane.b32.xlu1 %v3164_v13, %s2074_s30  ;;  %1164 = vrot.lane.b32.xlu0 %v3166_v41, %s2074_s30 }
 0x1ac   :  { %v844_v45 = vadd.f32 %v842_v61, %v835_v23  ;;  %v843_v4 = vadd.f32 %v841_v36, %v834_v27  ;;  %v3339_v36 = vstv %s1941_s19 }
 0x1ad   :  { %v850_v63 = vpop.permute.xlu1 %849  ;;  %v848_v42 = vpop.permute.xlu0 %847  ;;  %4183 = vst [vmem:[#allocation67_spill] sm:$0xff] %v3339_v36 }
 0x1ae   :  { %v853_v3 = vmul.f32 %v3307_v38, %v850_v63  ;;  %v852_v37 = vmul.f32 %v3307_v38, %v848_v42 }
 0x1af   :  { %1174 = vrot.lane.b32.xlu1 %v3164_v13, %s2075_s3  ;;  %1172 = vrot.lane.b32.xlu0 %v3166_v41, %s2075_s3 }
 0x1b0   :  { %v855_v63 = vadd.f32 %v853_v3, %v844_v45  ;;  %v854_v42 = vadd.f32 %v852_v37, %v843_v4 }
 0x1b1   :  { %v859_v52 = vpop.permute.xlu1 %858  ;;  %v857_v50 = vpop.permute.xlu0 %856 }
 0x1b2   :  { %v862_v40 = vmul.f32 %v3311_v57, %v859_v52  ;;  %v861_v25 = vmul.f32 %v3311_v57, %v857_v50  ;;  %v3369_v57 = vstv %s1946_s25 }
 0x1b3   :  { %1184 = vrot.lane.b32.xlu1 %v3277_v12, %s2071_s27  ;;  %1182 = vrot.lane.b32.xlu0 %v3279_v11, %s2071_s27 }
 0x1b4   :  { %v864_v61 = vadd.f32 %v862_v40, %v855_v63  ;;  %v863_v50 = vadd.f32 %v861_v25, %v854_v42  ;;  %v3341_v25 = vstv %s1942_s20  ;;  %v3349_v40 = vld [vmem:[#allocation2 + $0xb] sm:$0xff]  ;;  %v3351_v63 = vld [vmem:[#allocation2 + $0x3] sm:$0xff]  ;;  %v3353_v42 = vstv %s1943_s0 }
 0x1b5   :  { %v868_v62 = vpop.permute.xlu1 %867  ;;  %v866_v8 = vpop.permute.xlu0 %865  ;;  %4184 = vst [vmem:[#allocation68_spill] sm:$0xff] %v3341_v25 }
 0x1b6   :  { %v871_v48 = vmul.f32 %v3319_v5, %v868_v62  ;;  %v870_v46 = vmul.f32 %v3319_v5, %v866_v8  ;;  %v876_v62 = vmul.f32 %v3329_v35, %v2728_v55  ;;  %v875_v8 = vmul.f32 %v3329_v35, %v2730_v18 }
 0x1b7   :  { %1192 = vrot.lane.b32.xlu1 %v3277_v12, %s2070_s1  ;;  %1190 = vrot.lane.b32.xlu0 %v3279_v11, %s2070_s1  ;;  %v3357_v5 = vstv %s1944_s21 }
 0x1b8   :  { %v873_v3 = vadd.f32 %v871_v48, %v864_v61  ;;  %v872_v37 = vadd.f32 %v870_v46, %v863_v50 }
 0x1b9   :  { %v882_v54 = vpop.permute.xlu1 %881  ;;  %v880_v51 = vpop.permute.xlu0 %879 }
 0x1ba   :  { %v878_v45 = vadd.f32 %v876_v62, %v873_v3  ;;  %v885_v55 = vmul.f32 %v3339_v36, %v882_v54  ;;  %v877_v4 = vadd.f32 %v875_v8, %v872_v37  ;;  %v884_v18 = vmul.f32 %v3339_v36, %v880_v51 }
 0x1bb   :  { %1200 = vrot.lane.b32.xlu1 %v3277_v12, %s2072_s28  ;;  %1198 = vrot.lane.b32.xlu0 %v3279_v11, %s2072_s28  ;;  %v3365_v62 = vstv %s1945_s22 }
 0x1bc   :  { %v887_v54 = vadd.f32 %v885_v55, %v878_v45  ;;  %v886_v51 = vadd.f32 %v884_v18, %v877_v4 }
 0x1bd   :  { %v891_v17 = vpop.permute.xlu1 %890  ;;  %v889_v56 = vpop.permute.xlu0 %888 }
 0x1be   :  { %v894_v61 = vmul.f32 %v3341_v25, %v891_v17  ;;  %v893_v50 = vmul.f32 %v3341_v25, %v889_v56 }
 0x1bf   :  { %1212 = vrot.lane.b32.xlu1 %v3277_v12, %s2073_s29  ;;  %1210 = vrot.lane.b32.xlu0 %v3279_v11, %s2073_s29 }
 0x1c0   :  { %v896_v56 = vadd.f32 %v894_v61, %v887_v54  ;;  %v895_v25 = vadd.f32 %v893_v50, %v886_v51  ;;  %v3379_v54 = vstv %s1947_s26 }
 0x1c1   :  { %v900_v28 = vpop.permute.xlu1 %899  ;;  %v898_v52 = vpop.permute.xlu0 %897 }
 0x1c2   :  { %v903_v3 = vmul.f32 %v3353_v42, %v900_v28  ;;  %v902_v37 = vmul.f32 %v3353_v42, %v898_v52 }
 0x1c3   :  { %1220 = vrot.lane.b32.xlu1 %v3277_v12, %s2074_s30  ;;  %1218 = vrot.lane.b32.xlu0 %v3279_v11, %s2074_s30 }
 0x1c4   :  { %v905_v28 = vadd.f32 %v903_v3, %v896_v56  ;;  %v904_v52 = vadd.f32 %v902_v37, %v895_v25  ;;  %v937_v3 = vmul.f32 %v3379_v54, %v2842_v58  ;;  %v936_v37 = vmul.f32 %v3379_v54, %v2844_v1 }
 0x1c5   :  { %v911_v23 = vpop.permute.xlu1 %910  ;;  %v909_v27 = vpop.permute.xlu0 %908 }
 0x1c6   :  { %v914_v36 = vmul.f32 %v3357_v5, %v911_v23  ;;  %v913_v35 = vmul.f32 %v3357_v5, %v909_v27 }
 0x1c7   :  { %1228 = vrot.lane.b32.xlu1 %v3277_v12, %s2075_s3  ;;  %1226 = vrot.lane.b32.xlu0 %v3279_v11, %s2075_s3 }
 0x1c8   :  { %v916_v23 = vadd.f32 %v914_v36, %v905_v28  ;;  %v915_v27 = vadd.f32 %v913_v35, %v904_v52 }
 0x1c9   :  { %v920_v48 = vpop.permute.xlu1 %919  ;;  %v918_v46 = vpop.permute.xlu0 %917 }
 0x1ca   :  { %v923_v45 = vmul.f32 %v3365_v62, %v920_v48  ;;  %v922_v55 = vmul.f32 %v3365_v62, %v918_v46 }
 0x1cb   :  { %1238 = vrot.lane.b32.xlu1 %v3349_v40, %s2071_s27  ;;  %1236 = vrot.lane.b32.xlu0 %v3351_v63, %s2071_s27 }
 0x1cc   :  { %v925_v25 = vadd.f32 %v923_v45, %v916_v23  ;;  %v924_v48 = vadd.f32 %v922_v55, %v915_v27  ;;  %v3399_v55 = vstv %s1950_s6 }
 0x1cd   :  { %v929_v17 = vpop.permute.xlu1 %928  ;;  %v927_v8 = vpop.permute.xlu0 %926  ;;  %4186 = vst [vmem:[#allocation70_spill] sm:$0xff] %v3399_v55 }
 0x1ce   :  { %v932_v61 = vmul.f32 %v3369_v57, %v929_v17  ;;  %v931_v50 = vmul.f32 %v3369_v57, %v927_v8  ;;  %v3389_v17 = vstv %s1948_s4  ;;  %v3395_v8 = vstv %s1949_s5 }
 0x1cf   :  { %1246 = vrot.lane.b32.xlu1 %v3349_v40, %s2070_s1  ;;  %1244 = vrot.lane.b32.xlu0 %v3351_v63, %s2070_s1  ;;  %4185 = vst [vmem:[#allocation69_spill] sm:$0xff] %v3395_v8 }
 0x1d0   :  { %v934_v36 = vadd.f32 %v932_v61, %v925_v25  ;;  %v933_v35 = vadd.f32 %v931_v50, %v924_v48  ;;  %v3407_v50 = vstv %s1951_s7 }
 0x1d1   :  { %v943_v4 = vpop.permute.xlu1 %942  ;;  %v941_v18 = vpop.permute.xlu0 %940 }
 0x1d2   :  { %v939_v52 = vadd.f32 %v937_v3, %v934_v36  ;;  %v946_v58 = vmul.f32 %v3389_v17, %v943_v4  ;;  %v938_v45 = vadd.f32 %v936_v37, %v933_v35  ;;  %v945_v1 = vmul.f32 %v3389_v17, %v941_v18 }
 0x1d3   :  { %1254 = vrot.lane.b32.xlu1 %v3349_v40, %s2072_s28  ;;  %1252 = vrot.lane.b32.xlu0 %v3351_v63, %s2072_s28  ;;  %v3415_v35 = vstv %s1952_s8 }
 0x1d4   :  { %v948_v25 = vadd.f32 %v946_v58, %v939_v52  ;;  %v947_v48 = vadd.f32 %v945_v1, %v938_v45  ;;  %v3419_v52 = vld [vmem:[#allocation2 + $0xc] sm:$0xff]  ;;  %v3421_v58 = vld [vmem:[#allocation2 + $0x4] sm:$0xff]  ;;  %v3423_v45 = vstv %s1954_s9 }
 0x1d5   :  { %v952_v46 = vpop.permute.xlu1 %951  ;;  %v950_v51 = vpop.permute.xlu0 %949  ;;  %4187 = vst [vmem:[#allocation71_spill] sm:$0xff] %v3423_v45 }
 0x1d6   :  { %v955_v23 = vmul.f32 %v3395_v8, %v952_v46  ;;  %v954_v27 = vmul.f32 %v3395_v8, %v950_v51 }
 0x1d7   :  { %1266 = vrot.lane.b32.xlu1 %v3349_v40, %s2073_s29  ;;  %1264 = vrot.lane.b32.xlu0 %v3351_v63, %s2073_s29 }
 0x1d8   :  { %v957_v46 = vadd.f32 %v955_v23, %v948_v25  ;;  %v956_v51 = vadd.f32 %v954_v27, %v947_v48  ;;  %v3431_v27 = vstv %s1953_s10 }
 0x1d9   :  { %v961_v56 = vpop.permute.xlu1 %960  ;;  %v959_v28 = vpop.permute.xlu0 %958  ;;  %4188 = vst [vmem:[#allocation72_spill] sm:$0xff] %v3431_v27 }
 0x1da   :  { %v964_v18 = vmul.f32 %v3399_v55, %v961_v56  ;;  %v963_v36 = vmul.f32 %v3399_v55, %v959_v28 }
 0x1db   :  { %1274 = vrot.lane.b32.xlu1 %v3349_v40, %s2074_s30  ;;  %1272 = vrot.lane.b32.xlu0 %v3351_v63, %s2074_s30 }
 0x1dc   :  { %v966_v1 = vadd.f32 %v964_v18, %v957_v46  ;;  %v965_v55 = vadd.f32 %v963_v36, %v956_v51  ;;  %v998_v18 = vmul.f32 %v3423_v45, %v2949_v6  ;;  %v997_v36 = vmul.f32 %v3423_v45, %v2951_v2 }
 0x1dd   :  { %v972_v61 = vpop.permute.xlu1 %971  ;;  %v970_v4 = vpop.permute.xlu0 %969  ;;  %v3443_v6 = vstv %s1955_s11 }
 0x1de   :  { %v975_v3 = vmul.f32 %v3407_v50, %v972_v61  ;;  %v974_v37 = vmul.f32 %v3407_v50, %v970_v4  ;;  %4189 = vst [vmem:[#allocation73_spill] sm:$0xff] %v3443_v6 }
 0x1df   :  { %1282 = vrot.lane.b32.xlu1 %v3349_v40, %s2075_s3  ;;  %1280 = vrot.lane.b32.xlu0 %v3351_v63, %s2075_s3 }
 0x1e0   :  { %v977_v61 = vadd.f32 %v975_v3, %v966_v1  ;;  %v976_v4 = vadd.f32 %v974_v37, %v965_v55 }
 0x1e1   :  { %v981_v56 = vpop.permute.xlu1 %980  ;;  %v979_v28 = vpop.permute.xlu0 %978 }
 0x1e2   :  { %v984_v8 = vmul.f32 %v3415_v35, %v981_v56  ;;  %v983_v23 = vmul.f32 %v3415_v35, %v979_v28 }
 0x1e3   :  { %1292 = vrot.lane.b32.xlu1 %v3419_v52, %s2071_s27  ;;  %1290 = vrot.lane.b32.xlu0 %v3421_v58, %s2071_s27 }
 0x1e4   :  { %v986_v46 = vadd.f32 %v984_v8, %v977_v61  ;;  %v985_v51 = vadd.f32 %v983_v23, %v976_v4  ;;  %v3449_v23 = vstv %s1956_s12 }
 0x1e5   :  { %v990_v25 = vpop.permute.xlu1 %989  ;;  %v988_v48 = vpop.permute.xlu0 %987  ;;  %4190 = vst [vmem:[#allocation74_spill] sm:$0xff] %v3449_v23 }
 0x1e6   :  { %v993_v56 = vmul.f32 %v3431_v27, %v990_v25  ;;  %v992_v28 = vmul.f32 %v3431_v27, %v988_v48 }
 0x1e7   :  { %1300 = vrot.lane.b32.xlu1 %v3419_v52, %s2070_s1  ;;  %1298 = vrot.lane.b32.xlu0 %v3421_v58, %s2070_s1 }
 0x1e8   :  { %v995_v55 = vadd.f32 %v993_v56, %v986_v46  ;;  %v994_v3 = vadd.f32 %v992_v28, %v985_v51 }
 0x1e9   :  { %v1004_v37 = vpop.permute.xlu1 %1003  ;;  %v1002_v1 = vpop.permute.xlu0 %1001 }
 0x1ea   :  { %v1000_v2 = vadd.f32 %v998_v18, %v995_v55  ;;  %v999_v8 = vadd.f32 %v997_v36, %v994_v3  ;;  %v1007_v61 = vmul.f32 %v3443_v6, %v1004_v37  ;;  %v1006_v4 = vmul.f32 %v3443_v6, %v1002_v1 }
 0x1eb   :  { %1308 = vrot.lane.b32.xlu1 %v3419_v52, %s2072_s28  ;;  %1306 = vrot.lane.b32.xlu0 %v3421_v58, %s2072_s28  ;;  %v3459_v18 = vstv %s1957_s13 }
 0x1ec   :  { %4191 = vst [vmem:[#allocation75_spill] sm:$0xff] %v3459_v18  ;;  %v1009_v36 = vadd.f32 %v1007_v61, %v1000_v2  ;;  %v1008_v56 = vadd.f32 %v1006_v4, %v999_v8  ;;  %v3471_v61 = vld [vmem:[#allocation2 + $0xd] sm:$0xff]  ;;  %v3473_v4 = vld [vmem:[#allocation2 + $0x5] sm:$0xff] }
 0x1ed   :  { %v1013_v25 = vpop.permute.xlu1 %1012  ;;  %v1011_v48 = vpop.permute.xlu0 %1010 }
 0x1ee   :  { %v1016_v46 = vmul.f32 %v3449_v23, %v1013_v25  ;;  %v1015_v51 = vmul.f32 %v3449_v23, %v1011_v48 }
 0x1ef   :  { %1320 = vrot.lane.b32.xlu1 %v3419_v52, %s2073_s29  ;;  %1318 = vrot.lane.b32.xlu0 %v3421_v58, %s2073_s29 }
 0x1f0   :  { %v1018_v3 = vadd.f32 %v1016_v46, %v1009_v36  ;;  %v1017_v37 = vadd.f32 %v1015_v51, %v1008_v56 }
 0x1f1   :  { %v1022_v28 = vpop.permute.xlu1 %1021  ;;  %v1020_v55 = vpop.permute.xlu0 %1019 }
 0x1f2   :  { %v1025_v1 = vmul.f32 %v3459_v18, %v1022_v28  ;;  %v1024_v25 = vmul.f32 %v3459_v18, %v1020_v55 }
 0x1f3   :  { %1328 = vrot.lane.b32.xlu1 %v3419_v52, %s2074_s30  ;;  %1326 = vrot.lane.b32.xlu0 %v3421_v58, %s2074_s30 }
 0x1f4   :  { %v1027_v48 = vadd.f32 %v1025_v1, %v1018_v3  ;;  %v1026_v23 = vadd.f32 %v1024_v25, %v1017_v37 }
 0x1f5   :  { %v1077_v6 = vpop.permute.xlu1 %1076  ;;  %v1075_v27 = vpop.permute.xlu0 %1074 }
 0x1f6   :  { %v1959_v2 = vmul.f32 -1.442695, %v1027_v48  ;;  %v1958_v8 = vmul.f32 -1.442695, %v1026_v23  ;;  %v1079_v1 = vmul.f32 %v1077_v6, %v2422_v49  ;;  %v1078_v25 = vmul.f32 %v1075_v27, %v2422_v49  ;;  %v4192_v48 = vld [vmem:[#allocation23_spill] sm:$0xff] }
 0x1f7   :  { %1336 = vrot.lane.b32.xlu1 %v3419_v52, %s2075_s3  ;;  %1334 = vrot.lane.b32.xlu0 %v3421_v58, %s2075_s3  ;;  %v1099_v6 = vmul.f32 %v3054_v15, %v2451_v32 }
 0x1f8   :  { %1974 = vpow2.f32 %v1959_v2 }
 0x1f9   :  { %1976 = vpow2.f32 %v1958_v8  ;;  %v1085_v46 = vpop.permute.xlu1 %1084  ;;  %v1083_v51 = vpop.permute.xlu0 %1082 }
 0x1fa   :  { %v1087_v56 = vmul.f32 %v1085_v46, %v2420_v26  ;;  %v1086_v28 = vmul.f32 %v1083_v51, %v2420_v26 }
 0x1fb   :  { %1346 = vrot.lane.b32.xlu1 %v3471_v61, %s2071_s27  ;;  %1344 = vrot.lane.b32.xlu0 %v3473_v4, %s2071_s27 }
 0x1fc   :  { %v1089_v46 = vadd.f32 %v1087_v56, %v1079_v1  ;;  %v1088_v51 = vadd.f32 %v1086_v28, %v1078_v25 }
 0x1fd   :  { %v1093_v23 = vpop.permute.xlu1 %1092  ;;  %v1091_v36 = vpop.permute.xlu0 %1090 }
 0x1fe   :  { %v1095_v2 = vmul.f32 %v1093_v23, %v4192_v48  ;;  %v1094_v8 = vmul.f32 %v1091_v36, %v4192_v48 }
 0x1ff   :  { %1354 = vrot.lane.b32.xlu1 %v3471_v61, %s2070_s1  ;;  %1352 = vrot.lane.b32.xlu0 %v3473_v4, %s2070_s1 }
 0x200   :  { %v1097_v23 = vadd.f32 %v1095_v2, %v1089_v46  ;;  %v1096_v36 = vadd.f32 %v1094_v8, %v1088_v51 }
 0x201   :  { %v1105_v55 = vpop.permute.xlu1 %1104  ;;  %v1103_v3 = vpop.permute.xlu0 %1102 }
 0x202   :  { %v1975_v37 = vpop.eup %1974  ;;  %v1107_v15 = vmul.f32 %v1105_v55, %v2467_v19  ;;  %v1106_v1 = vmul.f32 %v1103_v3, %v2467_v19 }
 0x203   :  { %v1977_v18 = vpop.eup %1976  ;;  %v1035_v45 = vadd.f32 1.0, %v1975_v37  ;;  %1362 = vrot.lane.b32.xlu1 %v3471_v61, %s2072_s28  ;;  %1360 = vrot.lane.b32.xlu0 %v3473_v4, %s2072_s28  ;;  %v1098_v37 = vmul.f32 %v3056_v7, %v2451_v32 }
 0x204   :  { %v1034_v26 = vadd.f32 1.0, %v1977_v18 }
 0x205   :  { %1978 = vrcp.f32 %v1035_v45  ;;  %v1113_v49 = vpop.permute.xlu1 %1112  ;;  %v1111_v27 = vpop.permute.xlu0 %1110  ;;  %v1101_v45 = vadd.f32 %v1099_v6, %v1097_v23  ;;  %v1100_v28 = vadd.f32 %v1098_v37, %v1096_v36 }
 0x206   :  { %1980 = vrcp.f32 %v1034_v26  ;;  %v1115_v32 = vmul.f32 %v1113_v49, %v2473_v16  ;;  %v1114_v7 = vmul.f32 %v1111_v27, %v2473_v16  ;;  %v3518_v49 = vld [vmem:[#allocation2 + $0xe] sm:$0xff]  ;;  %v3520_v27 = vld [vmem:[#allocation2 + $0x6] sm:$0xff] }
 0x207   :  { %1374 = vrot.lane.b32.xlu1 %v3471_v61, %s2073_s29  ;;  %1372 = vrot.lane.b32.xlu0 %v3473_v4, %s2073_s29  ;;  %v1109_v2 = vadd.f32 %v1107_v15, %v1101_v45  ;;  %v1108_v8 = vadd.f32 %v1106_v1, %v1100_v28  ;;  %v4193_v15 = vld [vmem:[#allocation25_spill] sm:$0xff] }
 0x208   :  { %v1153_v1 = vmul.f32 %v3164_v13, %v4193_v15 }
 0x209   :  { %v1121_v18 = vpop.permute.xlu1 %1120  ;;  %v1119_v56 = vpop.permute.xlu0 %1118  ;;  %v1117_v3 = vadd.f32 %v1115_v32, %v1109_v2  ;;  %v1116_v16 = vadd.f32 %v1114_v7, %v1108_v8  ;;  %v1152_v7 = vmul.f32 %v3166_v41, %v4193_v15  ;;  %v4194_v2 = vld [vmem:[#allocation24_spill] sm:$0xff] }
 0x20a   :  { %v1123_v26 = vmul.f32 %v1121_v18, %v2483_v0  ;;  %v1122_v55 = vmul.f32 %v1119_v56, %v2483_v0 }
 0x20b   :  { %1382 = vrot.lane.b32.xlu1 %v3471_v61, %s2074_s30  ;;  %1380 = vrot.lane.b32.xlu0 %v3473_v4, %s2074_s30 }
 0x20c   :  { %v1125_v36 = vadd.f32 %v1123_v26, %v1117_v3  ;;  %v1124_v37 = vadd.f32 %v1122_v55, %v1116_v16 }
 0x20d   :  { %v1131_v25 = vpop.permute.xlu1 %1130  ;;  %v1129_v48 = vpop.permute.xlu0 %1128 }
 0x20e   :  { %v1133_v51 = vmul.f32 %v1131_v25, %v2493_v29  ;;  %v1132_v6 = vmul.f32 %v1129_v48, %v2493_v29 }
 0x20f   :  { %v1979_v46 = vpop.eup %1978  ;;  %1390 = vrot.lane.b32.xlu1 %v3471_v61, %s2075_s3  ;;  %1388 = vrot.lane.b32.xlu0 %v3473_v4, %s2075_s3 }
 0x210   :  { %v1981_v19 = vpop.eup %1980  ;;  %1041 = vst.msk [vmem:[#allocation8 + $0x8] sm:$0xff] %vm168_vm0, %v1979_v46  ;;  %v1135_v29 = vadd.f32 %v1133_v51, %v1125_v36  ;;  %v1134_v45 = vadd.f32 %v1132_v6, %v1124_v37  ;;  %v4196_v37 = vld [vmem:[#allocation27_spill] sm:$0xff] }
 0x211   :  { %1040 = vst.msk [vmem:[#allocation8] sm:$0xff] %vm168_vm0, %v1981_v19  ;;  %v1139_v0 = vpop.permute.xlu1 %1138  ;;  %v1137_v23 = vpop.permute.xlu0 %1136 }
 0x212   :  { %v1141_v18 = vmul.f32 %v1139_v0, %v2505_v43  ;;  %v1140_v56 = vmul.f32 %v1137_v23, %v2505_v43  ;;  %v4195_v0 = vld [vmem:[#allocation26_spill] sm:$0xff] }
 0x213   :  { %1400 = vrot.lane.b32.xlu1 %v3518_v49, %s2071_s27  ;;  %1398 = vrot.lane.b32.xlu0 %v3520_v27, %s2071_s27 }
 0x214   :  { %v1143_v25 = vadd.f32 %v1141_v18, %v1135_v29  ;;  %v1142_v48 = vadd.f32 %v1140_v56, %v1134_v45 }
 0x215   :  { %v1147_v28 = vpop.permute.xlu1 %1146  ;;  %v1145_v32 = vpop.permute.xlu0 %1144 }
 0x216   :  { %v1149_v43 = vmul.f32 %v1147_v28, %v4194_v2  ;;  %v1148_v8 = vmul.f32 %v1145_v32, %v4194_v2 }
 0x217   :  { %1408 = vrot.lane.b32.xlu1 %v3518_v49, %s2070_s1  ;;  %1406 = vrot.lane.b32.xlu0 %v3520_v27, %s2070_s1 }
 0x218   :  { %v1151_v26 = vadd.f32 %v1149_v43, %v1143_v25  ;;  %v1150_v55 = vadd.f32 %v1148_v8, %v1142_v48  ;;  %v3563_v43 = vld [vmem:[#allocation2 + $0x20] sm:$0xff]  ;;  %v3565_v8 = vld [vmem:[#allocation2 + $0x18] sm:$0xff] }
 0x219   :  { %v1159_v46 = vpop.permute.xlu1 %1158  ;;  %v1157_v13 = vpop.permute.xlu0 %1156 }
 0x21a   :  { %v1155_v19 = vadd.f32 %v1153_v1, %v1151_v26  ;;  %v1154_v3 = vadd.f32 %v1152_v7, %v1150_v55  ;;  %v1161_v23 = vmul.f32 %v1159_v46, %v4195_v0  ;;  %v1160_v36 = vmul.f32 %v1157_v13, %v4195_v0 }
 0x21b   :  { %1416 = vrot.lane.b32.xlu1 %v3518_v49, %s2072_s28  ;;  %1414 = vrot.lane.b32.xlu0 %v3520_v27, %s2072_s28 }
 0x21c   :  { %v1163_v28 = vadd.f32 %v1161_v23, %v1155_v19  ;;  %v1162_v15 = vadd.f32 %v1160_v36, %v1154_v3  ;;  %v4197_v36 = vld [vmem:[#allocation28_spill] sm:$0xff] }
 0x21d   :  { %v1167_v41 = vpop.permute.xlu1 %1166  ;;  %v1165_v16 = vpop.permute.xlu0 %1164 }
 0x21e   :  { %v1169_v18 = vmul.f32 %v1167_v41, %v4196_v37  ;;  %v1168_v56 = vmul.f32 %v1165_v16, %v4196_v37  ;;  %v1207_v16 = vmul.f32 %v3277_v12, %v2616_v14 }
 0x21f   :  { %1428 = vrot.lane.b32.xlu1 %v3518_v49, %s2073_s29  ;;  %1426 = vrot.lane.b32.xlu0 %v3520_v27, %s2073_s29 }
 0x220   :  { %v1171_v7 = vadd.f32 %v1169_v18, %v1163_v28  ;;  %v1170_v25 = vadd.f32 %v1168_v56, %v1162_v15 }
 0x221   :  { %v1175_v51 = vpop.permute.xlu1 %1174  ;;  %v1173_v6 = vpop.permute.xlu0 %1172 }
 0x222   :  { %v1177_v1 = vmul.f32 %v1175_v51, %v2568_v34  ;;  %v1176_v32 = vmul.f32 %v1173_v6, %v2568_v34  ;;  %v1206_v6 = vmul.f32 %v3279_v11, %v2616_v14 }
 0x223   :  { %1436 = vrot.lane.b32.xlu1 %v3518_v49, %s2074_s30  ;;  %1434 = vrot.lane.b32.xlu0 %v3520_v27, %s2074_s30 }
 0x224   :  { %v1179_v46 = vadd.f32 %v1177_v1, %v1171_v7  ;;  %v1178_v34 = vadd.f32 %v1176_v32, %v1170_v25  ;;  %v4198_v32 = vld [vmem:[#allocation29_spill] sm:$0xff] }
 0x225   :  { %v1185_v29 = vpop.permute.xlu1 %1184  ;;  %v1183_v45 = vpop.permute.xlu0 %1182 }
 0x226   :  { %v1187_v48 = vmul.f32 %v1185_v29, %v2578_v53  ;;  %v1186_v2 = vmul.f32 %v1183_v45, %v2578_v53 }
 0x227   :  { %1444 = vrot.lane.b32.xlu1 %v3518_v49, %s2075_s3  ;;  %1442 = vrot.lane.b32.xlu0 %v3520_v27, %s2075_s3 }
 0x228   :  { %v1189_v3 = vadd.f32 %v1187_v48, %v1179_v46  ;;  %v1188_v53 = vadd.f32 %v1186_v2, %v1178_v34  ;;  %v4199_v48 = vld [vmem:[#allocation30_spill] sm:$0xff] }
 0x229   :  { %v1193_v26 = vpop.permute.xlu1 %1192  ;;  %v1191_v55 = vpop.permute.xlu0 %1190 }
 0x22a   :  { %v1195_v13 = vmul.f32 %v1193_v26, %v2588_v21  ;;  %v1194_v19 = vmul.f32 %v1191_v55, %v2588_v21 }
 0x22b   :  { %1454 = vrot.lane.b32.xlu1 %v3563_v43, %s2071_s27  ;;  %1452 = vrot.lane.b32.xlu0 %v3565_v8, %s2071_s27 }
 0x22c   :  { %v1197_v0 = vadd.f32 %v1195_v13, %v1189_v3  ;;  %v1196_v23 = vadd.f32 %v1194_v19, %v1188_v53  ;;  %v4200_v19 = vld [vmem:[#allocation31_spill] sm:$0xff] }
 0x22d   :  { %v1201_v41 = vpop.permute.xlu1 %1200  ;;  %v1199_v51 = vpop.permute.xlu0 %1198 }
 0x22e   :  { %v1203_v21 = vmul.f32 %v1201_v41, %v4197_v36  ;;  %v1202_v37 = vmul.f32 %v1199_v51, %v4197_v36  ;;  %v4201_v51 = vld [vmem:[#allocation32_spill] sm:$0xff]  ;;  %v3609_v36 = vld [vmem:[#allocation2 + $0x19] sm:$0xff] }
 0x22f   :  { %1462 = vrot.lane.b32.xlu1 %v3563_v43, %s2070_s1  ;;  %1460 = vrot.lane.b32.xlu0 %v3565_v8, %s2070_s1 }
 0x230   :  { %v1205_v18 = vadd.f32 %v1203_v21, %v1197_v0  ;;  %v1204_v56 = vadd.f32 %v1202_v37, %v1196_v23  ;;  %v3607_v23 = vld [vmem:[#allocation2 + $0x21] sm:$0xff] }
 0x231   :  { %v1213_v29 = vpop.permute.xlu1 %1212  ;;  %v1211_v12 = vpop.permute.xlu0 %1210 }
 0x232   :  { %v1209_v45 = vadd.f32 %v1207_v16, %v1205_v18  ;;  %v1208_v28 = vadd.f32 %v1206_v6, %v1204_v56  ;;  %v1215_v7 = vmul.f32 %v1213_v29, %v4198_v32  ;;  %v1214_v25 = vmul.f32 %v1211_v12, %v4198_v32  ;;  %v4202_v29 = vld [vmem:[#allocation33_spill] sm:$0xff] }
 0x233   :  { %1470 = vrot.lane.b32.xlu1 %v3563_v43, %s2072_s28  ;;  %1468 = vrot.lane.b32.xlu0 %v3565_v8, %s2072_s28 }
 0x234   :  { %v1217_v34 = vadd.f32 %v1215_v7, %v1209_v45  ;;  %v1216_v13 = vadd.f32 %v1214_v25, %v1208_v28 }
 0x235   :  { %v1221_v14 = vpop.permute.xlu1 %1220  ;;  %v1219_v11 = vpop.permute.xlu0 %1218 }
 0x236   :  { %v1223_v2 = vmul.f32 %v1221_v14, %v4199_v48  ;;  %v1222_v26 = vmul.f32 %v1219_v11, %v4199_v48 }
 0x237   :  { %1482 = vrot.lane.b32.xlu1 %v3563_v43, %s2073_s29  ;;  %1480 = vrot.lane.b32.xlu0 %v3565_v8, %s2073_s29 }
 0x238   :  { %v1225_v41 = vadd.f32 %v1223_v2, %v1217_v34  ;;  %v1224_v16 = vadd.f32 %v1222_v26, %v1216_v13  ;;  %v4204_v2 = vld [vmem:[#allocation34_spill] sm:$0xff] }
 0x239   :  { %v1229_v15 = vpop.permute.xlu1 %1228  ;;  %v1227_v1 = vpop.permute.xlu0 %1226 }
 0x23a   :  { %v1231_v3 = vmul.f32 %v1229_v15, %v4200_v19  ;;  %v1230_v53 = vmul.f32 %v1227_v1, %v4200_v19  ;;  %v4203_v15 = vld [vmem:[#allocation21_spill] sm:$0xff] }
 0x23b   :  { %1490 = vrot.lane.b32.xlu1 %v3563_v43, %s2074_s30  ;;  %1488 = vrot.lane.b32.xlu0 %v3565_v8, %s2074_s30  ;;  %v1261_v1 = vmul.f32 %v3349_v40, %v4203_v15  ;;  %v1260_v7 = vmul.f32 %v3351_v63, %v4203_v15 }
 0x23c   :  { %v1233_v18 = vadd.f32 %v1231_v3, %v1225_v41  ;;  %v1232_v56 = vadd.f32 %v1230_v53, %v1224_v16 }
 0x23d   :  { %v1239_v55 = vpop.permute.xlu1 %1238  ;;  %v1237_v46 = vpop.permute.xlu0 %1236 }
 0x23e   :  { %v1241_v6 = vmul.f32 %v1239_v55, %v4201_v51  ;;  %v1240_v0 = vmul.f32 %v1237_v46, %v4201_v51  ;;  %v4205_v51 = vld [vmem:[#allocation22_spill] sm:$0xff] }
 0x23f   :  { %1498 = vrot.lane.b32.xlu1 %v3563_v43, %s2075_s3  ;;  %1496 = vrot.lane.b32.xlu0 %v3565_v8, %s2075_s3 }
 0x240   :  { %v1243_v28 = vadd.f32 %v1241_v6, %v1233_v18  ;;  %v1242_v14 = vadd.f32 %v1240_v0, %v1232_v56 }
 0x241   :  { %v1247_v21 = vpop.permute.xlu1 %1246  ;;  %v1245_v37 = vpop.permute.xlu0 %1244 }
 0x242   :  { %v1249_v12 = vmul.f32 %v1247_v21, %v4202_v29  ;;  %v1248_v45 = vmul.f32 %v1245_v37, %v4202_v29  ;;  %v4206_v21 = vld [vmem:[#allocation12_spill] sm:$0xff] }
 0x243   :  { %1508 = vrot.lane.b32.xlu1 %v3607_v23, %s2071_s27  ;;  %1506 = vrot.lane.b32.xlu0 %v3609_v36, %s2071_s27 }
 0x244   :  { %v1251_v25 = vadd.f32 %v1249_v12, %v1243_v28  ;;  %v1250_v48 = vadd.f32 %v1248_v45, %v1242_v14 }
 0x245   :  { %v1255_v11 = vpop.permute.xlu1 %1254  ;;  %v1253_v32 = vpop.permute.xlu0 %1252 }
 0x246   :  { %v1257_v26 = vmul.f32 %v1255_v11, %v4204_v2  ;;  %v1256_v55 = vmul.f32 %v1253_v32, %v4204_v2 }
 0x247   :  { %1516 = vrot.lane.b32.xlu1 %v3607_v23, %s2070_s1  ;;  %1514 = vrot.lane.b32.xlu0 %v3609_v36, %s2070_s1 }
 0x248   :  { %v1259_v46 = vadd.f32 %v1257_v26, %v1251_v25  ;;  %v1258_v34 = vadd.f32 %v1256_v55, %v1250_v48  ;;  %v3653_v25 = vld [vmem:[#allocation2 + $0x1a] sm:$0xff] }
 0x249   :  { %v1267_v13 = vpop.permute.xlu1 %1266  ;;  %v1265_v40 = vpop.permute.xlu0 %1264 }
 0x24a   :  { %v1263_v19 = vadd.f32 %v1261_v1, %v1259_v46  ;;  %v1262_v3 = vadd.f32 %v1260_v7, %v1258_v34  ;;  %v1269_v6 = vmul.f32 %v1267_v13, %v4205_v51  ;;  %v1268_v0 = vmul.f32 %v1265_v40, %v4205_v51  ;;  %v3651_v7 = vld [vmem:[#allocation2 + $0x22] sm:$0xff] }
 0x24b   :  { %1524 = vrot.lane.b32.xlu1 %v3607_v23, %s2072_s28  ;;  %1522 = vrot.lane.b32.xlu0 %v3609_v36, %s2072_s28  ;;  %v1315_v40 = vmul.f32 %v3419_v52, %v2780_v20 }
 0x24c   :  { %v1271_v12 = vadd.f32 %v1269_v6, %v1263_v19  ;;  %v1270_v45 = vadd.f32 %v1268_v0, %v1262_v3  ;;  %v1314_v3 = vmul.f32 %v3421_v58, %v2780_v20 }
 0x24d   :  { %v1275_v63 = vpop.permute.xlu1 %1274  ;;  %v1273_v53 = vpop.permute.xlu0 %1272 }
 0x24e   :  { %v1277_v37 = vmul.f32 %v1275_v63, %v4206_v21  ;;  %v1276_v18 = vmul.f32 %v1273_v53, %v4206_v21 }
 0x24f   :  { %1536 = vrot.lane.b32.xlu1 %v3607_v23, %s2073_s29  ;;  %1534 = vrot.lane.b32.xlu0 %v3609_v36, %s2073_s29 }
 0x250   :  { %v1279_v11 = vadd.f32 %v1277_v37, %v1271_v12  ;;  %v1278_v15 = vadd.f32 %v1276_v18, %v1270_v45 }
 0x251   :  { %v1283_v41 = vpop.permute.xlu1 %1282  ;;  %v1281_v16 = vpop.permute.xlu0 %1280 }
 0x252   :  { %v1285_v28 = vmul.f32 %v1283_v41, %v2732_v31  ;;  %v1284_v14 = vmul.f32 %v1281_v16, %v2732_v31  ;;  %v4207_v41 = vld [vmem:[#allocation13_spill] sm:$0xff] }
 0x253   :  { %1544 = vrot.lane.b32.xlu1 %v3607_v23, %s2074_s30  ;;  %1542 = vrot.lane.b32.xlu0 %v3609_v36, %s2074_s30 }
 0x254   :  { %v1287_v26 = vadd.f32 %v1285_v28, %v1279_v11  ;;  %v1286_v31 = vadd.f32 %v1284_v14, %v1278_v15  ;;  %v4209_v28 = vld [vmem:[#allocation15_spill] sm:$0xff] }
 0x255   :  { %v1293_v56 = vpop.permute.xlu1 %1292  ;;  %v1291_v29 = vpop.permute.xlu0 %1290 }
 0x256   :  { %v1295_v1 = vmul.f32 %v1293_v56, %v2742_v24  ;;  %v1294_v32 = vmul.f32 %v1291_v29, %v2742_v24  ;;  %v4208_v29 = vld [vmem:[#allocation14_spill] sm:$0xff] }
 0x257   :  { %1552 = vrot.lane.b32.xlu1 %v3607_v23, %s2075_s3  ;;  %1550 = vrot.lane.b32.xlu0 %v3609_v36, %s2075_s3 }
 0x258   :  { %v1297_v34 = vadd.f32 %v1295_v1, %v1287_v26  ;;  %v1296_v24 = vadd.f32 %v1294_v32, %v1286_v31 }
 0x259   :  { %v1301_v48 = vpop.permute.xlu1 %1300  ;;  %v1299_v2 = vpop.permute.xlu0 %1298 }
 0x25a   :  { %v1303_v55 = vmul.f32 %v1301_v48, %v2752_v9  ;;  %v1302_v46 = vmul.f32 %v1299_v2, %v2752_v9  ;;  %v4210_v2 = vld [vmem:[#allocation35_spill] sm:$0xff] }
 0x25b   :  { %1562 = vrot.lane.b32.xlu1 %v3651_v7, %s2071_s27  ;;  %1560 = vrot.lane.b32.xlu0 %v3653_v25, %s2071_s27 }
 0x25c   :  { %v1305_v63 = vadd.f32 %v1303_v55, %v1297_v34  ;;  %v1304_v53 = vadd.f32 %v1302_v46, %v1296_v24  ;;  %v4211_v34 = vld [vmem:[#allocation36_spill] sm:$0xff] }
 0x25d   :  { %v1309_v13 = vpop.permute.xlu1 %1308  ;;  %v1307_v19 = vpop.permute.xlu0 %1306 }
 0x25e   :  { %v1311_v9 = vmul.f32 %v1309_v13, %v4207_v41  ;;  %v1310_v16 = vmul.f32 %v1307_v19, %v4207_v41  ;;  %v3697_v19 = vld [vmem:[#allocation2 + $0x1b] sm:$0xff] }
 0x25f   :  { %1570 = vrot.lane.b32.xlu1 %v3651_v7, %s2070_s1  ;;  %1568 = vrot.lane.b32.xlu0 %v3653_v25, %s2070_s1 }
 0x260   :  { %v1313_v51 = vadd.f32 %v1311_v9, %v1305_v63  ;;  %v1312_v6 = vadd.f32 %v1310_v16, %v1304_v53  ;;  %v4212_v9 = vld [vmem:[#allocation37_spill] sm:$0xff] }
 0x261   :  { %v1321_v0 = vpop.permute.xlu1 %1320  ;;  %v1319_v52 = vpop.permute.xlu0 %1318 }
 0x262   :  { %v1317_v21 = vadd.f32 %v1315_v40, %v1313_v51  ;;  %v1316_v37 = vadd.f32 %v1314_v3, %v1312_v6  ;;  %v1323_v12 = vmul.f32 %v1321_v0, %v4208_v29  ;;  %v1322_v45 = vmul.f32 %v1319_v52, %v4208_v29  ;;  %v3695_v40 = vld [vmem:[#allocation2 + $0x23] sm:$0xff] }
 0x263   :  { %1578 = vrot.lane.b32.xlu1 %v3651_v7, %s2072_s28  ;;  %1576 = vrot.lane.b32.xlu0 %v3653_v25, %s2072_s28  ;;  %v4214_v29 = vld [vmem:[#allocation38_spill] sm:$0xff] }
 0x264   :  { %v1325_v32 = vadd.f32 %v1323_v12, %v1317_v21  ;;  %v1324_v48 = vadd.f32 %v1322_v45, %v1316_v37  ;;  %v4213_v21 = vld [vmem:[#allocation39_spill] sm:$0xff] }
 0x265   :  { %v1329_v20 = vpop.permute.xlu1 %1328  ;;  %v1327_v58 = vpop.permute.xlu0 %1326  ;;  %v1369_v37 = vmul.f32 %v3471_v61, %v4213_v21 }
 0x266   :  { %v1331_v14 = vmul.f32 %v1329_v20, %v4209_v28  ;;  %v1330_v11 = vmul.f32 %v1327_v58, %v4209_v28  ;;  %v1368_v58 = vmul.f32 %v3473_v4, %v4213_v21  ;;  %v4215_v4 = vld [vmem:[#allocation16_spill] sm:$0xff] }
 0x267   :  { %1590 = vrot.lane.b32.xlu1 %v3651_v7, %s2073_s29  ;;  %1588 = vrot.lane.b32.xlu0 %v3653_v25, %s2073_s29 }
 0x268   :  { %v1333_v55 = vadd.f32 %v1331_v14, %v1325_v32  ;;  %v1332_v46 = vadd.f32 %v1330_v11, %v1324_v48 }
 0x269   :  { %v1337_v18 = vpop.permute.xlu1 %1336  ;;  %v1335_v56 = vpop.permute.xlu0 %1334 }
 0x26a   :  { %v1339_v26 = vmul.f32 %v1337_v18, %v4210_v2  ;;  %v1338_v31 = vmul.f32 %v1335_v56, %v4210_v2 }
 0x26b   :  { %1598 = vrot.lane.b32.xlu1 %v3651_v7, %s2074_s30  ;;  %1596 = vrot.lane.b32.xlu0 %v3653_v25, %s2074_s30 }
 0x26c   :  { %v1341_v53 = vadd.f32 %v1339_v26, %v1333_v55  ;;  %v1340_v41 = vadd.f32 %v1338_v31, %v1332_v46  ;;  %v4216_v31 = vld [vmem:[#allocation17_spill] sm:$0xff] }
 0x26d   :  { %v1347_v15 = vpop.permute.xlu1 %1346  ;;  %v1345_v1 = vpop.permute.xlu0 %1344 }
 0x26e   :  { %v1349_v24 = vmul.f32 %v1347_v15, %v4211_v34  ;;  %v1348_v13 = vmul.f32 %v1345_v1, %v4211_v34 }
 0x26f   :  { %1606 = vrot.lane.b32.xlu1 %v3651_v7, %s2075_s3  ;;  %1604 = vrot.lane.b32.xlu0 %v3653_v25, %s2075_s3 }
 0x270   :  { %v1351_v6 = vadd.f32 %v1349_v24, %v1341_v53  ;;  %v1350_v0 = vadd.f32 %v1348_v13, %v1340_v41 }
 0x271   :  { %v1355_v3 = vpop.permute.xlu1 %1354  ;;  %v1353_v63 = vpop.permute.xlu0 %1352 }
 0x272   :  { %v1357_v16 = vmul.f32 %v1355_v3, %v4212_v9  ;;  %v1356_v51 = vmul.f32 %v1353_v63, %v4212_v9 }
 0x273   :  { %1616 = vrot.lane.b32.xlu1 %v3695_v40, %s2071_s27  ;;  %1614 = vrot.lane.b32.xlu0 %v3697_v19, %s2071_s27 }
 0x274   :  { %v1359_v18 = vadd.f32 %v1357_v16, %v1351_v6  ;;  %v1358_v56 = vadd.f32 %v1356_v51, %v1350_v0 }
 0x275   :  { %v1363_v52 = vpop.permute.xlu1 %1362  ;;  %v1361_v20 = vpop.permute.xlu0 %1360 }
 0x276   :  { %v1365_v12 = vmul.f32 %v1363_v52, %v4214_v29  ;;  %v1364_v45 = vmul.f32 %v1361_v20, %v4214_v29  ;;  %v3739_v20 = vld [vmem:[#allocation2 + $0x24] sm:$0xff]  ;;  %v4217_v29 = vld [vmem:[#allocation40_spill] sm:$0xff] }
 0x277   :  { %1624 = vrot.lane.b32.xlu1 %v3695_v40, %s2070_s1  ;;  %1622 = vrot.lane.b32.xlu0 %v3697_v19, %s2070_s1 }
 0x278   :  { %v1367_v28 = vadd.f32 %v1365_v12, %v1359_v18  ;;  %v1366_v14 = vadd.f32 %v1364_v45, %v1358_v56 }
 0x279   :  { %v1375_v11 = vpop.permute.xlu1 %1374  ;;  %v1373_v61 = vpop.permute.xlu0 %1372 }
 0x27a   :  { %v1371_v15 = vadd.f32 %v1369_v37, %v1367_v28  ;;  %v1370_v1 = vadd.f32 %v1368_v58, %v1366_v14  ;;  %v1377_v32 = vmul.f32 %v1375_v11, %v4215_v4  ;;  %v1376_v48 = vmul.f32 %v1373_v61, %v4215_v4  ;;  %v3741_v58 = vld [vmem:[#allocation2 + $0x1c] sm:$0xff] }
 0x27b   :  { %1632 = vrot.lane.b32.xlu1 %v3695_v40, %s2072_s28  ;;  %1630 = vrot.lane.b32.xlu0 %v3697_v19, %s2072_s28  ;;  %v4218_v61 = vld [vmem:[#allocation41_spill] sm:$0xff] }
 0x27c   :  { %v1379_v34 = vadd.f32 %v1377_v32, %v1371_v15  ;;  %v1378_v24 = vadd.f32 %v1376_v48, %v1370_v1  ;;  %v4219_v1 = vld [vmem:[#allocation42_spill] sm:$0xff] }
 0x27d   :  { %v1383_v2 = vpop.permute.xlu1 %1382  ;;  %v1381_v26 = vpop.permute.xlu0 %1380  ;;  %v1423_v4 = vmul.f32 %v3518_v49, %v4219_v1  ;;  %v1422_v48 = vmul.f32 %v3520_v27, %v4219_v1 }
 0x27e   :  { %v1385_v55 = vmul.f32 %v1383_v2, %v4216_v31  ;;  %v1384_v46 = vmul.f32 %v1381_v26, %v4216_v31 }
 0x27f   :  { %1644 = vrot.lane.b32.xlu1 %v3695_v40, %s2073_s29  ;;  %1642 = vrot.lane.b32.xlu0 %v3697_v19, %s2073_s29 }
 0x280   :  { %v1387_v63 = vadd.f32 %v1385_v55, %v1379_v34  ;;  %v1386_v53 = vadd.f32 %v1384_v46, %v1378_v24  ;;  %v4220_v24 = vld [vmem:[#allocation18_spill] sm:$0xff] }
 0x281   :  { %v1391_v13 = vpop.permute.xlu1 %1390  ;;  %v1389_v3 = vpop.permute.xlu0 %1388 }
 0x282   :  { %v1393_v41 = vmul.f32 %v1391_v13, %v2895_v44  ;;  %v1392_v9 = vmul.f32 %v1389_v3, %v2895_v44 }
 0x283   :  { %1652 = vrot.lane.b32.xlu1 %v3695_v40, %s2074_s30  ;;  %1650 = vrot.lane.b32.xlu0 %v3697_v19, %s2074_s30 }
 0x284   :  { %v1395_v16 = vadd.f32 %v1393_v41, %v1387_v63  ;;  %v1394_v51 = vadd.f32 %v1392_v9, %v1386_v53  ;;  %v4221_v41 = vld [vmem:[#allocation19_spill] sm:$0xff] }
 0x285   :  { %v1401_v6 = vpop.permute.xlu1 %1400  ;;  %v1399_v0 = vpop.permute.xlu0 %1398 }
 0x286   :  { %v1403_v52 = vmul.f32 %v1401_v6, %v2905_v60  ;;  %v1402_v21 = vmul.f32 %v1399_v0, %v2905_v60 }
 0x287   :  { %1660 = vrot.lane.b32.xlu1 %v3695_v40, %s2075_s3  ;;  %1658 = vrot.lane.b32.xlu0 %v3697_v19, %s2075_s3 }
 0x288   :  { %v1405_v44 = vadd.f32 %v1403_v52, %v1395_v16  ;;  %v1404_v37 = vadd.f32 %v1402_v21, %v1394_v51  ;;  %v4222_v21 = vld [vmem:[#allocation43_spill] sm:$0xff] }
 0x289   :  { %v1409_v18 = vpop.permute.xlu1 %1408  ;;  %v1407_v56 = vpop.permute.xlu0 %1406 }
 0x28a   :  { %v1411_v12 = vmul.f32 %v1409_v18, %v4217_v29  ;;  %v1410_v45 = vmul.f32 %v1407_v56, %v4217_v29 }
 0x28b   :  { %1670 = vrot.lane.b32.xlu1 %v3739_v20, %s2071_s27  ;;  %1668 = vrot.lane.b32.xlu0 %v3741_v58, %s2071_s27 }
 0x28c   :  { %v1413_v60 = vadd.f32 %v1411_v12, %v1405_v44  ;;  %v1412_v28 = vadd.f32 %v1410_v45, %v1404_v37  ;;  %v4223_v45 = vld [vmem:[#allocation44_spill] sm:$0xff] }
 0x28d   :  { %v1417_v14 = vpop.permute.xlu1 %1416  ;;  %v1415_v11 = vpop.permute.xlu0 %1414 }
 0x28e   :  { %v1419_v15 = vmul.f32 %v1417_v14, %v4218_v61  ;;  %v1418_v32 = vmul.f32 %v1415_v11, %v4218_v61  ;;  %v3783_v61 = vld [vmem:[#allocation2 + $0x25] sm:$0xff] }
 0x28f   :  { %1678 = vrot.lane.b32.xlu1 %v3739_v20, %s2070_s1  ;;  %1676 = vrot.lane.b32.xlu0 %v3741_v58, %s2070_s1 }
 0x290   :  { %v1421_v2 = vadd.f32 %v1419_v15, %v1413_v60  ;;  %v1420_v26 = vadd.f32 %v1418_v32, %v1412_v28  ;;  %v3785_v15 = vld [vmem:[#allocation2 + $0x1d] sm:$0xff] }
 0x291   :  { %v1429_v31 = vpop.permute.xlu1 %1428  ;;  %v1427_v55 = vpop.permute.xlu0 %1426  ;;  %v4224_v32 = vld [vmem:[#allocation45_spill] sm:$0xff] }
 0x292   :  { %v1425_v46 = vadd.f32 %v1423_v4, %v1421_v2  ;;  %v1424_v34 = vadd.f32 %v1422_v48, %v1420_v26  ;;  %v1431_v13 = vmul.f32 %v1429_v31, %v4220_v24  ;;  %v1430_v49 = vmul.f32 %v1427_v55, %v4220_v24 }
 0x293   :  { %1686 = vrot.lane.b32.xlu1 %v3739_v20, %s2072_s28  ;;  %1684 = vrot.lane.b32.xlu0 %v3741_v58, %s2072_s28 }
 0x294   :  { %v1433_v27 = vadd.f32 %v1431_v13, %v1425_v46  ;;  %v1432_v3 = vadd.f32 %v1430_v49, %v1424_v34  ;;  %v4225_v34 = vld [vmem:[#allocation46_spill] sm:$0xff]  ;;  %v4226_v13 = vld [vmem:[#allocation47_spill] sm:$0xff] }
 0x295   :  { %v1437_v63 = vpop.permute.xlu1 %1436  ;;  %v1435_v53 = vpop.permute.xlu0 %1434  ;;  %v1477_v49 = vmul.f32 %v3563_v43, %v4226_v13 }
 0x296   :  { %v1439_v9 = vmul.f32 %v1437_v63, %v4221_v41  ;;  %v1438_v16 = vmul.f32 %v1435_v53, %v4221_v41 }
 0x297   :  { %1698 = vrot.lane.b32.xlu1 %v3739_v20, %s2073_s29  ;;  %1696 = vrot.lane.b32.xlu0 %v3741_v58, %s2073_s29 }
 0x298   :  { %v1441_v51 = vadd.f32 %v1439_v9, %v1433_v27  ;;  %v1440_v6 = vadd.f32 %v1438_v16, %v1432_v3  ;;  %v1476_v3 = vmul.f32 %v3565_v8, %v4226_v13 }
 0x299   :  { %v1445_v0 = vpop.permute.xlu1 %1444  ;;  %v1443_v52 = vpop.permute.xlu0 %1442 }
 0x29a   :  { %v1447_v44 = vmul.f32 %v1445_v0, %v4222_v21  ;;  %v1446_v37 = vmul.f32 %v1443_v52, %v4222_v21 }
 0x29b   :  { %1706 = vrot.lane.b32.xlu1 %v3739_v20, %s2074_s30  ;;  %1704 = vrot.lane.b32.xlu0 %v3741_v58, %s2074_s30 }
 0x29c   :  { %v1449_v18 = vadd.f32 %v1447_v44, %v1441_v51  ;;  %v1448_v56 = vadd.f32 %v1446_v37, %v1440_v6  ;;  %v4227_v6 = vld [vmem:[#allocation20_spill] sm:$0xff] }
 0x29d   :  { %v1455_v29 = vpop.permute.xlu1 %1454  ;;  %v1453_v12 = vpop.permute.xlu0 %1452 }
 0x29e   :  { %v1457_v60 = vmul.f32 %v1455_v29, %v4223_v45  ;;  %v1456_v28 = vmul.f32 %v1453_v12, %v4223_v45 }
 0x29f   :  { %1714 = vrot.lane.b32.xlu1 %v3739_v20, %s2075_s3  ;;  %1712 = vrot.lane.b32.xlu0 %v3741_v58, %s2075_s3 }
 0x2a0   :  { %v1459_v14 = vadd.f32 %v1457_v60, %v1449_v18  ;;  %v1458_v11 = vadd.f32 %v1456_v28, %v1448_v56  ;;  %v4228_v56 = vld [vmem:[#allocation48_spill] sm:$0xff] }
 0x2a1   :  { %v1463_v1 = vpop.permute.xlu1 %1462  ;;  %v1461_v4 = vpop.permute.xlu0 %1460 }
 0x2a2   :  { %v1465_v48 = vmul.f32 %v1463_v1, %v4224_v32  ;;  %v1464_v2 = vmul.f32 %v1461_v4, %v4224_v32  ;;  %v4229_v4 = vld [vmem:[#allocation49_spill] sm:$0xff] }
 0x2a3   :  { %1724 = vrot.lane.b32.xlu1 %v3783_v61, %s2071_s27  ;;  %1722 = vrot.lane.b32.xlu0 %v3785_v15, %s2071_s27 }
 0x2a4   :  { %v1467_v26 = vadd.f32 %v1465_v48, %v1459_v14  ;;  %v1466_v31 = vadd.f32 %v1464_v2, %v1458_v11  ;;  %v3827_v2 = vld [vmem:[#allocation2 + $0x26] sm:$0xff] }
 0x2a5   :  { %v1471_v55 = vpop.permute.xlu1 %1470  ;;  %v1469_v46 = vpop.permute.xlu0 %1468 }
 0x2a6   :  { %v1473_v24 = vmul.f32 %v1471_v55, %v4225_v34  ;;  %v1472_v27 = vmul.f32 %v1469_v46, %v4225_v34  ;;  %v4230_v34 = vld [vmem:[#allocation50_spill] sm:$0xff] }
 0x2a7   :  { %1732 = vrot.lane.b32.xlu1 %v3783_v61, %s2070_s1  ;;  %1730 = vrot.lane.b32.xlu0 %v3785_v15, %s2070_s1 }
 0x2a8   :  { %v1475_v63 = vadd.f32 %v1473_v24, %v1467_v26  ;;  %v1474_v53 = vadd.f32 %v1472_v27, %v1466_v31  ;;  %v3829_v26 = vld [vmem:[#allocation2 + $0x1e] sm:$0xff] }
 0x2a9   :  { %v1483_v41 = vpop.permute.xlu1 %1482  ;;  %v1481_v9 = vpop.permute.xlu0 %1480 }
 0x2aa   :  { %v1479_v16 = vadd.f32 %v1477_v49, %v1475_v63  ;;  %v1478_v51 = vadd.f32 %v1476_v3, %v1474_v53  ;;  %v1485_v0 = vmul.f32 %v1483_v41, %v4227_v6  ;;  %v1484_v43 = vmul.f32 %v1481_v9, %v4227_v6  ;;  %v4231_v63 = vld [vmem:[#allocation52_spill] sm:$0xff]  ;;  %v4232_v6 = vld [vmem:[#allocation51_spill] sm:$0xff] }
 0x2ab   :  { %1740 = vrot.lane.b32.xlu1 %v3783_v61, %s2072_s28  ;;  %1738 = vrot.lane.b32.xlu0 %v3785_v15, %s2072_s28  ;;  %v1531_v53 = vmul.f32 %v3607_v23, %v4231_v63  ;;  %v1530_v9 = vmul.f32 %v3609_v36, %v4231_v63 }
 0x2ac   :  { %v1487_v8 = vadd.f32 %v1485_v0, %v1479_v16  ;;  %v1486_v52 = vadd.f32 %v1484_v43, %v1478_v51 }
 0x2ad   :  { %v1491_v21 = vpop.permute.xlu1 %1490  ;;  %v1489_v44 = vpop.permute.xlu0 %1488 }
 0x2ae   :  { %v1493_v29 = vmul.f32 %v1491_v21, %v4228_v56  ;;  %v1492_v12 = vmul.f32 %v1489_v44, %v4228_v56 }
 0x2af   :  { %1752 = vrot.lane.b32.xlu1 %v3783_v61, %s2073_s29  ;;  %1750 = vrot.lane.b32.xlu0 %v3785_v15, %s2073_s29 }
 0x2b0   :  { %v1495_v11 = vadd.f32 %v1493_v29, %v1487_v8  ;;  %v1494_v1 = vadd.f32 %v1492_v12, %v1486_v52  ;;  %v4233_v12 = vld [vmem:[#allocation53_spill] sm:$0xff] }
 0x2b1   :  { %v1499_v37 = vpop.permute.xlu1 %1498  ;;  %v1497_v18 = vpop.permute.xlu0 %1496 }
 0x2b2   :  { %v1501_v28 = vmul.f32 %v1499_v37, %v3058_v22  ;;  %v1500_v14 = vmul.f32 %v1497_v18, %v3058_v22 }
 0x2b3   :  { %1760 = vrot.lane.b32.xlu1 %v3783_v61, %s2074_s30  ;;  %1758 = vrot.lane.b32.xlu0 %v3785_v15, %s2074_s30 }
 0x2b4   :  { %v1503_v46 = vadd.f32 %v1501_v28, %v1495_v11  ;;  %v1502_v22 = vadd.f32 %v1500_v14, %v1494_v1  ;;  %v4234_v28 = vld [vmem:[#allocation54_spill] sm:$0xff] }
 0x2b5   :  { %v1509_v45 = vpop.permute.xlu1 %1508  ;;  %v1507_v60 = vpop.permute.xlu0 %1506 }
 0x2b6   :  { %v1511_v32 = vmul.f32 %v1509_v45, %v4229_v4  ;;  %v1510_v48 = vmul.f32 %v1507_v60, %v4229_v4 }
 0x2b7   :  { %1768 = vrot.lane.b32.xlu1 %v3783_v61, %s2075_s3  ;;  %1766 = vrot.lane.b32.xlu0 %v3785_v15, %s2075_s3 }
 0x2b8   :  { %v1513_v49 = vadd.f32 %v1511_v32, %v1503_v46  ;;  %v1512_v27 = vadd.f32 %v1510_v48, %v1502_v22 }
 0x2b9   :  { %v1517_v31 = vpop.permute.xlu1 %1516  ;;  %v1515_v55 = vpop.permute.xlu0 %1514 }
 0x2ba   :  { %v1519_v24 = vmul.f32 %v1517_v31, %v4230_v34  ;;  %v1518_v13 = vmul.f32 %v1515_v55, %v4230_v34  ;;  %v4235_v31 = vld [vmem:[#allocation55_spill] sm:$0xff] }
 0x2bb   :  { %1778 = vrot.lane.b32.xlu1 %v3827_v2, %s2071_s27  ;;  %1776 = vrot.lane.b32.xlu0 %v3829_v26, %s2071_s27 }
 0x2bc   :  { %v1521_v16 = vadd.f32 %v1519_v24, %v1513_v49  ;;  %v1520_v51 = vadd.f32 %v1518_v13, %v1512_v27  ;;  %v4236_v24 = vld [vmem:[#allocation56_spill] sm:$0xff] }
 0x2bd   :  { %v1525_v3 = vpop.permute.xlu1 %1524  ;;  %v1523_v41 = vpop.permute.xlu0 %1522 }
 0x2be   :  { %v1527_v0 = vmul.f32 %v1525_v3, %v4232_v6  ;;  %v1526_v43 = vmul.f32 %v1523_v41, %v4232_v6  ;;  %v4237_v41 = vld [vmem:[#allocation57_spill] sm:$0xff] }
 0x2bf   :  { %1786 = vrot.lane.b32.xlu1 %v3827_v2, %s2070_s1  ;;  %1784 = vrot.lane.b32.xlu0 %v3829_v26, %s2070_s1  ;;  %s2076_s1 = smov [#allocation8]  }
 0x2c0   :  { %v1529_v8 = vadd.f32 %v1527_v0, %v1521_v16  ;;  %v1528_v52 = vadd.f32 %v1526_v43, %v1520_v51  ;;  %s1848_s27 = sshll.u32 %s2076_s1, 4  ;;  %s1849_s27 = int_to_ptr.vmem [resolvable:$true] %s1848_s27 }
 0x2c1   :  { %v1537_v21 = vpop.permute.xlu1 %1536  ;;  %v1535_v23 = vpop.permute.xlu0 %1534  ;;  %p2042_p0 = scmp.lt.s32.totalorder %s1849_s27, %s1849_s27 }
 0x2c2   :  { %v1533_v44 = vadd.f32 %v1531_v53, %v1529_v8  ;;  %v1532_v37 = vadd.f32 %v1530_v9, %v1528_v52  ;;  %v1539_v45 = vmul.f32 %v1537_v21, %v4233_v12  ;;  %v1538_v60 = vmul.f32 %v1535_v23, %v4233_v12  ;;  %v4238_v8 = vld [vmem:[#allocation59_spill] sm:$0xff] }
 0x2c3   :  { %1794 = vrot.lane.b32.xlu1 %v3827_v2, %s2072_s28  ;;  %1792 = vrot.lane.b32.xlu0 %v3829_v26, %s2072_s28  ;;  %v1585_v52 = vmul.f32 %v3651_v7, %v4238_v8  ;;  %v1584_v21 = vmul.f32 %v3653_v25, %v4238_v8  ;;  %s2037_s28 = scalar_lea.vmem %s1849_s27, 512 }
 0x2c4   :  { %v1541_v32 = vadd.f32 %v1539_v45, %v1533_v44  ;;  %v1540_v48 = vadd.f32 %v1538_v60, %v1532_v37  ;;  %v4239_v37 = vld [vmem:[#allocation58_spill] sm:$0xff]  ;;  %p2038_p13 = scmp.ne.s32.totalorder %s1849_s27, %s2037_s28  ;;  %p2043_p1 = scmp.lt.s32.totalorder %s2037_s28, %s2037_s28 }
 0x2c5   :  { %v1545_v36 = vpop.permute.xlu1 %1544  ;;  %v1543_v18 = vpop.permute.xlu0 %1542 }
 0x2c6   :  { %v1547_v14 = vmul.f32 %v1545_v36, %v4234_v28  ;;  %v1546_v11 = vmul.f32 %v1543_v18, %v4234_v28  ;;  %p2044_p2 = por %p2043_p1, %p2042_p0 }
 0x2c7   :  { %1806 = vrot.lane.b32.xlu1 %v3827_v2, %s2073_s29  ;;  %1804 = vrot.lane.b32.xlu0 %v3829_v26, %s2073_s29 }
 0x2c8   :  { %v1549_v22 = vadd.f32 %v1547_v14, %v1541_v32  ;;  %v1548_v34 = vadd.f32 %v1546_v11, %v1540_v48  ;;  %p2045_p3 = pnand %p2044_p2, %p2038_p13 }
 0x2c9   :  { %v1553_v56 = vpop.permute.xlu1 %1552  ;;  %v1551_v29 = vpop.permute.xlu0 %1550 }
 0x2ca   :  { %v1555_v55 = vmul.f32 %v1553_v56, %v4235_v31  ;;  %v1554_v46 = vmul.f32 %v1551_v29, %v4235_v31 }
 0x2cb   :  { %1814 = vrot.lane.b32.xlu1 %v3827_v2, %s2074_s30  ;;  %1812 = vrot.lane.b32.xlu0 %v3829_v26, %s2074_s30 }
 0x2cc   :  { %v1557_v63 = vadd.f32 %v1555_v55, %v1549_v22  ;;  %v1556_v53 = vadd.f32 %v1554_v46, %v1548_v34 }
 0x2cd   :  { %v1563_v1 = vpop.permute.xlu1 %1562  ;;  %v1561_v4 = vpop.permute.xlu0 %1560 }
 0x2ce   :  { %v1565_v13 = vmul.f32 %v1563_v1, %v4236_v24  ;;  %v1564_v49 = vmul.f32 %v1561_v4, %v4236_v24 }
 0x2cf   :  { %1822 = vrot.lane.b32.xlu1 %v3827_v2, %s2075_s3  ;;  %1820 = vrot.lane.b32.xlu0 %v3829_v26, %s2075_s3 }
 0x2d0   :  { %v1567_v51 = vadd.f32 %v1565_v13, %v1557_v63  ;;  %v1566_v6 = vadd.f32 %v1564_v49, %v1556_v53 }
 0x2d1   :  { %v1571_v27 = vpop.permute.xlu1 %1570  ;;  %v1569_v3 = vpop.permute.xlu0 %1568 }
 0x2d2   :  { %v1573_v9 = vmul.f32 %v1571_v27, %v4237_v41  ;;  %v1572_v16 = vmul.f32 %v1569_v3, %v4237_v41 }
 0x2d4   :  { %v1575_v23 = vadd.f32 %v1573_v9, %v1567_v51  ;;  %v1574_v44 = vadd.f32 %v1572_v16, %v1566_v6 }
 0x2d5   :  { %v1579_v0 = vpop.permute.xlu1 %1578  ;;  %v1577_v43 = vpop.permute.xlu0 %1576 }
 0x2d6   :  { %v1581_v36 = vmul.f32 %v1579_v0, %v4239_v37  ;;  %v1580_v18 = vmul.f32 %v1577_v43, %v4239_v37  ;;  %v1638_v43 = vmul.f32 %v3697_v19, %v3271_v47  ;;  %v4242_v19 = vld [vmem:[#allocation62_spill] sm:$0xff] }
 0x2d8   :  { %v1583_v56 = vadd.f32 %v1581_v36, %v1575_v23  ;;  %v1582_v29 = vadd.f32 %v1580_v18, %v1574_v44 }
 0x2d9   :  { %v1591_v12 = vpop.permute.xlu1 %1590  ;;  %v1589_v45 = vpop.permute.xlu0 %1588 }
 0x2da   :  { %v1587_v60 = vadd.f32 %v1585_v52, %v1583_v56  ;;  %v1586_v28 = vadd.f32 %v1584_v21, %v1582_v29  ;;  %v1593_v7 = vmul.f32 %v1591_v12, %v3207_v30  ;;  %v1592_v25 = vmul.f32 %v1589_v45, %v3207_v30  ;;  %v4240_v52 = vld [vmem:[#allocation60_spill] sm:$0xff] }
 0x2dc   :  { %v1595_v46 = vadd.f32 %v1593_v7, %v1587_v60  ;;  %v1594_v22 = vadd.f32 %v1592_v25, %v1586_v28 }
 0x2dd   :  { %v1599_v14 = vpop.permute.xlu1 %1598  ;;  %v1597_v11 = vpop.permute.xlu0 %1596 }
 0x2de   :  { %v1601_v32 = vmul.f32 %v1599_v14, %v3214_v10  ;;  %v1600_v48 = vmul.f32 %v1597_v11, %v3214_v10 }
 0x2e0   :  { %v1603_v13 = vadd.f32 %v1601_v32, %v1595_v46  ;;  %v1602_v49 = vadd.f32 %v1600_v48, %v1594_v22  ;;  %v4243_v32 = vld [vmem:[#allocation63_spill] sm:$0xff] }
 0x2e1   :  { %v1607_v1 = vpop.permute.xlu1 %1606  ;;  %v1605_v4 = vpop.permute.xlu0 %1604 }
 0x2e2   :  { %v1609_v34 = vmul.f32 %v1607_v1, %v3227_v33  ;;  %v1608_v24 = vmul.f32 %v1605_v4, %v3227_v33  ;;  %v1639_v33 = vmul.f32 %v3695_v40, %v3271_v47  ;;  %v4241_v40 = vld [vmem:[#allocation61_spill] sm:$0xff] }
 0x2e4   :  { %v1611_v53 = vadd.f32 %v1609_v34, %v1603_v13  ;;  %v1610_v41 = vadd.f32 %v1608_v24, %v1602_v49 }
 0x2e5   :  { %v1617_v31 = vpop.permute.xlu1 %1616  ;;  %v1615_v55 = vpop.permute.xlu0 %1614 }
 0x2e6   :  { %v1619_v27 = vmul.f32 %v1617_v31, %v3240_v59  ;;  %v1618_v3 = vmul.f32 %v1615_v55, %v3240_v59 }
 0x2e8   :  { %v1621_v16 = vadd.f32 %v1619_v27, %v1611_v53  ;;  %v1620_v51 = vadd.f32 %v1618_v3, %v1610_v41  ;;  %v4244_v3 = vld [vmem:[#allocation64_spill] sm:$0xff] }
 0x2e9   :  { %v1625_v63 = vpop.permute.xlu1 %1624  ;;  %v1623_v30 = vpop.permute.xlu0 %1622 }
 0x2ea   :  { %v1627_v10 = vmul.f32 %v1625_v63, %v3250_v39  ;;  %v1626_v9 = vmul.f32 %v1623_v30, %v3250_v39 }
 0x2ec   :  { %v1629_v8 = vadd.f32 %v1627_v10, %v1621_v16  ;;  %v1628_v59 = vadd.f32 %v1626_v9, %v1620_v51  ;;  %v4245_v16 = vld [vmem:[#allocation66_spill] sm:$0xff] }
 0x2ed   :  { %v1633_v6 = vpop.permute.xlu1 %1632  ;;  %v1631_v0 = vpop.permute.xlu0 %1630  ;;  %v1693_v51 = vmul.f32 %v3739_v20, %v4245_v16  ;;  %v4247_v20 = vld [vmem:[#allocation67_spill] sm:$0xff] }
 0x2ee   :  { %v1635_v21 = vmul.f32 %v1633_v6, %v4240_v52  ;;  %v1634_v23 = vmul.f32 %v1631_v0, %v4240_v52  ;;  %v1692_v6 = vmul.f32 %v3741_v58, %v4245_v16 }
 0x2f0   :  { %v1637_v44 = vadd.f32 %v1635_v21, %v1629_v8  ;;  %v1636_v37 = vadd.f32 %v1634_v23, %v1628_v59 }
 0x2f1   :  { %v1645_v36 = vpop.permute.xlu1 %1644  ;;  %v1643_v39 = vpop.permute.xlu0 %1642 }
 0x2f2   :  { %v1641_v18 = vadd.f32 %v1639_v33, %v1637_v44  ;;  %v1640_v56 = vadd.f32 %v1638_v43, %v1636_v37  ;;  %v1647_v28 = vmul.f32 %v1645_v36, %v4241_v40  ;;  %v1646_v47 = vmul.f32 %v1643_v39, %v4241_v40  ;;  %v4246_v33 = vld [vmem:[#allocation65_spill] sm:$0xff] }
 0x2f4   :  { %v1649_v7 = vadd.f32 %v1647_v28, %v1641_v18  ;;  %v1648_v25 = vadd.f32 %v1646_v47, %v1640_v56 }
 0x2f5   :  { %v1653_v29 = vpop.permute.xlu1 %1652  ;;  %v1651_v12 = vpop.permute.xlu0 %1650 }
 0x2f6   :  { %v1655_v14 = vmul.f32 %v1653_v29, %v4242_v19  ;;  %v1654_v11 = vmul.f32 %v1651_v12, %v4242_v19  ;;  %v4248_v12 = vld [vmem:[#allocation68_spill] sm:$0xff] }
 0x2f8   :  { %v1657_v55 = vadd.f32 %v1655_v14, %v1649_v7  ;;  %v1656_v46 = vadd.f32 %v1654_v11, %v1648_v25 }
 0x2f9   :  { %v1661_v45 = vpop.permute.xlu1 %1660  ;;  %v1659_v60 = vpop.permute.xlu0 %1658 }
 0x2fa   :  { %v1663_v48 = vmul.f32 %v1661_v45, %v4243_v32  ;;  %v1662_v31 = vmul.f32 %v1659_v60, %v4243_v32 }
 0x2fc   :  { %v1665_v49 = vadd.f32 %v1663_v48, %v1657_v55  ;;  %v1664_v27 = vadd.f32 %v1662_v31, %v1656_v46 }
 0x2fd   :  { %v1671_v1 = vpop.permute.xlu1 %1670  ;;  %v1669_v4 = vpop.permute.xlu0 %1668 }
 0x2fe   :  { %v1673_v22 = vmul.f32 %v1671_v1, %v3307_v38  ;;  %v1672_v34 = vmul.f32 %v1669_v4, %v3307_v38 }
 0x300   :  { %v1675_v53 = vadd.f32 %v1673_v22, %v1665_v49  ;;  %v1674_v41 = vadd.f32 %v1672_v34, %v1664_v27  ;;  %v1746_v27 = vmul.f32 %v3785_v15, %v3379_v54  ;;  %v4249_v15 = vld [vmem:[#allocation69_spill] sm:$0xff] }
 0x301   :  { %v1679_v24 = vpop.permute.xlu1 %1678  ;;  %v1677_v13 = vpop.permute.xlu0 %1676 }
 0x302   :  { %v1681_v63 = vmul.f32 %v1679_v24, %v4244_v3  ;;  %v1680_v30 = vmul.f32 %v1677_v13, %v4244_v3 }
 0x304   :  { %v1683_v0 = vadd.f32 %v1681_v63, %v1675_v53  ;;  %v1682_v38 = vadd.f32 %v1680_v30, %v1674_v41 }
 0x305   :  { %v1687_v10 = vpop.permute.xlu1 %1686  ;;  %v1685_v9 = vpop.permute.xlu0 %1684 }
 0x306   :  { %v1689_v43 = vmul.f32 %v1687_v10, %v4246_v33  ;;  %v1688_v8 = vmul.f32 %v1685_v9, %v4246_v33 }
 0x308   :  { %v1691_v59 = vadd.f32 %v1689_v43, %v1683_v0  ;;  %v1690_v52 = vadd.f32 %v1688_v8, %v1682_v38 }
 0x309   :  { %v1699_v21 = vpop.permute.xlu1 %1698  ;;  %v1697_v23 = vpop.permute.xlu0 %1696 }
 0x30a   :  { %v1695_v44 = vadd.f32 %v1693_v51, %v1691_v59  ;;  %v1694_v37 = vadd.f32 %v1692_v6, %v1690_v52  ;;  %v1701_v29 = vmul.f32 %v1699_v21, %v4247_v20  ;;  %v1700_v58 = vmul.f32 %v1697_v23, %v4247_v20  ;;  %v4250_v21 = vld [vmem:[#allocation70_spill] sm:$0xff] }
 0x30c   :  { %v1703_v47 = vadd.f32 %v1701_v29, %v1695_v44  ;;  %v1702_v19 = vadd.f32 %v1700_v58, %v1694_v37 }
 0x30d   :  { %v1707_v36 = vpop.permute.xlu1 %1706  ;;  %v1705_v39 = vpop.permute.xlu0 %1704 }
 0x30e   :  { %v1709_v45 = vmul.f32 %v1707_v36, %v4248_v12  ;;  %v1708_v60 = vmul.f32 %v1705_v39, %v4248_v12 }
 0x310   :  { %v1711_v1 = vadd.f32 %v1709_v45, %v1703_v47  ;;  %v1710_v4 = vadd.f32 %v1708_v60, %v1702_v19  ;;  %v4251_v47 = vld [vmem:[#allocation71_spill] sm:$0xff] }
 0x311   :  { %v1715_v18 = vpop.permute.xlu1 %1714  ;;  %v1713_v56 = vpop.permute.xlu0 %1712  ;;  %v1801_v19 = vmul.f32 %v3827_v2, %v4251_v47 }
 0x312   :  { %v1717_v14 = vmul.f32 %v1715_v18, %v3353_v42  ;;  %v1716_v11 = vmul.f32 %v1713_v56, %v3353_v42  ;;  %v1747_v42 = vmul.f32 %v3783_v61, %v3379_v54 }
 0x314   :  { %v1719_v31 = vadd.f32 %v1717_v14, %v1711_v1  ;;  %v1718_v55 = vadd.f32 %v1716_v11, %v1710_v4  ;;  %v1800_v14 = vmul.f32 %v3829_v26, %v4251_v47  ;;  %v4252_v1 = vld [vmem:[#allocation72_spill] sm:$0xff] }
 0x315   :  { %v1725_v40 = vpop.permute.xlu1 %1724  ;;  %v1723_v28 = vpop.permute.xlu0 %1722 }
 0x316   :  { %v1727_v7 = vmul.f32 %v1725_v40, %v3357_v5  ;;  %v1726_v25 = vmul.f32 %v1723_v28, %v3357_v5 }
 0x318   :  { %v1729_v34 = vadd.f32 %v1727_v7, %v1719_v31  ;;  %v1728_v24 = vadd.f32 %v1726_v25, %v1718_v55 }
 0x319   :  { %v1733_v32 = vpop.permute.xlu1 %1732  ;;  %v1731_v48 = vpop.permute.xlu0 %1730 }
 0x31a   :  { %v1735_v46 = vmul.f32 %v1733_v32, %v3365_v62  ;;  %v1734_v22 = vmul.f32 %v1731_v48, %v3365_v62 }
 0x31c   :  { %v1737_v3 = vadd.f32 %v1735_v46, %v1729_v34  ;;  %v1736_v5 = vadd.f32 %v1734_v22, %v1728_v24  ;;  %v4253_v46 = vld [vmem:[#allocation73_spill] sm:$0xff] }
 0x31d   :  { %v1741_v13 = vpop.permute.xlu1 %1740  ;;  %v1739_v49 = vpop.permute.xlu0 %1738 }
 0x31e   :  { %v1743_v63 = vmul.f32 %v1741_v13, %v3369_v57  ;;  %v1742_v30 = vmul.f32 %v1739_v49, %v3369_v57  ;;  %v4254_v13 = vld [vmem:[#allocation74_spill] sm:$0xff] }
 0x320   :  { %v1745_v53 = vadd.f32 %v1743_v63, %v1737_v3  ;;  %v1744_v41 = vadd.f32 %v1742_v30, %v1736_v5 }
 0x321   :  { %v1753_v10 = vpop.permute.xlu1 %1752  ;;  %v1751_v62 = vpop.permute.xlu0 %1750 }
 0x322   :  { %v1749_v9 = vadd.f32 %v1747_v42, %v1745_v53  ;;  %v1748_v16 = vadd.f32 %v1746_v27, %v1744_v41  ;;  %v1755_v61 = vmul.f32 %v1753_v10, %v3389_v17  ;;  %v1754_v54 = vmul.f32 %v1751_v62, %v3389_v17  ;;  %v4255_v53 = vld [vmem:[#allocation75_spill] sm:$0xff] }
 0x324   :  { %v1757_v59 = vadd.f32 %v1755_v61, %v1749_v9  ;;  %v1756_v52 = vadd.f32 %v1754_v54, %v1748_v16 }
 0x325   :  { %v1761_v51 = vpop.permute.xlu1 %1760  ;;  %v1759_v6 = vpop.permute.xlu0 %1758 }
 0x326   :  { %v1763_v33 = vmul.f32 %v1761_v51, %v4249_v15  ;;  %v1762_v43 = vmul.f32 %v1759_v6, %v4249_v15 }
 0x328   :  { %v1765_v37 = vadd.f32 %v1763_v33, %v1757_v59  ;;  %v1764_v36 = vadd.f32 %v1762_v43, %v1756_v52 }
 0x329   :  { %v1769_v0 = vpop.permute.xlu1 %1768  ;;  %v1767_v38 = vpop.permute.xlu0 %1766 }
 0x32a   :  { %v1771_v23 = vmul.f32 %v1769_v0, %v4250_v21  ;;  %v1770_v44 = vmul.f32 %v1767_v38, %v4250_v21 }
 0x32c   :  { %v1773_v20 = vadd.f32 %v1771_v23, %v1765_v37  ;;  %v1772_v29 = vadd.f32 %v1770_v44, %v1764_v36 }
 0x32d   :  { %v1779_v8 = vpop.permute.xlu1 %1778  ;;  %v1777_v57 = vpop.permute.xlu0 %1776 }
 0x32e   :  { %v1781_v39 = vmul.f32 %v1779_v8, %v3407_v50  ;;  %v1780_v18 = vmul.f32 %v1777_v57, %v3407_v50 }
 0x330   :  { %v1783_v45 = vadd.f32 %v1781_v39, %v1773_v20  ;;  %v1782_v60 = vadd.f32 %v1780_v18, %v1772_v29 }
 0x331   :  { %v1787_v56 = vpop.permute.xlu1 %1786  ;;  %v1785_v17 = vpop.permute.xlu0 %1784 }
 0x332   :  { %v1789_v58 = vmul.f32 %v1787_v56, %v3415_v35  ;;  %v1788_v12 = vmul.f32 %v1785_v17, %v3415_v35 }
 0x334   :  { %v1791_v11 = vadd.f32 %v1789_v58, %v1783_v45  ;;  %v1790_v50 = vadd.f32 %v1788_v12, %v1782_v60 }
 0x335   :  { %v1795_v40 = vpop.permute.xlu1 %1794  ;;  %v1793_v28 = vpop.permute.xlu0 %1792 }
 0x336   :  { %v1797_v4 = vmul.f32 %v1795_v40, %v4252_v1  ;;  %v1796_v7 = vmul.f32 %v1793_v28, %v4252_v1 }
 0x338   :  { %v1799_v25 = vadd.f32 %v1797_v4, %v1791_v11  ;;  %v1798_v32 = vadd.f32 %v1796_v7, %v1790_v50 }
 0x339   :  { %v1807_v48 = vpop.permute.xlu1 %1806  ;;  %v1805_v35 = vpop.permute.xlu0 %1804 }
 0x33a   :  { %v1803_v31 = vadd.f32 %v1801_v19, %v1799_v25  ;;  %v1802_v55 = vadd.f32 %v1800_v14, %v1798_v32  ;;  %v1809_v22 = vmul.f32 %v1807_v48, %v4253_v46  ;;  %v1808_v34 = vmul.f32 %v1805_v35, %v4253_v46 }
 0x33c   :  { %v1811_v42 = vadd.f32 %v1809_v22, %v1803_v31  ;;  %v1810_v27 = vadd.f32 %v1808_v34, %v1802_v55 }
 0x33d   :  { %v1815_v2 = vpop.permute.xlu1 %1814  ;;  %v1813_v24 = vpop.permute.xlu0 %1812 }
 0x33e   :  { %v1817_v26 = vmul.f32 %v1815_v2, %v4254_v13  ;;  %v1816_v49 = vmul.f32 %v1813_v24, %v4254_v13 }
 0x340   :  { %v1819_v63 = vadd.f32 %v1817_v26, %v1811_v42  ;;  %v1818_v30 = vadd.f32 %v1816_v49, %v1810_v27 }
 0x341   :  { %v1823_v3 = vpop.permute.xlu1 %1822  ;;  %v1821_v5 = vpop.permute.xlu0 %1820 }
 0x342   :  { %v1825_v41 = vmul.f32 %v1823_v3, %v4255_v53  ;;  %v1824_v10 = vmul.f32 %v1821_v5, %v4255_v53 }
 0x344   :  { %v1827_v62 = vadd.f32 %v1825_v41, %v1819_v63  ;;  %v1826_v9 = vadd.f32 %v1824_v10, %v1818_v30 }
 0x346   :  { %v1961_v16 = vmul.f32 -1.442695, %v1827_v62  ;;  %v1960_v51 = vmul.f32 -1.442695, %v1826_v9 }
 0x348   :  { %1982 = vpow2.f32 %v1961_v16 }
 0x349   :  { %1984 = vpow2.f32 %v1960_v51 }
 0x352   :  { %v1983_v6 = vpop.eup %1982 }
 0x353   :  { %v1985_v0 = vpop.eup %1984  ;;  %v1835_v38 = vadd.f32 1.0, %v1983_v6 }
 0x354   :  { %v1834_v61 = vadd.f32 1.0, %v1985_v0 }
 0x355   :  { %1986 = vrcp.f32 %v1835_v38 }
 0x356   :  { %1988 = vrcp.f32 %v1834_v61 }
 0x35f   :  { %v1987_v54 = vpop.eup %1986 }
 0x360   :  { %v1989_v15 = vpop.eup %1988  ;;  %1842 = vst.msk [vmem:[#allocation8 + $0x18] sm:$0xff] %vm168_vm0, %v1987_v54 }
 0x361   :  { %1841 = vst.msk [vmem:[#allocation8 + $0x10] sm:$0xff] %vm168_vm0, %v1989_v15 }
 0x362   :  { %2048 = shalt.err (!%p2045_p3)
}
 0x363   :  { %s2049_s3 = scalar_lea.hbm %s3968_s2, 512 }
 0x364   :  { %p2050_p4 = scmp.ne.s32.totalorder %s3968_s2, %s2049_s3  ;;  %p2053_p5 = scmp.lt.u32.totalorder %s2049_s3, %s3968_s2 }
 0x366   :  { %p2055_p6 = pnand %p2053_p5, %p2050_p4 }
 0x368   :  { %2058 = shalt.err (!%p2055_p6)
}
 0x369   :  { %1854 = dma.vmem_to_hbm [thread:$0]  %s1849_s27, 512, %s3968_s2, [#allocation5], %s2067_s23, %s2067_s23, %s2068_s24  }
 0x36a   :  { %2063 = dma.done.wait [#allocation5], 512  }
 0x36b   :  { %2064 = vsyncadd [#allocation5], 4294966784 }
 0x36c   :  { %1858 = vsyncpa [#allocation4], 1 }
 0x36d   :  { %1859 = vsyncpa [#allocation5], 1 }
 0x36e   :  { %1860 = vsyncpa [#allocation6], 1 }

</bundles_post_ra>
